<compile_context>
chip_gen: v7x
topology: tpu7x:2x2x1
jax: 0.10.0
libtpu: 0.0.40
codegen_flags: <defaults>
</compile_context>

<pallas_src>
import numpy as np
import jax
import jax.numpy as jnp
from jax import lax
from jax.experimental import pallas as pl
from jax.experimental.pallas import tpu as pltpu

IGNORE_ID = -1


def _make_kernel(B, BP, T_out):
    def decoder_kernel(emb_ref, tgt_ref, encT_ref, enc2d_ref,
                       wx0_ref, wc0_ref, whh0_ref, b0_ref,
                       wih1_ref, whh1_ref, b1_ref,
                       w1h_ref, w1c_ref, bl1_ref, w2_ref, b2_ref,
                       loss_ref, cnt_ref,
                       g0x_buf, hbuf, cbuf):
        M8, E = emb_ref.shape
        D, BT = encT_ref.shape
        H = whh0_ref.shape[0]
        Vp = w2_ref.shape[1]
        T_enc = BT // B

        # ---- hoisted loads / broadcasts (outside the recurrence) ------------
        encT = encT_ref[...]            # (D, B*T_enc)
        enc2d = enc2d_ref[...]          # (B*T_enc, D)
        wc0 = wc0_ref[...]
        whh0 = whh0_ref[...]
        wih1 = wih1_ref[...]
        whh1 = whh1_ref[...]
        b0 = jnp.broadcast_to(b0_ref[...], (B, 4 * H))
        b1 = jnp.broadcast_to(b1_ref[...], (B, 4 * H))

        # Block-diagonal attention mask: scores are ONE dense (B, B*T_enc) MXU
        # matmul; off-batch entries get -1e30 so their softmax weight is 0.
        row = lax.broadcasted_iota(jnp.int32, (B, BT), 0)
        col = lax.broadcasted_iota(jnp.int32, (B, BT), 1)
        own = (col >= row * T_enc) & (col < (row + 1) * T_enc)
        att_mask = jnp.where(own, 0.0, -1e30).astype(jnp.float32)

        # ---- pre-pass: input-dependent part of layer-0 gates ----------------
        # ONE (M8, E) @ (E, 4H) MXU dot instead of T_out tiny M=B dots.
        g0x_buf[...] = jnp.dot(emb_ref[...], wx0_ref[...],
                               preferred_element_type=jnp.float32)

        # Zero-init deferred-MLP buffers: padded rows (b >= B) must stay finite
        # so the post-loop CE math is NaN-free.
        hbuf[...] = jnp.zeros_like(hbuf)
        cbuf[...] = jnp.zeros_like(cbuf)

        def lstm_gates(g, c_prev):
            # transcendentals only on the lanes that need them (i,f,g,o order)
            i_g = jax.nn.sigmoid(g[:, 0 * H:1 * H])
            f_g = jax.nn.sigmoid(g[:, 1 * H:2 * H])
            g_g = jnp.tanh(g[:, 2 * H:3 * H])
            o_g = jax.nn.sigmoid(g[:, 3 * H:4 * H])
            c_new = f_g * c_prev + i_g * g_g
            h_new = o_g * jnp.tanh(c_new)
            return h_new, c_new

        def step(t, carry):
            h0, c0, h1, c1, ctx = carry
            r = pl.multiple_of(t * BP, BP)      # 8-aligned per-step row offset

            # layer-0 cell: recurrent part only (input part precomputed above)
            g0 = (g0x_buf[pl.ds(r, B), :]
                  + jnp.dot(ctx, wc0, preferred_element_type=jnp.float32)
                  + jnp.dot(h0, whh0, preferred_element_type=jnp.float32)
                  + b0)
            h0n, c0n = lstm_gates(g0, c0)

            # layer-1 cell: per-operand dots, no staging store->load hazard
            g1 = (jnp.dot(h0n, wih1, preferred_element_type=jnp.float32)
                  + jnp.dot(h1, whh1, preferred_element_type=jnp.float32)
                  + b1)
            h1n, c1n = lstm_gates(g1, c1)

            # dot-product attention, all on the MXU
            s = jnp.dot(h1n, encT, preferred_element_type=jnp.float32) + att_mask
            m = jnp.max(s, axis=-1, keepdims=True)
            p = jnp.exp(s - m)
            attn = p * pl.reciprocal(jnp.sum(p, axis=-1, keepdims=True),
                                     approx=True)
            ctxn = jnp.dot(attn, enc2d, preferred_element_type=jnp.float32)

            # defer output MLP / CE: record h and ctx rows for this step
            hbuf[pl.ds(r, B), :] = h1n
            cbuf[pl.ds(r, B), :] = ctxn
            return (h0n, c0n, h1n, c1n, ctxn)

        zH = jnp.zeros((B, H), jnp.float32)
        init = (zH, zH, zH, zH, jnp.zeros((B, D), jnp.float32))
        unroll = T_out if T_out <= 8 else 4      # bounded code size for long T
        lax.fori_loop(0, T_out, step, init, unroll=unroll)

        # ---- post-loop: batched output MLP + cross-entropy ------------------
        # TODO(synk): for realistic vocab / T_out, chunk this (M8, Vp) logits
        # pass in row blocks to respect v7x's 64 MiB VMEM.
        bl1 = jnp.broadcast_to(bl1_ref[...], (M8, H))
        b2 = jnp.broadcast_to(b2_ref[...], (M8, Vp))
        hmid = jnp.tanh(
            jnp.dot(hbuf[...], w1h_ref[...], preferred_element_type=jnp.float32)
            + jnp.dot(cbuf[...], w1c_ref[...], preferred_element_type=jnp.float32)
            + bl1)
        logits = jnp.dot(hmid, w2_ref[...],
                         preferred_element_type=jnp.float32) + b2     # (M8, Vp)

        tgt = tgt_ref[...]                                            # (M8,1) i32
        lmax = jnp.max(logits, axis=-1, keepdims=True)
        lse = lmax + jnp.log(jnp.sum(jnp.exp(logits - lmax), axis=-1,
                                     keepdims=True))
        logp = logits - lse
        vcol = lax.broadcasted_iota(jnp.int32, (M8, Vp), 1)
        onehot = (vcol == tgt).astype(jnp.float32)
        valid = (tgt >= 0).astype(jnp.float32)                        # (M8, 1)
        loss_ref[...] = -jnp.sum(onehot * logp * valid, keepdims=True)
        cnt_ref[...] = jnp.sum(valid, keepdims=True)

    return decoder_kernel


def decoder_loss_pallas(embedded, dec_out, enc, p):
    """embedded: (B,T_out,E) f32; dec_out: (B,T_out) int32; enc: (B,T_enc,D) f32."""
    B, T_out, E = embedded.shape
    _, T_enc, D = enc.shape
    H = p["whh0"].shape[0]
    V = p["w2"].shape[1]
    Vp = ((V + 127) // 128) * 128
    BP = ((B + 7) // 8) * 8            # per-step row stride, 8-sublane aligned
    M8 = T_out * BP

    # Row layout: row t*BP + b holds (timestep t, batch b); rows b >= B padded.
    emb_tm = jnp.transpose(embedded, (1, 0, 2)).astype(jnp.float32)    # (T,B,E)
    emb_flat = jnp.pad(emb_tm, ((0, 0), (0, BP - B), (0, 0))).reshape(M8, E)
    tgt_tm = jnp.transpose(dec_out).astype(jnp.int32)                  # (T,B)
    tgt_flat = jnp.pad(tgt_tm, ((0, 0), (0, BP - B)),
                       constant_values=IGNORE_ID).reshape(M8, 1)

    # vocab padded to 128 lanes; padded logits killed with a -1e9 bias
    w2p = jnp.pad(p["w2"], ((0, 0), (0, Vp - V)))
    b2p = jnp.pad(p["b2"], ((0, 0), (0, Vp - V)), constant_values=-1e9)

    enc2d = enc.reshape(B * T_enc, D).astype(jnp.float32)              # (B*T, D)
    encT = jnp.transpose(enc2d)                                        # (D, B*T)

    vmem = pl.BlockSpec(memory_space=pltpu.MemorySpace.VMEM)
    kernel = _make_kernel(B, BP, T_out)
    # TODO(synk): on v7x a batch-parallel grid over the 2 TensorCores would be
    # worthwhile at larger B; at B=2 the single-program form is kept.
    loss_sum, cnt = pl.pallas_call(
        kernel,
        out_shape=(jax.ShapeDtypeStruct((1, 1), jnp.float32),
                   jax.ShapeDtypeStruct((1, 1), jnp.float32)),
        in_specs=[vmem] * 16,
        out_specs=(vmem, vmem),
        scratch_shapes=[pltpu.VMEM((M8, 4 * H), jnp.float32),   # g0_x pre-pass
                        pltpu.VMEM((M8, H), jnp.float32),       # h1 per step
                        pltpu.VMEM((M8, D), jnp.float32)],      # ctx per step
        compiler_params=pltpu.CompilerParams(
            vmem_limit_bytes=32 * 1024 * 1024),
    )(emb_flat, tgt_flat, encT, enc2d,
      p["wx0"], p["wc0"], p["whh0"], p["b0"],
      p["wih1"], p["whh1"], p["b1"],
      p["w1h"], p["w1c"], p["b1l"], w2p, b2p)
    # TODO(synk): scalar mean (sum / count) done outside the kernel; guard the
    # degenerate all-ignored case (cnt == 0) against NaN.
    return loss_sum[0, 0] / jnp.maximum(cnt[0, 0], 1.0)


def reference_loss(emb_seq, dec_out, enc, p):
    """Pure-JAX reference mirroring the PyTorch forward."""
    T_out, B, _ = emb_seq.shape
    D = enc.shape[2]
    H = p["whh0"].shape[0]
    h0 = jnp.zeros((B, H)); c0 = jnp.zeros((B, H))
    h1 = jnp.zeros((B, H)); c1 = jnp.zeros((B, H))
    ctx = jnp.zeros((B, D))
    total = jnp.float32(0.0); cnt = jnp.float32(0.0)
    for t in range(T_out):
        x = emb_seq[t]
        g = x @ p["wx0"] + ctx @ p["wc0"] + h0 @ p["whh0"] + p["b0"]
        i = jax.nn.sigmoid(g[:, :H]); f = jax.nn.sigmoid(g[:, H:2 * H])
        gg = jnp.tanh(g[:, 2 * H:3 * H]); o = jax.nn.sigmoid(g[:, 3 * H:])
        c0 = f * c0 + i * gg; h0 = o * jnp.tanh(c0)
        g = h0 @ p["wih1"] + h1 @ p["whh1"] + p["b1"]
        i = jax.nn.sigmoid(g[:, :H]); f = jax.nn.sigmoid(g[:, H:2 * H])
        gg = jnp.tanh(g[:, 2 * H:3 * H]); o = jax.nn.sigmoid(g[:, 3 * H:])
        c1 = f * c1 + i * gg; h1 = o * jnp.tanh(c1)
        scores = jnp.einsum("bd,btd->bt", h1, enc)
        attn = jax.nn.softmax(scores, axis=-1)
        ctx = jnp.einsum("bt,btd->bd", attn, enc)
        hmid = jnp.tanh(h1 @ p["w1h"] + ctx @ p["w1c"] + p["b1l"])
        logits = hmid @ p["w2"] + p["b2"]
        logp = jax.nn.log_softmax(logits, axis=-1)
        tgt = dec_out[:, t]
        valid = tgt != IGNORE_ID
        safe = jnp.where(valid, tgt, 0)
        nll = -jnp.take_along_axis(logp, safe[:, None], axis=1)[:, 0]
        total = total + jnp.sum(jnp.where(valid, nll, 0.0))
        cnt = cnt + jnp.sum(valid.astype(jnp.float32))
    return total / cnt


if __name__ == "__main__":
    # Module hyper-parameters (small, shapes consistent with the PyTorch module).
    vocab_size = 40
    embedding_dim = 24
    decoder_hidden = 32
    encoder_hidden = 16
    D = 2 * encoder_hidden   # encoder output feature size (= decoder_hidden for dot attention)
    H = decoder_hidden
    num_layers = 2
    sos_id, eos_id = 1, 2

    B, T_enc = 2, 8
    target_lengths = [5, 3]

    key = jax.random.PRNGKey(0)
    k_tok, k_enc, k_par = jax.random.split(key, 3)

    # ---- build `inputs` (padded with IGNORE_ID) and encoder outputs ----
    max_tgt = max(target_lengths)
    raw_tokens = np.asarray(jax.random.randint(k_tok, (B, max_tgt), 3, vocab_size))
    inputs = np.full((B, max_tgt), IGNORE_ID, dtype=np.int32)
    for b, L in enumerate(target_lengths):
        inputs[b, :L] = raw_tokens[b, :L]
    encoder_outputs = jax.random.normal(k_enc, (B, T_enc, D), jnp.float32)

    # ---- replicate forward()'s decoder_inputs / decoder_outputs construction ----
    out_len = max_tgt + 1
    dec_in = np.full((B, out_len), eos_id, dtype=np.int32)
    dec_out = np.full((B, out_len), IGNORE_ID, dtype=np.int32)
    for b in range(B):
        tgt = inputs[b][inputs[b] != IGNORE_ID]
        L = len(tgt)
        dec_in[b, 0] = sos_id
        dec_in[b, 1:L + 1] = tgt
        dec_out[b, :L] = tgt
        dec_out[b, L] = eos_id

    # ---- deterministic parameters (PyTorch shapes, stored pre-transposed for x @ W) ----
    def init(k, shape, scale=0.1):
        return scale * jax.random.normal(k, shape, jnp.float32)

    ks = jax.random.split(k_par, 12)
    params = {
        "emb": init(ks[0], (vocab_size, embedding_dim)),
        "wx0": init(ks[1], (embedding_dim, 4 * H)),   # W_ih[:, :E]^T
        "wc0": init(ks[2], (D, 4 * H)),               # W_ih[:, E:]^T
        "whh0": init(ks[3], (H, 4 * H)),
        "b0": init(ks[4], (1, 4 * H)),                # b_ih + b_hh combined
        "wih1": init(ks[5], (H, 4 * H)),
        "whh1": init(ks[6], (H, 4 * H)),
        "b1": init(ks[7], (1, 4 * H)),
        "w1h": init(ks[8], (H, H)),                   # Linear1 weight split
        "w1c": init(ks[9], (D, H)),
        "b1l": init(ks[10], (1, H)),
        "w2": init(ks[11], (H, vocab_size)),
        "b2": jnp.zeros((1, vocab_size), jnp.float32),
    }

    # ---- glue: embedding lookup (data-dependent gather stays in host/XLA) ----
    # TODO(synk): nn.Embedding gather left to XLA; not worth a Pallas kernel here.
    embedded = params["emb"][jnp.asarray(dec_in)]                      # (B, T_out, E)
    dec_out_j = jnp.asarray(dec_out, dtype=jnp.int32)                  # (B, T_out)

    loss = decoder_loss_pallas(embedded, dec_out_j, encoder_outputs, params)
    loss = jax.block_until_ready(loss)

    emb_seq = jnp.transpose(embedded, (1, 0, 2)).astype(jnp.float32)   # (T_out, B, E)
    ref = jax.block_until_ready(
        reference_loss(emb_seq, dec_out_j, encoder_outputs, params))

    # approx=True reciprocal in the attention softmax gives ~1e-4-level drift.
    assert np.allclose(np.asarray(loss), np.asarray(ref), rtol=2e-3, atol=2e-3), \
        (float(loss), float(ref))
    print("KERNEL_OK")
</pallas_src>

<mosaic_0001>
module attributes {stable_mosaic.version = 11 : i64} {
  func.func @decoder_kernel(%arg0: memref<48x24xf32, #tpu.memory_space<vmem>>, %arg1: memref<48x1xi32, #tpu.memory_space<vmem>>, %arg2: memref<32x16xf32, #tpu.memory_space<vmem>>, %arg3: memref<16x32xf32, #tpu.memory_space<vmem>>, %arg4: memref<24x128xf32, #tpu.memory_space<vmem>>, %arg5: memref<32x128xf32, #tpu.memory_space<vmem>>, %arg6: memref<32x128xf32, #tpu.memory_space<vmem>>, %arg7: memref<1x128xf32, #tpu.memory_space<vmem>>, %arg8: memref<32x128xf32, #tpu.memory_space<vmem>>, %arg9: memref<32x128xf32, #tpu.memory_space<vmem>>, %arg10: memref<1x128xf32, #tpu.memory_space<vmem>>, %arg11: memref<32x32xf32, #tpu.memory_space<vmem>>, %arg12: memref<32x32xf32, #tpu.memory_space<vmem>>, %arg13: memref<1x32xf32, #tpu.memory_space<vmem>>, %arg14: memref<32x128xf32, #tpu.memory_space<vmem>>, %arg15: memref<1x128xf32, #tpu.memory_space<vmem>>, %arg16: memref<1x1xf32, #tpu.memory_space<vmem>>, %arg17: memref<1x1xf32, #tpu.memory_space<vmem>>, %arg18: memref<48x128xf32, #tpu.memory_space<vmem>>, %arg19: memref<48x32xf32, #tpu.memory_space<vmem>>, %arg20: memref<48x32xf32, #tpu.memory_space<vmem>>) attributes {dimension_semantics = [], scalar_prefetch = 0 : i64, scratch_operands = 3 : i64, tpu.core_type = #tpu.core_type<tc>} {
    %c0 = arith.constant 0 : index
    %c0_0 = arith.constant 0 : index
    %0 = vector.load %arg2[%c0, %c0_0] : memref<32x16xf32, #tpu.memory_space<vmem>>, vector<32x16xf32>
    %c0_1 = arith.constant 0 : index
    %c0_2 = arith.constant 0 : index
    %1 = vector.load %arg3[%c0_1, %c0_2] : memref<16x32xf32, #tpu.memory_space<vmem>>, vector<16x32xf32>
    %c0_3 = arith.constant 0 : index
    %c0_4 = arith.constant 0 : index
    %2 = vector.load %arg5[%c0_3, %c0_4] : memref<32x128xf32, #tpu.memory_space<vmem>>, vector<32x128xf32>
    %c0_5 = arith.constant 0 : index
    %c0_6 = arith.constant 0 : index
    %3 = vector.load %arg6[%c0_5, %c0_6] : memref<32x128xf32, #tpu.memory_space<vmem>>, vector<32x128xf32>
    %c0_7 = arith.constant 0 : index
    %c0_8 = arith.constant 0 : index
    %4 = vector.load %arg8[%c0_7, %c0_8] : memref<32x128xf32, #tpu.memory_space<vmem>>, vector<32x128xf32>
    %c0_9 = arith.constant 0 : index
    %c0_10 = arith.constant 0 : index
    %5 = vector.load %arg9[%c0_9, %c0_10] : memref<32x128xf32, #tpu.memory_space<vmem>>, vector<32x128xf32>
    %c0_11 = arith.constant 0 : index
    %c0_12 = arith.constant 0 : index
    %6 = vector.load %arg7[%c0_11, %c0_12] : memref<1x128xf32, #tpu.memory_space<vmem>>, vector<1x128xf32>
    %7 = vector.shape_cast %6 : vector<1x128xf32> to vector<1x128xf32>
    %8 = vector.broadcast %7 : vector<1x128xf32> to vector<2x128xf32>
    %c0_13 = arith.constant 0 : index
    %c0_14 = arith.constant 0 : index
    %9 = vector.load %arg10[%c0_13, %c0_14] : memref<1x128xf32, #tpu.memory_space<vmem>>, vector<1x128xf32>
    %10 = vector.shape_cast %9 : vector<1x128xf32> to vector<1x128xf32>
    %11 = vector.broadcast %10 : vector<1x128xf32> to vector<2x128xf32>
    %12 = tpu.iota {dimensions = array<i32: 0>} : vector<2x16xi32>
    %13 = tpu.iota {dimensions = array<i32: 1>} : vector<2x16xi32>
    %c8_i32 = arith.constant 8 : i32
    %14 = vector.broadcast %c8_i32 : i32 to vector<2x16xi32>
    %15 = arith.muli %12, %14 : vector<2x16xi32>
    %16 = arith.cmpi sge, %13, %15 : vector<2x16xi32>
    %c1_i32 = arith.constant 1 : i32
    %17 = vector.broadcast %c1_i32 : i32 to vector<2x16xi32>
    %18 = arith.addi %12, %17 : vector<2x16xi32>
    %c8_i32_15 = arith.constant 8 : i32
    %19 = vector.broadcast %c8_i32_15 : i32 to vector<2x16xi32>
    %20 = arith.muli %18, %19 : vector<2x16xi32>
    %21 = arith.cmpi slt, %13, %20 : vector<2x16xi32>
    %22 = arith.andi %16, %21 : vector<2x16xi1>
    %cst = arith.constant 0.000000e+00 : f32
    %cst_16 = arith.constant -1.000000e+30 : f32
    %23 = vector.broadcast %cst : f32 to vector<2x16xf32>
    %24 = vector.broadcast %cst_16 : f32 to vector<2x16xf32>
    %25 = arith.select %22, %23, %24 : vector<2x16xi1>, vector<2x16xf32>
    %c0_17 = arith.constant 0 : index
    %c0_18 = arith.constant 0 : index
    %26 = vector.load %arg0[%c0_17, %c0_18] : memref<48x24xf32, #tpu.memory_space<vmem>>, vector<48x24xf32>
    %c0_19 = arith.constant 0 : index
    %c0_20 = arith.constant 0 : index
    %27 = vector.load %arg4[%c0_19, %c0_20] : memref<24x128xf32, #tpu.memory_space<vmem>>, vector<24x128xf32>
    %cst_21 = arith.constant dense<0.000000e+00> : vector<48x128xf32>
    %28 = tpu.matmul %26, %27, %cst_21 {dimension_numbers = #tpu.dot_dimension_numbers<[1], [0], [0], [1], [0, 0, 1, 1], [], []>} : vector<48x24xf32>, vector<24x128xf32>, vector<48x128xf32> -> vector<48x128xf32>
    %c0_22 = arith.constant 0 : index
    %c0_23 = arith.constant 0 : index
    %29 = vector.load %arg18[%c0_22, %c0_23] : memref<48x128xf32, #tpu.memory_space<vmem>>, vector<48x128xf32>
    tpu.vector_store %arg18[%c0_22, %c0_23], %28 {strides = array<i32>} : memref<48x128xf32, #tpu.memory_space<vmem>>, vector<48x128xf32>,
    %cst_24 = arith.constant 0.000000e+00 : f32
    %30 = vector.broadcast %cst_24 : f32 to vector<48x32xf32>
    %c0_25 = arith.constant 0 : index
    %c0_26 = arith.constant 0 : index
    %31 = vector.load %arg19[%c0_25, %c0_26] : memref<48x32xf32, #tpu.memory_space<vmem>>, vector<48x32xf32>
    tpu.vector_store %arg19[%c0_25, %c0_26], %30 {strides = array<i32>} : memref<48x32xf32, #tpu.memory_space<vmem>>, vector<48x32xf32>,
    %cst_27 = arith.constant 0.000000e+00 : f32
    %32 = vector.broadcast %cst_27 : f32 to vector<48x32xf32>
    %c0_28 = arith.constant 0 : index
    %c0_29 = arith.constant 0 : index
    %33 = vector.load %arg20[%c0_28, %c0_29] : memref<48x32xf32, #tpu.memory_space<vmem>>, vector<48x32xf32>
    tpu.vector_store %arg20[%c0_28, %c0_29], %32 {strides = array<i32>} : memref<48x32xf32, #tpu.memory_space<vmem>>, vector<48x32xf32>,
    %cst_30 = arith.constant 0.000000e+00 : f32
    %34 = vector.broadcast %cst_30 : f32 to vector<2x32xf32>
    %cst_31 = arith.constant 0.000000e+00 : f32
    %35 = vector.broadcast %cst_31 : f32 to vector<2x32xf32>
    %c0_i32 = arith.constant 0 : i32
    %c8_i32_32 = arith.constant 8 : i32
    %36 = arith.muli %c0_i32, %c8_i32_32 : i32
    %37 = tpu.assume_multiple %36, 8 : i32
    %38 = arith.index_cast %37 : i32 to index
    %c0_33 = arith.constant 0 : index
    %39 = vector.load %arg18[%38, %c0_33] : memref<48x128xf32, #tpu.memory_space<vmem>>, vector<2x128xf32>
    %cst_34 = arith.constant dense<0.000000e+00> : vector<2x128xf32>
    %40 = tpu.matmul %35, %2, %cst_34 {dimension_numbers = #tpu.dot_dimension_numbers<[1], [0], [0], [1], [0, 0, 1, 1], [], []>} : vector<2x32xf32>, vector<32x128xf32>, vector<2x128xf32> -> vector<2x128xf32>
    %41 = arith.addf %39, %40 : vector<2x128xf32>
    %cst_35 = arith.constant dense<0.000000e+00> : vector<2x128xf32>
    %42 = tpu.matmul %34, %3, %cst_35 {dimension_numbers = #tpu.dot_dimension_numbers<[1], [0], [0], [1], [0, 0, 1, 1], [], []>} : vector<2x32xf32>, vector<32x128xf32>, vector<2x128xf32> -> vector<2x128xf32>
    %43 = arith.addf %41, %42 : vector<2x128xf32>
    %44 = arith.addf %43, %8 : vector<2x128xf32>
    %45 = vector.extract_strided_slice %44 {offsets = [0, 0], sizes = [2, 32], strides = [1, 1]} : vector<2x128xf32> to vector<2x32xf32>
    %46 = arith.negf %45 : vector<2x32xf32>
    %47 = math.exp %46 : vector<2x32xf32>
    %cst_36 = arith.constant 1.000000e+00 : f32
    %48 = vector.broadcast %cst_36 : f32 to vector<2x32xf32>
    %49 = arith.addf %48, %47 : vector<2x32xf32>
    %50 = arith.divf %48, %49 : vector<2x32xf32>
    %51 = vector.extract_strided_slice %44 {offsets = [0, 32], sizes = [2, 32], strides = [1, 1]} : vector<2x128xf32> to vector<2x32xf32>
    %52 = arith.negf %51 : vector<2x32xf32>
    %53 = math.exp %52 : vector<2x32xf32>
    %cst_37 = arith.constant 1.000000e+00 : f32
    %54 = vector.broadcast %cst_37 : f32 to vector<2x32xf32>
    %55 = arith.addf %54, %53 : vector<2x32xf32>
    %56 = arith.divf %54, %55 : vector<2x32xf32>
    %57 = vector.extract_strided_slice %44 {offsets = [0, 64], sizes = [2, 32], strides = [1, 1]} : vector<2x128xf32> to vector<2x32xf32>
    %58 = math.tanh %57 : vector<2x32xf32>
    %59 = vector.extract_strided_slice %44 {offsets = [0, 96], sizes = [2, 32], strides = [1, 1]} : vector<2x128xf32> to vector<2x32xf32>
    %60 = arith.negf %59 : vector<2x32xf32>
    %61 = math.exp %60 : vector<2x32xf32>
    %cst_38 = arith.constant 1.000000e+00 : f32
    %62 = vector.broadcast %cst_38 : f32 to vector<2x32xf32>
    %63 = arith.addf %62, %61 : vector<2x32xf32>
    %64 = arith.divf %62, %63 : vector<2x32xf32>
    %65 = arith.mulf %56, %34 : vector<2x32xf32>
    %66 = arith.mulf %50, %58 : vector<2x32xf32>
    %67 = arith.addf %65, %66 : vector<2x32xf32>
    %68 = math.tanh %67 : vector<2x32xf32>
    %69 = arith.mulf %64, %68 : vector<2x32xf32>
    %cst_39 = arith.constant dense<0.000000e+00> : vector<2x128xf32>
    %70 = tpu.matmul %69, %4, %cst_39 {dimension_numbers = #tpu.dot_dimension_numbers<[1], [0], [0], [1], [0, 0, 1, 1], [], []>} : vector<2x32xf32>, vector<32x128xf32>, vector<2x128xf32> -> vector<2x128xf32>
    %cst_40 = arith.constant dense<0.000000e+00> : vector<2x128xf32>
    %71 = tpu.matmul %34, %5, %cst_40 {dimension_numbers = #tpu.dot_dimension_numbers<[1], [0], [0], [1], [0, 0, 1, 1], [], []>} : vector<2x32xf32>, vector<32x128xf32>, vector<2x128xf32> -> vector<2x128xf32>
    %72 = arith.addf %70, %71 : vector<2x128xf32>
    %73 = arith.addf %72, %11 : vector<2x128xf32>
    %74 = vector.extract_strided_slice %73 {offsets = [0, 0], sizes = [2, 32], strides = [1, 1]} : vector<2x128xf32> to vector<2x32xf32>
    %75 = arith.negf %74 : vector<2x32xf32>
    %76 = math.exp %75 : vector<2x32xf32>
    %cst_41 = arith.constant 1.000000e+00 : f32
    %77 = vector.broadcast %cst_41 : f32 to vector<2x32xf32>
    %78 = arith.addf %77, %76 : vector<2x32xf32>
    %79 = arith.divf %77, %78 : vector<2x32xf32>
    %80 = vector.extract_strided_slice %73 {offsets = [0, 32], sizes = [2, 32], strides = [1, 1]} : vector<2x128xf32> to vector<2x32xf32>
    %81 = arith.negf %80 : vector<2x32xf32>
    %82 = math.exp %81 : vector<2x32xf32>
    %cst_42 = arith.constant 1.000000e+00 : f32
    %83 = vector.broadcast %cst_42 : f32 to vector<2x32xf32>
    %84 = arith.addf %83, %82 : vector<2x32xf32>
    %85 = arith.divf %83, %84 : vector<2x32xf32>
    %86 = vector.extract_strided_slice %73 {offsets = [0, 64], sizes = [2, 32], strides = [1, 1]} : vector<2x128xf32> to vector<2x32xf32>
    %87 = math.tanh %86 : vector<2x32xf32>
    %88 = vector.extract_strided_slice %73 {offsets = [0, 96], sizes = [2, 32], strides = [1, 1]} : vector<2x128xf32> to vector<2x32xf32>
    %89 = arith.negf %88 : vector<2x32xf32>
    %90 = math.exp %89 : vector<2x32xf32>
    %cst_43 = arith.constant 1.000000e+00 : f32
    %91 = vector.broadcast %cst_43 : f32 to vector<2x32xf32>
    %92 = arith.addf %91, %90 : vector<2x32xf32>
    %93 = arith.divf %91, %92 : vector<2x32xf32>
    %94 = arith.mulf %85, %34 : vector<2x32xf32>
    %95 = arith.mulf %79, %87 : vector<2x32xf32>
    %96 = arith.addf %94, %95 : vector<2x32xf32>
    %97 = math.tanh %96 : vector<2x32xf32>
    %98 = arith.mulf %93, %97 : vector<2x32xf32>
    %cst_44 = arith.constant dense<0.000000e+00> : vector<2x16xf32>
    %99 = tpu.matmul %98, %0, %cst_44 {dimension_numbers = #tpu.dot_dimension_numbers<[1], [0], [0], [1], [0, 0, 1, 1], [], []>} : vector<2x32xf32>, vector<32x16xf32>, vector<2x16xf32> -> vector<2x16xf32>
    %100 = arith.addf %99, %25 : vector<2x16xf32>
    %cst_45 = arith.constant dense<0xFF800000> : vector<2xf32>
    %101 = vector.multi_reduction <maximumf>, %100, %cst_45 [1] : vector<2x16xf32> to vector<2xf32>
    %102 = vector.shape_cast %101 : vector<2xf32> to vector<2x1xf32>
    %103 = vector.broadcast %102 : vector<2x1xf32> to vector<2x16xf32>
    %104 = arith.subf %100, %103 : vector<2x16xf32>
    %105 = math.exp %104 : vector<2x16xf32>
    %cst_46 = arith.constant dense<0.000000e+00> : vector<2xf32>
    %106 = vector.multi_reduction <add>, %105, %cst_46 [1] : vector<2x16xf32> to vector<2xf32>
    %107 = vector.shape_cast %106 : vector<2xf32> to vector<2x1xf32>
    %108 = tpu.reciprocal %107 {approx = true} : vector<2x1xf32> -> vector<2x1xf32>
    %109 = vector.broadcast %108 : vector<2x1xf32> to vector<2x16xf32>
    %110 = arith.mulf %105, %109 : vector<2x16xf32>
    %cst_47 = arith.constant dense<0.000000e+00> : vector<2x32xf32>
    %111 = tpu.matmul %110, %1, %cst_47 {dimension_numbers = #tpu.dot_dimension_numbers<[1], [0], [0], [1], [0, 0, 1, 1], [], []>} : vector<2x16xf32>, vector<16x32xf32>, vector<2x32xf32> -> vector<2x32xf32>
    %112 = arith.index_cast %37 : i32 to index
    %c0_48 = arith.constant 0 : index
    %113 = vector.load %arg19[%112, %c0_48] : memref<48x32xf32, #tpu.memory_space<vmem>>, vector<2x32xf32>
    tpu.vector_store %arg19[%112, %c0_48], %98 {strides = array<i32>} : memref<48x32xf32, #tpu.memory_space<vmem>>, vector<2x32xf32>,
    %114 = arith.index_cast %37 : i32 to index
    %c0_49 = arith.constant 0 : index
    %115 = vector.load %arg20[%114, %c0_49] : memref<48x32xf32, #tpu.memory_space<vmem>>, vector<2x32xf32>
    tpu.vector_store %arg20[%114, %c0_49], %111 {strides = array<i32>} : memref<48x32xf32, #tpu.memory_space<vmem>>, vector<2x32xf32>,
    %c1_i32_50 = arith.constant 1 : i32
    %c8_i32_51 = arith.constant 8 : i32
    %116 = arith.muli %c1_i32_50, %c8_i32_51 : i32
    %117 = tpu.assume_multiple %116, 8 : i32
    %118 = arith.index_cast %117 : i32 to index
    %c0_52 = arith.constant 0 : index
    %119 = vector.load %arg18[%118, %c0_52] : memref<48x128xf32, #tpu.memory_space<vmem>>, vector<2x128xf32>
    %cst_53 = arith.constant dense<0.000000e+00> : vector<2x128xf32>
    %120 = tpu.matmul %111, %2, %cst_53 {dimension_numbers = #tpu.dot_dimension_numbers<[1], [0], [0], [1], [0, 0, 1, 1], [], []>} : vector<2x32xf32>, vector<32x128xf32>, vector<2x128xf32> -> vector<2x128xf32>
    %121 = arith.addf %119, %120 : vector<2x128xf32>
    %cst_54 = arith.constant dense<0.000000e+00> : vector<2x128xf32>
    %122 = tpu.matmul %69, %3, %cst_54 {dimension_numbers = #tpu.dot_dimension_numbers<[1], [0], [0], [1], [0, 0, 1, 1], [], []>} : vector<2x32xf32>, vector<32x128xf32>, vector<2x128xf32> -> vector<2x128xf32>
    %123 = arith.addf %121, %122 : vector<2x128xf32>
    %124 = arith.addf %123, %8 : vector<2x128xf32>
    %125 = vector.extract_strided_slice %124 {offsets = [0, 0], sizes = [2, 32], strides = [1, 1]} : vector<2x128xf32> to vector<2x32xf32>
    %126 = arith.negf %125 : vector<2x32xf32>
    %127 = math.exp %126 : vector<2x32xf32>
    %cst_55 = arith.constant 1.000000e+00 : f32
    %128 = vector.broadcast %cst_55 : f32 to vector<2x32xf32>
    %129 = arith.addf %128, %127 : vector<2x32xf32>
    %130 = arith.divf %128, %129 : vector<2x32xf32>
    %131 = vector.extract_strided_slice %124 {offsets = [0, 32], sizes = [2, 32], strides = [1, 1]} : vector<2x128xf32> to vector<2x32xf32>
    %132 = arith.negf %131 : vector<2x32xf32>
    %133 = math.exp %132 : vector<2x32xf32>
    %cst_56 = arith.constant 1.000000e+00 : f32
    %134 = vector.broadcast %cst_56 : f32 to vector<2x32xf32>
    %135 = arith.addf %134, %133 : vector<2x32xf32>
    %136 = arith.divf %134, %135 : vector<2x32xf32>
    %137 = vector.extract_strided_slice %124 {offsets = [0, 64], sizes = [2, 32], strides = [1, 1]} : vector<2x128xf32> to vector<2x32xf32>
    %138 = math.tanh %137 : vector<2x32xf32>
    %139 = vector.extract_strided_slice %124 {offsets = [0, 96], sizes = [2, 32], strides = [1, 1]} : vector<2x128xf32> to vector<2x32xf32>
    %140 = arith.negf %139 : vector<2x32xf32>
    %141 = math.exp %140 : vector<2x32xf32>
    %cst_57 = arith.constant 1.000000e+00 : f32
    %142 = vector.broadcast %cst_57 : f32 to vector<2x32xf32>
    %143 = arith.addf %142, %141 : vector<2x32xf32>
    %144 = arith.divf %142, %143 : vector<2x32xf32>
    %145 = arith.mulf %136, %67 : vector<2x32xf32>
    %146 = arith.mulf %130, %138 : vector<2x32xf32>
    %147 = arith.addf %145, %146 : vector<2x32xf32>
    %148 = math.tanh %147 : vector<2x32xf32>
    %149 = arith.mulf %144, %148 : vector<2x32xf32>
    %cst_58 = arith.constant dense<0.000000e+00> : vector<2x128xf32>
    %150 = tpu.matmul %149, %4, %cst_58 {dimension_numbers = #tpu.dot_dimension_numbers<[1], [0], [0], [1], [0, 0, 1, 1], [], []>} : vector<2x32xf32>, vector<32x128xf32>, vector<2x128xf32> -> vector<2x128xf32>
    %cst_59 = arith.constant dense<0.000000e+00> : vector<2x128xf32>
    %151 = tpu.matmul %98, %5, %cst_59 {dimension_numbers = #tpu.dot_dimension_numbers<[1], [0], [0], [1], [0, 0, 1, 1], [], []>} : vector<2x32xf32>, vector<32x128xf32>, vector<2x128xf32> -> vector<2x128xf32>
    %152 = arith.addf %150, %151 : vector<2x128xf32>
    %153 = arith.addf %152, %11 : vector<2x128xf32>
    %154 = vector.extract_strided_slice %153 {offsets = [0, 0], sizes = [2, 32], strides = [1, 1]} : vector<2x128xf32> to vector<2x32xf32>
    %155 = arith.negf %154 : vector<2x32xf32>
    %156 = math.exp %155 : vector<2x32xf32>
    %cst_60 = arith.constant 1.000000e+00 : f32
    %157 = vector.broadcast %cst_60 : f32 to vector<2x32xf32>
    %158 = arith.addf %157, %156 : vector<2x32xf32>
    %159 = arith.divf %157, %158 : vector<2x32xf32>
    %160 = vector.extract_strided_slice %153 {offsets = [0, 32], sizes = [2, 32], strides = [1, 1]} : vector<2x128xf32> to vector<2x32xf32>
    %161 = arith.negf %160 : vector<2x32xf32>
    %162 = math.exp %161 : vector<2x32xf32>
    %cst_61 = arith.constant 1.000000e+00 : f32
    %163 = vector.broadcast %cst_61 : f32 to vector<2x32xf32>
    %164 = arith.addf %163, %162 : vector<2x32xf32>
    %165 = arith.divf %163, %164 : vector<2x32xf32>
    %166 = vector.extract_strided_slice %153 {offsets = [0, 64], sizes = [2, 32], strides = [1, 1]} : vector<2x128xf32> to vector<2x32xf32>
    %167 = math.tanh %166 : vector<2x32xf32>
    %168 = vector.extract_strided_slice %153 {offsets = [0, 96], sizes = [2, 32], strides = [1, 1]} : vector<2x128xf32> to vector<2x32xf32>
    %169 = arith.negf %168 : vector<2x32xf32>
    %170 = math.exp %169 : vector<2x32xf32>
    %cst_62 = arith.constant 1.000000e+00 : f32
    %171 = vector.broadcast %cst_62 : f32 to vector<2x32xf32>
    %172 = arith.addf %171, %170 : vector<2x32xf32>
    %173 = arith.divf %171, %172 : vector<2x32xf32>
    %174 = arith.mulf %165, %96 : vector<2x32xf32>
    %175 = arith.mulf %159, %167 : vector<2x32xf32>
    %176 = arith.addf %174, %175 : vector<2x32xf32>
    %177 = math.tanh %176 : vector<2x32xf32>
    %178 = arith.mulf %173, %177 : vector<2x32xf32>
    %cst_63 = arith.constant dense<0.000000e+00> : vector<2x16xf32>
    %179 = tpu.matmul %178, %0, %cst_63 {dimension_numbers = #tpu.dot_dimension_numbers<[1], [0], [0], [1], [0, 0, 1, 1], [], []>} : vector<2x32xf32>, vector<32x16xf32>, vector<2x16xf32> -> vector<2x16xf32>
    %180 = arith.addf %179, %25 : vector<2x16xf32>
    %cst_64 = arith.constant dense<0xFF800000> : vector<2xf32>
    %181 = vector.multi_reduction <maximumf>, %180, %cst_64 [1] : vector<2x16xf32> to vector<2xf32>
    %182 = vector.shape_cast %181 : vector<2xf32> to vector<2x1xf32>
    %183 = vector.broadcast %182 : vector<2x1xf32> to vector<2x16xf32>
    %184 = arith.subf %180, %183 : vector<2x16xf32>
    %185 = math.exp %184 : vector<2x16xf32>
    %cst_65 = arith.constant dense<0.000000e+00> : vector<2xf32>
    %186 = vector.multi_reduction <add>, %185, %cst_65 [1] : vector<2x16xf32> to vector<2xf32>
    %187 = vector.shape_cast %186 : vector<2xf32> to vector<2x1xf32>
    %188 = tpu.reciprocal %187 {approx = true} : vector<2x1xf32> -> vector<2x1xf32>
    %189 = vector.broadcast %188 : vector<2x1xf32> to vector<2x16xf32>
    %190 = arith.mulf %185, %189 : vector<2x16xf32>
    %cst_66 = arith.constant dense<0.000000e+00> : vector<2x32xf32>
    %191 = tpu.matmul %190, %1, %cst_66 {dimension_numbers = #tpu.dot_dimension_numbers<[1], [0], [0], [1], [0, 0, 1, 1], [], []>} : vector<2x16xf32>, vector<16x32xf32>, vector<2x32xf32> -> vector<2x32xf32>
    %192 = arith.index_cast %117 : i32 to index
    %c0_67 = arith.constant 0 : index
    %193 = vector.load %arg19[%192, %c0_67] : memref<48x32xf32, #tpu.memory_space<vmem>>, vector<2x32xf32>
    tpu.vector_store %arg19[%192, %c0_67], %178 {strides = array<i32>} : memref<48x32xf32, #tpu.memory_space<vmem>>, vector<2x32xf32>,
    %194 = arith.index_cast %117 : i32 to index
    %c0_68 = arith.constant 0 : index
    %195 = vector.load %arg20[%194, %c0_68] : memref<48x32xf32, #tpu.memory_space<vmem>>, vector<2x32xf32>
    tpu.vector_store %arg20[%194, %c0_68], %191 {strides = array<i32>} : memref<48x32xf32, #tpu.memory_space<vmem>>, vector<2x32xf32>,
    %c2_i32 = arith.constant 2 : i32
    %c8_i32_69 = arith.constant 8 : i32
    %196 = arith.muli %c2_i32, %c8_i32_69 : i32
    %197 = tpu.assume_multiple %196, 8 : i32
    %198 = arith.index_cast %197 : i32 to index
    %c0_70 = arith.constant 0 : index
    %199 = vector.load %arg18[%198, %c0_70] : memref<48x128xf32, #tpu.memory_space<vmem>>, vector<2x128xf32>
    %cst_71 = arith.constant dense<0.000000e+00> : vector<2x128xf32>
    %200 = tpu.matmul %191, %2, %cst_71 {dimension_numbers = #tpu.dot_dimension_numbers<[1], [0], [0], [1], [0, 0, 1, 1], [], []>} : vector<2x32xf32>, vector<32x128xf32>, vector<2x128xf32> -> vector<2x128xf32>
    %201 = arith.addf %199, %200 : vector<2x128xf32>
    %cst_72 = arith.constant dense<0.000000e+00> : vector<2x128xf32>
    %202 = tpu.matmul %149, %3, %cst_72 {dimension_numbers = #tpu.dot_dimension_numbers<[1], [0], [0], [1], [0, 0, 1, 1], [], []>} : vector<2x32xf32>, vector<32x128xf32>, vector<2x128xf32> -> vector<2x128xf32>
    %203 = arith.addf %201, %202 : vector<2x128xf32>
    %204 = arith.addf %203, %8 : vector<2x128xf32>
    %205 = vector.extract_strided_slice %204 {offsets = [0, 0], sizes = [2, 32], strides = [1, 1]} : vector<2x128xf32> to vector<2x32xf32>
    %206 = arith.negf %205 : vector<2x32xf32>
    %207 = math.exp %206 : vector<2x32xf32>
    %cst_73 = arith.constant 1.000000e+00 : f32
    %208 = vector.broadcast %cst_73 : f32 to vector<2x32xf32>
    %209 = arith.addf %208, %207 : vector<2x32xf32>
    %210 = arith.divf %208, %209 : vector<2x32xf32>
    %211 = vector.extract_strided_slice %204 {offsets = [0, 32], sizes = [2, 32], strides = [1, 1]} : vector<2x128xf32> to vector<2x32xf32>
    %212 = arith.negf %211 : vector<2x32xf32>
    %213 = math.exp %212 : vector<2x32xf32>
    %cst_74 = arith.constant 1.000000e+00 : f32
    %214 = vector.broadcast %cst_74 : f32 to vector<2x32xf32>
    %215 = arith.addf %214, %213 : vector<2x32xf32>
    %216 = arith.divf %214, %215 : vector<2x32xf32>
    %217 = vector.extract_strided_slice %204 {offsets = [0, 64], sizes = [2, 32], strides = [1, 1]} : vector<2x128xf32> to vector<2x32xf32>
    %218 = math.tanh %217 : vector<2x32xf32>
    %219 = vector.extract_strided_slice %204 {offsets = [0, 96], sizes = [2, 32], strides = [1, 1]} : vector<2x128xf32> to vector<2x32xf32>
    %220 = arith.negf %219 : vector<2x32xf32>
    %221 = math.exp %220 : vector<2x32xf32>
    %cst_75 = arith.constant 1.000000e+00 : f32
    %222 = vector.broadcast %cst_75 : f32 to vector<2x32xf32>
    %223 = arith.addf %222, %221 : vector<2x32xf32>
    %224 = arith.divf %222, %223 : vector<2x32xf32>
    %225 = arith.mulf %216, %147 : vector<2x32xf32>
    %226 = arith.mulf %210, %218 : vector<2x32xf32>
    %227 = arith.addf %225, %226 : vector<2x32xf32>
    %228 = math.tanh %227 : vector<2x32xf32>
    %229 = arith.mulf %224, %228 : vector<2x32xf32>
    %cst_76 = arith.constant dense<0.000000e+00> : vector<2x128xf32>
    %230 = tpu.matmul %229, %4, %cst_76 {dimension_numbers = #tpu.dot_dimension_numbers<[1], [0], [0], [1], [0, 0, 1, 1], [], []>} : vector<2x32xf32>, vector<32x128xf32>, vector<2x128xf32> -> vector<2x128xf32>
    %cst_77 = arith.constant dense<0.000000e+00> : vector<2x128xf32>
    %231 = tpu.matmul %178, %5, %cst_77 {dimension_numbers = #tpu.dot_dimension_numbers<[1], [0], [0], [1], [0, 0, 1, 1], [], []>} : vector<2x32xf32>, vector<32x128xf32>, vector<2x128xf32> -> vector<2x128xf32>
    %232 = arith.addf %230, %231 : vector<2x128xf32>
    %233 = arith.addf %232, %11 : vector<2x128xf32>
    %234 = vector.extract_strided_slice %233 {offsets = [0, 0], sizes = [2, 32], strides = [1, 1]} : vector<2x128xf32> to vector<2x32xf32>
    %235 = arith.negf %234 : vector<2x32xf32>
    %236 = math.exp %235 : vector<2x32xf32>
    %cst_78 = arith.constant 1.000000e+00 : f32
    %237 = vector.broadcast %cst_78 : f32 to vector<2x32xf32>
    %238 = arith.addf %237, %236 : vector<2x32xf32>
    %239 = arith.divf %237, %238 : vector<2x32xf32>
    %240 = vector.extract_strided_slice %233 {offsets = [0, 32], sizes = [2, 32], strides = [1, 1]} : vector<2x128xf32> to vector<2x32xf32>
    %241 = arith.negf %240 : vector<2x32xf32>
    %242 = math.exp %241 : vector<2x32xf32>
    %cst_79 = arith.constant 1.000000e+00 : f32
    %243 = vector.broadcast %cst_79 : f32 to vector<2x32xf32>
    %244 = arith.addf %243, %242 : vector<2x32xf32>
    %245 = arith.divf %243, %244 : vector<2x32xf32>
    %246 = vector.extract_strided_slice %233 {offsets = [0, 64], sizes = [2, 32], strides = [1, 1]} : vector<2x128xf32> to vector<2x32xf32>
    %247 = math.tanh %246 : vector<2x32xf32>
    %248 = vector.extract_strided_slice %233 {offsets = [0, 96], sizes = [2, 32], strides = [1, 1]} : vector<2x128xf32> to vector<2x32xf32>
    %249 = arith.negf %248 : vector<2x32xf32>
    %250 = math.exp %249 : vector<2x32xf32>
    %cst_80 = arith.constant 1.000000e+00 : f32
    %251 = vector.broadcast %cst_80 : f32 to vector<2x32xf32>
    %252 = arith.addf %251, %250 : vector<2x32xf32>
    %253 = arith.divf %251, %252 : vector<2x32xf32>
    %254 = arith.mulf %245, %176 : vector<2x32xf32>
    %255 = arith.mulf %239, %247 : vector<2x32xf32>
    %256 = arith.addf %254, %255 : vector<2x32xf32>
    %257 = math.tanh %256 : vector<2x32xf32>
    %258 = arith.mulf %253, %257 : vector<2x32xf32>
    %cst_81 = arith.constant dense<0.000000e+00> : vector<2x16xf32>
    %259 = tpu.matmul %258, %0, %cst_81 {dimension_numbers = #tpu.dot_dimension_numbers<[1], [0], [0], [1], [0, 0, 1, 1], [], []>} : vector<2x32xf32>, vector<32x16xf32>, vector<2x16xf32> -> vector<2x16xf32>
    %260 = arith.addf %259, %25 : vector<2x16xf32>
    %cst_82 = arith.constant dense<0xFF800000> : vector<2xf32>
    %261 = vector.multi_reduction <maximumf>, %260, %cst_82 [1] : vector<2x16xf32> to vector<2xf32>
    %262 = vector.shape_cast %261 : vector<2xf32> to vector<2x1xf32>
    %263 = vector.broadcast %262 : vector<2x1xf32> to vector<2x16xf32>
    %264 = arith.subf %260, %263 : vector<2x16xf32>
    %265 = math.exp %264 : vector<2x16xf32>
    %cst_83 = arith.constant dense<0.000000e+00> : vector<2xf32>
    %266 = vector.multi_reduction <add>, %265, %cst_83 [1] : vector<2x16xf32> to vector<2xf32>
    %267 = vector.shape_cast %266 : vector<2xf32> to vector<2x1xf32>
    %268 = tpu.reciprocal %267 {approx = true} : vector<2x1xf32> -> vector<2x1xf32>
    %269 = vector.broadcast %268 : vector<2x1xf32> to vector<2x16xf32>
    %270 = arith.mulf %265, %269 : vector<2x16xf32>
    %cst_84 = arith.constant dense<0.000000e+00> : vector<2x32xf32>
    %271 = tpu.matmul %270, %1, %cst_84 {dimension_numbers = #tpu.dot_dimension_numbers<[1], [0], [0], [1], [0, 0, 1, 1], [], []>} : vector<2x16xf32>, vector<16x32xf32>, vector<2x32xf32> -> vector<2x32xf32>
    %272 = arith.index_cast %197 : i32 to index
    %c0_85 = arith.constant 0 : index
    %273 = vector.load %arg19[%272, %c0_85] : memref<48x32xf32, #tpu.memory_space<vmem>>, vector<2x32xf32>
    tpu.vector_store %arg19[%272, %c0_85], %258 {strides = array<i32>} : memref<48x32xf32, #tpu.memory_space<vmem>>, vector<2x32xf32>,
    %274 = arith.index_cast %197 : i32 to index
    %c0_86 = arith.constant 0 : index
    %275 = vector.load %arg20[%274, %c0_86] : memref<48x32xf32, #tpu.memory_space<vmem>>, vector<2x32xf32>
    tpu.vector_store %arg20[%274, %c0_86], %271 {strides = array<i32>} : memref<48x32xf32, #tpu.memory_space<vmem>>, vector<2x32xf32>,
    %c3_i32 = arith.constant 3 : i32
    %c8_i32_87 = arith.constant 8 : i32
    %276 = arith.muli %c3_i32, %c8_i32_87 : i32
    %277 = tpu.assume_multiple %276, 8 : i32
    %278 = arith.index_cast %277 : i32 to index
    %c0_88 = arith.constant 0 : index
    %279 = vector.load %arg18[%278, %c0_88] : memref<48x128xf32, #tpu.memory_space<vmem>>, vector<2x128xf32>
    %cst_89 = arith.constant dense<0.000000e+00> : vector<2x128xf32>
    %280 = tpu.matmul %271, %2, %cst_89 {dimension_numbers = #tpu.dot_dimension_numbers<[1], [0], [0], [1], [0, 0, 1, 1], [], []>} : vector<2x32xf32>, vector<32x128xf32>, vector<2x128xf32> -> vector<2x128xf32>
    %281 = arith.addf %279, %280 : vector<2x128xf32>
    %cst_90 = arith.constant dense<0.000000e+00> : vector<2x128xf32>
    %282 = tpu.matmul %229, %3, %cst_90 {dimension_numbers = #tpu.dot_dimension_numbers<[1], [0], [0], [1], [0, 0, 1, 1], [], []>} : vector<2x32xf32>, vector<32x128xf32>, vector<2x128xf32> -> vector<2x128xf32>
    %283 = arith.addf %281, %282 : vector<2x128xf32>
    %284 = arith.addf %283, %8 : vector<2x128xf32>
    %285 = vector.extract_strided_slice %284 {offsets = [0, 0], sizes = [2, 32], strides = [1, 1]} : vector<2x128xf32> to vector<2x32xf32>
    %286 = arith.negf %285 : vector<2x32xf32>
    %287 = math.exp %286 : vector<2x32xf32>
    %cst_91 = arith.constant 1.000000e+00 : f32
    %288 = vector.broadcast %cst_91 : f32 to vector<2x32xf32>
    %289 = arith.addf %288, %287 : vector<2x32xf32>
    %290 = arith.divf %288, %289 : vector<2x32xf32>
    %291 = vector.extract_strided_slice %284 {offsets = [0, 32], sizes = [2, 32], strides = [1, 1]} : vector<2x128xf32> to vector<2x32xf32>
    %292 = arith.negf %291 : vector<2x32xf32>
    %293 = math.exp %292 : vector<2x32xf32>
    %cst_92 = arith.constant 1.000000e+00 : f32
    %294 = vector.broadcast %cst_92 : f32 to vector<2x32xf32>
    %295 = arith.addf %294, %293 : vector<2x32xf32>
    %296 = arith.divf %294, %295 : vector<2x32xf32>
    %297 = vector.extract_strided_slice %284 {offsets = [0, 64], sizes = [2, 32], strides = [1, 1]} : vector<2x128xf32> to vector<2x32xf32>
    %298 = math.tanh %297 : vector<2x32xf32>
    %299 = vector.extract_strided_slice %284 {offsets = [0, 96], sizes = [2, 32], strides = [1, 1]} : vector<2x128xf32> to vector<2x32xf32>
    %300 = arith.negf %299 : vector<2x32xf32>
    %301 = math.exp %300 : vector<2x32xf32>
    %cst_93 = arith.constant 1.000000e+00 : f32
    %302 = vector.broadcast %cst_93 : f32 to vector<2x32xf32>
    %303 = arith.addf %302, %301 : vector<2x32xf32>
    %304 = arith.divf %302, %303 : vector<2x32xf32>
    %305 = arith.mulf %296, %227 : vector<2x32xf32>
    %306 = arith.mulf %290, %298 : vector<2x32xf32>
    %307 = arith.addf %305, %306 : vector<2x32xf32>
    %308 = math.tanh %307 : vector<2x32xf32>
    %309 = arith.mulf %304, %308 : vector<2x32xf32>
    %cst_94 = arith.constant dense<0.000000e+00> : vector<2x128xf32>
    %310 = tpu.matmul %309, %4, %cst_94 {dimension_numbers = #tpu.dot_dimension_numbers<[1], [0], [0], [1], [0, 0, 1, 1], [], []>} : vector<2x32xf32>, vector<32x128xf32>, vector<2x128xf32> -> vector<2x128xf32>
    %cst_95 = arith.constant dense<0.000000e+00> : vector<2x128xf32>
    %311 = tpu.matmul %258, %5, %cst_95 {dimension_numbers = #tpu.dot_dimension_numbers<[1], [0], [0], [1], [0, 0, 1, 1], [], []>} : vector<2x32xf32>, vector<32x128xf32>, vector<2x128xf32> -> vector<2x128xf32>
    %312 = arith.addf %310, %311 : vector<2x128xf32>
    %313 = arith.addf %312, %11 : vector<2x128xf32>
    %314 = vector.extract_strided_slice %313 {offsets = [0, 0], sizes = [2, 32], strides = [1, 1]} : vector<2x128xf32> to vector<2x32xf32>
    %315 = arith.negf %314 : vector<2x32xf32>
    %316 = math.exp %315 : vector<2x32xf32>
    %cst_96 = arith.constant 1.000000e+00 : f32
    %317 = vector.broadcast %cst_96 : f32 to vector<2x32xf32>
    %318 = arith.addf %317, %316 : vector<2x32xf32>
    %319 = arith.divf %317, %318 : vector<2x32xf32>
    %320 = vector.extract_strided_slice %313 {offsets = [0, 32], sizes = [2, 32], strides = [1, 1]} : vector<2x128xf32> to vector<2x32xf32>
    %321 = arith.negf %320 : vector<2x32xf32>
    %322 = math.exp %321 : vector<2x32xf32>
    %cst_97 = arith.constant 1.000000e+00 : f32
    %323 = vector.broadcast %cst_97 : f32 to vector<2x32xf32>
    %324 = arith.addf %323, %322 : vector<2x32xf32>
    %325 = arith.divf %323, %324 : vector<2x32xf32>
    %326 = vector.extract_strided_slice %313 {offsets = [0, 64], sizes = [2, 32], strides = [1, 1]} : vector<2x128xf32> to vector<2x32xf32>
    %327 = math.tanh %326 : vector<2x32xf32>
    %328 = vector.extract_strided_slice %313 {offsets = [0, 96], sizes = [2, 32], strides = [1, 1]} : vector<2x128xf32> to vector<2x32xf32>
    %329 = arith.negf %328 : vector<2x32xf32>
    %330 = math.exp %329 : vector<2x32xf32>
    %cst_98 = arith.constant 1.000000e+00 : f32
    %331 = vector.broadcast %cst_98 : f32 to vector<2x32xf32>
    %332 = arith.addf %331, %330 : vector<2x32xf32>
    %333 = arith.divf %331, %332 : vector<2x32xf32>
    %334 = arith.mulf %325, %256 : vector<2x32xf32>
    %335 = arith.mulf %319, %327 : vector<2x32xf32>
    %336 = arith.addf %334, %335 : vector<2x32xf32>
    %337 = math.tanh %336 : vector<2x32xf32>
    %338 = arith.mulf %333, %337 : vector<2x32xf32>
    %cst_99 = arith.constant dense<0.000000e+00> : vector<2x16xf32>
    %339 = tpu.matmul %338, %0, %cst_99 {dimension_numbers = #tpu.dot_dimension_numbers<[1], [0], [0], [1], [0, 0, 1, 1], [], []>} : vector<2x32xf32>, vector<32x16xf32>, vector<2x16xf32> -> vector<2x16xf32>
    %340 = arith.addf %339, %25 : vector<2x16xf32>
    %cst_100 = arith.constant dense<0xFF800000> : vector<2xf32>
    %341 = vector.multi_reduction <maximumf>, %340, %cst_100 [1] : vector<2x16xf32> to vector<2xf32>
    %342 = vector.shape_cast %341 : vector<2xf32> to vector<2x1xf32>
    %343 = vector.broadcast %342 : vector<2x1xf32> to vector<2x16xf32>
    %344 = arith.subf %340, %343 : vector<2x16xf32>
    %345 = math.exp %344 : vector<2x16xf32>
    %cst_101 = arith.constant dense<0.000000e+00> : vector<2xf32>
    %346 = vector.multi_reduction <add>, %345, %cst_101 [1] : vector<2x16xf32> to vector<2xf32>
    %347 = vector.shape_cast %346 : vector<2xf32> to vector<2x1xf32>
    %348 = tpu.reciprocal %347 {approx = true} : vector<2x1xf32> -> vector<2x1xf32>
    %349 = vector.broadcast %348 : vector<2x1xf32> to vector<2x16xf32>
    %350 = arith.mulf %345, %349 : vector<2x16xf32>
    %cst_102 = arith.constant dense<0.000000e+00> : vector<2x32xf32>
    %351 = tpu.matmul %350, %1, %cst_102 {dimension_numbers = #tpu.dot_dimension_numbers<[1], [0], [0], [1], [0, 0, 1, 1], [], []>} : vector<2x16xf32>, vector<16x32xf32>, vector<2x32xf32> -> vector<2x32xf32>
    %352 = arith.index_cast %277 : i32 to index
    %c0_103 = arith.constant 0 : index
    %353 = vector.load %arg19[%352, %c0_103] : memref<48x32xf32, #tpu.memory_space<vmem>>, vector<2x32xf32>
    tpu.vector_store %arg19[%352, %c0_103], %338 {strides = array<i32>} : memref<48x32xf32, #tpu.memory_space<vmem>>, vector<2x32xf32>,
    %354 = arith.index_cast %277 : i32 to index
    %c0_104 = arith.constant 0 : index
    %355 = vector.load %arg20[%354, %c0_104] : memref<48x32xf32, #tpu.memory_space<vmem>>, vector<2x32xf32>
    tpu.vector_store %arg20[%354, %c0_104], %351 {strides = array<i32>} : memref<48x32xf32, #tpu.memory_space<vmem>>, vector<2x32xf32>,
    %c4_i32 = arith.constant 4 : i32
    %c8_i32_105 = arith.constant 8 : i32
    %356 = arith.muli %c4_i32, %c8_i32_105 : i32
    %357 = tpu.assume_multiple %356, 8 : i32
    %358 = arith.index_cast %357 : i32 to index
    %c0_106 = arith.constant 0 : index
    %359 = vector.load %arg18[%358, %c0_106] : memref<48x128xf32, #tpu.memory_space<vmem>>, vector<2x128xf32>
    %cst_107 = arith.constant dense<0.000000e+00> : vector<2x128xf32>
    %360 = tpu.matmul %351, %2, %cst_107 {dimension_numbers = #tpu.dot_dimension_numbers<[1], [0], [0], [1], [0, 0, 1, 1], [], []>} : vector<2x32xf32>, vector<32x128xf32>, vector<2x128xf32> -> vector<2x128xf32>
    %361 = arith.addf %359, %360 : vector<2x128xf32>
    %cst_108 = arith.constant dense<0.000000e+00> : vector<2x128xf32>
    %362 = tpu.matmul %309, %3, %cst_108 {dimension_numbers = #tpu.dot_dimension_numbers<[1], [0], [0], [1], [0, 0, 1, 1], [], []>} : vector<2x32xf32>, vector<32x128xf32>, vector<2x128xf32> -> vector<2x128xf32>
    %363 = arith.addf %361, %362 : vector<2x128xf32>
    %364 = arith.addf %363, %8 : vector<2x128xf32>
    %365 = vector.extract_strided_slice %364 {offsets = [0, 0], sizes = [2, 32], strides = [1, 1]} : vector<2x128xf32> to vector<2x32xf32>
    %366 = arith.negf %365 : vector<2x32xf32>
    %367 = math.exp %366 : vector<2x32xf32>
    %cst_109 = arith.constant 1.000000e+00 : f32
    %368 = vector.broadcast %cst_109 : f32 to vector<2x32xf32>
    %369 = arith.addf %368, %367 : vector<2x32xf32>
    %370 = arith.divf %368, %369 : vector<2x32xf32>
    %371 = vector.extract_strided_slice %364 {offsets = [0, 32], sizes = [2, 32], strides = [1, 1]} : vector<2x128xf32> to vector<2x32xf32>
    %372 = arith.negf %371 : vector<2x32xf32>
    %373 = math.exp %372 : vector<2x32xf32>
    %cst_110 = arith.constant 1.000000e+00 : f32
    %374 = vector.broadcast %cst_110 : f32 to vector<2x32xf32>
    %375 = arith.addf %374, %373 : vector<2x32xf32>
    %376 = arith.divf %374, %375 : vector<2x32xf32>
    %377 = vector.extract_strided_slice %364 {offsets = [0, 64], sizes = [2, 32], strides = [1, 1]} : vector<2x128xf32> to vector<2x32xf32>
    %378 = math.tanh %377 : vector<2x32xf32>
    %379 = vector.extract_strided_slice %364 {offsets = [0, 96], sizes = [2, 32], strides = [1, 1]} : vector<2x128xf32> to vector<2x32xf32>
    %380 = arith.negf %379 : vector<2x32xf32>
    %381 = math.exp %380 : vector<2x32xf32>
    %cst_111 = arith.constant 1.000000e+00 : f32
    %382 = vector.broadcast %cst_111 : f32 to vector<2x32xf32>
    %383 = arith.addf %382, %381 : vector<2x32xf32>
    %384 = arith.divf %382, %383 : vector<2x32xf32>
    %385 = arith.mulf %376, %307 : vector<2x32xf32>
    %386 = arith.mulf %370, %378 : vector<2x32xf32>
    %387 = arith.addf %385, %386 : vector<2x32xf32>
    %388 = math.tanh %387 : vector<2x32xf32>
    %389 = arith.mulf %384, %388 : vector<2x32xf32>
    %cst_112 = arith.constant dense<0.000000e+00> : vector<2x128xf32>
    %390 = tpu.matmul %389, %4, %cst_112 {dimension_numbers = #tpu.dot_dimension_numbers<[1], [0], [0], [1], [0, 0, 1, 1], [], []>} : vector<2x32xf32>, vector<32x128xf32>, vector<2x128xf32> -> vector<2x128xf32>
    %cst_113 = arith.constant dense<0.000000e+00> : vector<2x128xf32>
    %391 = tpu.matmul %338, %5, %cst_113 {dimension_numbers = #tpu.dot_dimension_numbers<[1], [0], [0], [1], [0, 0, 1, 1], [], []>} : vector<2x32xf32>, vector<32x128xf32>, vector<2x128xf32> -> vector<2x128xf32>
    %392 = arith.addf %390, %391 : vector<2x128xf32>
    %393 = arith.addf %392, %11 : vector<2x128xf32>
    %394 = vector.extract_strided_slice %393 {offsets = [0, 0], sizes = [2, 32], strides = [1, 1]} : vector<2x128xf32> to vector<2x32xf32>
    %395 = arith.negf %394 : vector<2x32xf32>
    %396 = math.exp %395 : vector<2x32xf32>
    %cst_114 = arith.constant 1.000000e+00 : f32
    %397 = vector.broadcast %cst_114 : f32 to vector<2x32xf32>
    %398 = arith.addf %397, %396 : vector<2x32xf32>
    %399 = arith.divf %397, %398 : vector<2x32xf32>
    %400 = vector.extract_strided_slice %393 {offsets = [0, 32], sizes = [2, 32], strides = [1, 1]} : vector<2x128xf32> to vector<2x32xf32>
    %401 = arith.negf %400 : vector<2x32xf32>
    %402 = math.exp %401 : vector<2x32xf32>
    %cst_115 = arith.constant 1.000000e+00 : f32
    %403 = vector.broadcast %cst_115 : f32 to vector<2x32xf32>
    %404 = arith.addf %403, %402 : vector<2x32xf32>
    %405 = arith.divf %403, %404 : vector<2x32xf32>
    %406 = vector.extract_strided_slice %393 {offsets = [0, 64], sizes = [2, 32], strides = [1, 1]} : vector<2x128xf32> to vector<2x32xf32>
    %407 = math.tanh %406 : vector<2x32xf32>
    %408 = vector.extract_strided_slice %393 {offsets = [0, 96], sizes = [2, 32], strides = [1, 1]} : vector<2x128xf32> to vector<2x32xf32>
    %409 = arith.negf %408 : vector<2x32xf32>
    %410 = math.exp %409 : vector<2x32xf32>
    %cst_116 = arith.constant 1.000000e+00 : f32
    %411 = vector.broadcast %cst_116 : f32 to vector<2x32xf32>
    %412 = arith.addf %411, %410 : vector<2x32xf32>
    %413 = arith.divf %411, %412 : vector<2x32xf32>
    %414 = arith.mulf %405, %336 : vector<2x32xf32>
    %415 = arith.mulf %399, %407 : vector<2x32xf32>
    %416 = arith.addf %414, %415 : vector<2x32xf32>
    %417 = math.tanh %416 : vector<2x32xf32>
    %418 = arith.mulf %413, %417 : vector<2x32xf32>
    %cst_117 = arith.constant dense<0.000000e+00> : vector<2x16xf32>
    %419 = tpu.matmul %418, %0, %cst_117 {dimension_numbers = #tpu.dot_dimension_numbers<[1], [0], [0], [1], [0, 0, 1, 1], [], []>} : vector<2x32xf32>, vector<32x16xf32>, vector<2x16xf32> -> vector<2x16xf32>
    %420 = arith.addf %419, %25 : vector<2x16xf32>
    %cst_118 = arith.constant dense<0xFF800000> : vector<2xf32>
    %421 = vector.multi_reduction <maximumf>, %420, %cst_118 [1] : vector<2x16xf32> to vector<2xf32>
    %422 = vector.shape_cast %421 : vector<2xf32> to vector<2x1xf32>
    %423 = vector.broadcast %422 : vector<2x1xf32> to vector<2x16xf32>
    %424 = arith.subf %420, %423 : vector<2x16xf32>
    %425 = math.exp %424 : vector<2x16xf32>
    %cst_119 = arith.constant dense<0.000000e+00> : vector<2xf32>
    %426 = vector.multi_reduction <add>, %425, %cst_119 [1] : vector<2x16xf32> to vector<2xf32>
    %427 = vector.shape_cast %426 : vector<2xf32> to vector<2x1xf32>
    %428 = tpu.reciprocal %427 {approx = true} : vector<2x1xf32> -> vector<2x1xf32>
    %429 = vector.broadcast %428 : vector<2x1xf32> to vector<2x16xf32>
    %430 = arith.mulf %425, %429 : vector<2x16xf32>
    %cst_120 = arith.constant dense<0.000000e+00> : vector<2x32xf32>
    %431 = tpu.matmul %430, %1, %cst_120 {dimension_numbers = #tpu.dot_dimension_numbers<[1], [0], [0], [1], [0, 0, 1, 1], [], []>} : vector<2x16xf32>, vector<16x32xf32>, vector<2x32xf32> -> vector<2x32xf32>
    %432 = arith.index_cast %357 : i32 to index
    %c0_121 = arith.constant 0 : index
    %433 = vector.load %arg19[%432, %c0_121] : memref<48x32xf32, #tpu.memory_space<vmem>>, vector<2x32xf32>
    tpu.vector_store %arg19[%432, %c0_121], %418 {strides = array<i32>} : memref<48x32xf32, #tpu.memory_space<vmem>>, vector<2x32xf32>,
    %434 = arith.index_cast %357 : i32 to index
    %c0_122 = arith.constant 0 : index
    %435 = vector.load %arg20[%434, %c0_122] : memref<48x32xf32, #tpu.memory_space<vmem>>, vector<2x32xf32>
    tpu.vector_store %arg20[%434, %c0_122], %431 {strides = array<i32>} : memref<48x32xf32, #tpu.memory_space<vmem>>, vector<2x32xf32>,
    %c5_i32 = arith.constant 5 : i32
    %c8_i32_123 = arith.constant 8 : i32
    %436 = arith.muli %c5_i32, %c8_i32_123 : i32
    %437 = tpu.assume_multiple %436, 8 : i32
    %438 = arith.index_cast %437 : i32 to index
    %c0_124 = arith.constant 0 : index
    %439 = vector.load %arg18[%438, %c0_124] : memref<48x128xf32, #tpu.memory_space<vmem>>, vector<2x128xf32>
    %cst_125 = arith.constant dense<0.000000e+00> : vector<2x128xf32>
    %440 = tpu.matmul %431, %2, %cst_125 {dimension_numbers = #tpu.dot_dimension_numbers<[1], [0], [0], [1], [0, 0, 1, 1], [], []>} : vector<2x32xf32>, vector<32x128xf32>, vector<2x128xf32> -> vector<2x128xf32>
    %441 = arith.addf %439, %440 : vector<2x128xf32>
    %cst_126 = arith.constant dense<0.000000e+00> : vector<2x128xf32>
    %442 = tpu.matmul %389, %3, %cst_126 {dimension_numbers = #tpu.dot_dimension_numbers<[1], [0], [0], [1], [0, 0, 1, 1], [], []>} : vector<2x32xf32>, vector<32x128xf32>, vector<2x128xf32> -> vector<2x128xf32>
    %443 = arith.addf %441, %442 : vector<2x128xf32>
    %444 = arith.addf %443, %8 : vector<2x128xf32>
    %445 = vector.extract_strided_slice %444 {offsets = [0, 0], sizes = [2, 32], strides = [1, 1]} : vector<2x128xf32> to vector<2x32xf32>
    %446 = arith.negf %445 : vector<2x32xf32>
    %447 = math.exp %446 : vector<2x32xf32>
    %cst_127 = arith.constant 1.000000e+00 : f32
    %448 = vector.broadcast %cst_127 : f32 to vector<2x32xf32>
    %449 = arith.addf %448, %447 : vector<2x32xf32>
    %450 = arith.divf %448, %449 : vector<2x32xf32>
    %451 = vector.extract_strided_slice %444 {offsets = [0, 32], sizes = [2, 32], strides = [1, 1]} : vector<2x128xf32> to vector<2x32xf32>
    %452 = arith.negf %451 : vector<2x32xf32>
    %453 = math.exp %452 : vector<2x32xf32>
    %cst_128 = arith.constant 1.000000e+00 : f32
    %454 = vector.broadcast %cst_128 : f32 to vector<2x32xf32>
    %455 = arith.addf %454, %453 : vector<2x32xf32>
    %456 = arith.divf %454, %455 : vector<2x32xf32>
    %457 = vector.extract_strided_slice %444 {offsets = [0, 64], sizes = [2, 32], strides = [1, 1]} : vector<2x128xf32> to vector<2x32xf32>
    %458 = math.tanh %457 : vector<2x32xf32>
    %459 = vector.extract_strided_slice %444 {offsets = [0, 96], sizes = [2, 32], strides = [1, 1]} : vector<2x128xf32> to vector<2x32xf32>
    %460 = arith.negf %459 : vector<2x32xf32>
    %461 = math.exp %460 : vector<2x32xf32>
    %cst_129 = arith.constant 1.000000e+00 : f32
    %462 = vector.broadcast %cst_129 : f32 to vector<2x32xf32>
    %463 = arith.addf %462, %461 : vector<2x32xf32>
    %464 = arith.divf %462, %463 : vector<2x32xf32>
    %465 = arith.mulf %456, %387 : vector<2x32xf32>
    %466 = arith.mulf %450, %458 : vector<2x32xf32>
    %467 = arith.addf %465, %466 : vector<2x32xf32>
    %468 = math.tanh %467 : vector<2x32xf32>
    %469 = arith.mulf %464, %468 : vector<2x32xf32>
    %cst_130 = arith.constant dense<0.000000e+00> : vector<2x128xf32>
    %470 = tpu.matmul %469, %4, %cst_130 {dimension_numbers = #tpu.dot_dimension_numbers<[1], [0], [0], [1], [0, 0, 1, 1], [], []>} : vector<2x32xf32>, vector<32x128xf32>, vector<2x128xf32> -> vector<2x128xf32>
    %cst_131 = arith.constant dense<0.000000e+00> : vector<2x128xf32>
    %471 = tpu.matmul %418, %5, %cst_131 {dimension_numbers = #tpu.dot_dimension_numbers<[1], [0], [0], [1], [0, 0, 1, 1], [], []>} : vector<2x32xf32>, vector<32x128xf32>, vector<2x128xf32> -> vector<2x128xf32>
    %472 = arith.addf %470, %471 : vector<2x128xf32>
    %473 = arith.addf %472, %11 : vector<2x128xf32>
    %474 = vector.extract_strided_slice %473 {offsets = [0, 0], sizes = [2, 32], strides = [1, 1]} : vector<2x128xf32> to vector<2x32xf32>
    %475 = arith.negf %474 : vector<2x32xf32>
    %476 = math.exp %475 : vector<2x32xf32>
    %cst_132 = arith.constant 1.000000e+00 : f32
    %477 = vector.broadcast %cst_132 : f32 to vector<2x32xf32>
    %478 = arith.addf %477, %476 : vector<2x32xf32>
    %479 = arith.divf %477, %478 : vector<2x32xf32>
    %480 = vector.extract_strided_slice %473 {offsets = [0, 32], sizes = [2, 32], strides = [1, 1]} : vector<2x128xf32> to vector<2x32xf32>
    %481 = arith.negf %480 : vector<2x32xf32>
    %482 = math.exp %481 : vector<2x32xf32>
    %cst_133 = arith.constant 1.000000e+00 : f32
    %483 = vector.broadcast %cst_133 : f32 to vector<2x32xf32>
    %484 = arith.addf %483, %482 : vector<2x32xf32>
    %485 = arith.divf %483, %484 : vector<2x32xf32>
    %486 = vector.extract_strided_slice %473 {offsets = [0, 64], sizes = [2, 32], strides = [1, 1]} : vector<2x128xf32> to vector<2x32xf32>
    %487 = math.tanh %486 : vector<2x32xf32>
    %488 = vector.extract_strided_slice %473 {offsets = [0, 96], sizes = [2, 32], strides = [1, 1]} : vector<2x128xf32> to vector<2x32xf32>
    %489 = arith.negf %488 : vector<2x32xf32>
    %490 = math.exp %489 : vector<2x32xf32>
    %cst_134 = arith.constant 1.000000e+00 : f32
    %491 = vector.broadcast %cst_134 : f32 to vector<2x32xf32>
    %492 = arith.addf %491, %490 : vector<2x32xf32>
    %493 = arith.divf %491, %492 : vector<2x32xf32>
    %494 = arith.mulf %485, %416 : vector<2x32xf32>
    %495 = arith.mulf %479, %487 : vector<2x32xf32>
    %496 = arith.addf %494, %495 : vector<2x32xf32>
    %497 = math.tanh %496 : vector<2x32xf32>
    %498 = arith.mulf %493, %497 : vector<2x32xf32>
    %cst_135 = arith.constant dense<0.000000e+00> : vector<2x16xf32>
    %499 = tpu.matmul %498, %0, %cst_135 {dimension_numbers = #tpu.dot_dimension_numbers<[1], [0], [0], [1], [0, 0, 1, 1], [], []>} : vector<2x32xf32>, vector<32x16xf32>, vector<2x16xf32> -> vector<2x16xf32>
    %500 = arith.addf %499, %25 : vector<2x16xf32>
    %cst_136 = arith.constant dense<0xFF800000> : vector<2xf32>
    %501 = vector.multi_reduction <maximumf>, %500, %cst_136 [1] : vector<2x16xf32> to vector<2xf32>
    %502 = vector.shape_cast %501 : vector<2xf32> to vector<2x1xf32>
    %503 = vector.broadcast %502 : vector<2x1xf32> to vector<2x16xf32>
    %504 = arith.subf %500, %503 : vector<2x16xf32>
    %505 = math.exp %504 : vector<2x16xf32>
    %cst_137 = arith.constant dense<0.000000e+00> : vector<2xf32>
    %506 = vector.multi_reduction <add>, %505, %cst_137 [1] : vector<2x16xf32> to vector<2xf32>
    %507 = vector.shape_cast %506 : vector<2xf32> to vector<2x1xf32>
    %508 = tpu.reciprocal %507 {approx = true} : vector<2x1xf32> -> vector<2x1xf32>
    %509 = vector.broadcast %508 : vector<2x1xf32> to vector<2x16xf32>
    %510 = arith.mulf %505, %509 : vector<2x16xf32>
    %cst_138 = arith.constant dense<0.000000e+00> : vector<2x32xf32>
    %511 = tpu.matmul %510, %1, %cst_138 {dimension_numbers = #tpu.dot_dimension_numbers<[1], [0], [0], [1], [0, 0, 1, 1], [], []>} : vector<2x16xf32>, vector<16x32xf32>, vector<2x32xf32> -> vector<2x32xf32>
    %512 = arith.index_cast %437 : i32 to index
    %c0_139 = arith.constant 0 : index
    %513 = vector.load %arg19[%512, %c0_139] : memref<48x32xf32, #tpu.memory_space<vmem>>, vector<2x32xf32>
    tpu.vector_store %arg19[%512, %c0_139], %498 {strides = array<i32>} : memref<48x32xf32, #tpu.memory_space<vmem>>, vector<2x32xf32>,
    %514 = arith.index_cast %437 : i32 to index
    %c0_140 = arith.constant 0 : index
    %515 = vector.load %arg20[%514, %c0_140] : memref<48x32xf32, #tpu.memory_space<vmem>>, vector<2x32xf32>
    tpu.vector_store %arg20[%514, %c0_140], %511 {strides = array<i32>} : memref<48x32xf32, #tpu.memory_space<vmem>>, vector<2x32xf32>,
    %c6_i32 = arith.constant 6 : i32
    %c0_141 = arith.constant 0 : index
    %c0_142 = arith.constant 0 : index
    %516 = vector.load %arg13[%c0_141, %c0_142] : memref<1x32xf32, #tpu.memory_space<vmem>>, vector<1x32xf32>
    %517 = vector.shape_cast %516 : vector<1x32xf32> to vector<1x32xf32>
    %518 = vector.broadcast %517 : vector<1x32xf32> to vector<48x32xf32>
    %c0_143 = arith.constant 0 : index
    %c0_144 = arith.constant 0 : index
    %519 = vector.load %arg15[%c0_143, %c0_144] : memref<1x128xf32, #tpu.memory_space<vmem>>, vector<1x128xf32>
    %520 = vector.shape_cast %519 : vector<1x128xf32> to vector<1x128xf32>
    %521 = vector.broadcast %520 : vector<1x128xf32> to vector<48x128xf32>
    %c0_145 = arith.constant 0 : index
    %c0_146 = arith.constant 0 : index
    %522 = vector.load %arg19[%c0_145, %c0_146] : memref<48x32xf32, #tpu.memory_space<vmem>>, vector<48x32xf32>
    %c0_147 = arith.constant 0 : index
    %c0_148 = arith.constant 0 : index
    %523 = vector.load %arg11[%c0_147, %c0_148] : memref<32x32xf32, #tpu.memory_space<vmem>>, vector<32x32xf32>
    %cst_149 = arith.constant dense<0.000000e+00> : vector<48x32xf32>
    %524 = tpu.matmul %522, %523, %cst_149 {dimension_numbers = #tpu.dot_dimension_numbers<[1], [0], [0], [1], [0, 0, 1, 1], [], []>} : vector<48x32xf32>, vector<32x32xf32>, vector<48x32xf32> -> vector<48x32xf32>
    %c0_150 = arith.constant 0 : index
    %c0_151 = arith.constant 0 : index
    %525 = vector.load %arg20[%c0_150, %c0_151] : memref<48x32xf32, #tpu.memory_space<vmem>>, vector<48x32xf32>
    %c0_152 = arith.constant 0 : index
    %c0_153 = arith.constant 0 : index
    %526 = vector.load %arg12[%c0_152, %c0_153] : memref<32x32xf32, #tpu.memory_space<vmem>>, vector<32x32xf32>
    %cst_154 = arith.constant dense<0.000000e+00> : vector<48x32xf32>
    %527 = tpu.matmul %525, %526, %cst_154 {dimension_numbers = #tpu.dot_dimension_numbers<[1], [0], [0], [1], [0, 0, 1, 1], [], []>} : vector<48x32xf32>, vector<32x32xf32>, vector<48x32xf32> -> vector<48x32xf32>
    %528 = arith.addf %524, %527 : vector<48x32xf32>
    %529 = arith.addf %528, %518 : vector<48x32xf32>
    %530 = math.tanh %529 : vector<48x32xf32>
    %c0_155 = arith.constant 0 : index
    %c0_156 = arith.constant 0 : index
    %531 = vector.load %arg14[%c0_155, %c0_156] : memref<32x128xf32, #tpu.memory_space<vmem>>, vector<32x128xf32>
    %cst_157 = arith.constant dense<0.000000e+00> : vector<48x128xf32>
    %532 = tpu.matmul %530, %531, %cst_157 {dimension_numbers = #tpu.dot_dimension_numbers<[1], [0], [0], [1], [0, 0, 1, 1], [], []>} : vector<48x32xf32>, vector<32x128xf32>, vector<48x128xf32> -> vector<48x128xf32>
    %533 = arith.addf %532, %521 : vector<48x128xf32>
    %c0_158 = arith.constant 0 : index
    %c0_159 = arith.constant 0 : index
    %534 = vector.load %arg1[%c0_158, %c0_159] : memref<48x1xi32, #tpu.memory_space<vmem>>, vector<48x1xi32>
    %cst_160 = arith.constant dense<0xFF800000> : vector<48xf32>
    %535 = vector.multi_reduction <maximumf>, %533, %cst_160 [1] : vector<48x128xf32> to vector<48xf32>
    %536 = vector.shape_cast %535 : vector<48xf32> to vector<48x1xf32>
    %537 = vector.broadcast %536 : vector<48x1xf32> to vector<48x128xf32>
    %538 = arith.subf %533, %537 : vector<48x128xf32>
    %539 = math.exp %538 : vector<48x128xf32>
    %cst_161 = arith.constant dense<0.000000e+00> : vector<48xf32>
    %540 = vector.multi_reduction <add>, %539, %cst_161 [1] : vector<48x128xf32> to vector<48xf32>
    %541 = vector.shape_cast %540 : vector<48xf32> to vector<48x1xf32>
    %542 = math.log %541 : vector<48x1xf32>
    %543 = arith.addf %536, %542 : vector<48x1xf32>
    %544 = vector.broadcast %543 : vector<48x1xf32> to vector<48x128xf32>
    %545 = arith.subf %533, %544 : vector<48x128xf32>
    %546 = tpu.iota {dimensions = array<i32: 1>} : vector<48x128xi32>
    %547 = vector.broadcast %534 : vector<48x1xi32> to vector<48x128xi32>
    %548 = arith.cmpi eq, %546, %547 : vector<48x128xi32>
    %549 = arith.extui %548 : vector<48x128xi1> to vector<48x128xi32>
    %550 = arith.sitofp %549 : vector<48x128xi32> to vector<48x128xf32>
    %c0_i32_162 = arith.constant 0 : i32
    %551 = vector.broadcast %c0_i32_162 : i32 to vector<48x1xi32>
    %552 = arith.cmpi sge, %534, %551 : vector<48x1xi32>
    %553 = arith.extui %552 : vector<48x1xi1> to vector<48x1xi32>
    %554 = arith.sitofp %553 : vector<48x1xi32> to vector<48x1xf32>
    %555 = arith.mulf %550, %545 : vector<48x128xf32>
    %556 = vector.broadcast %554 : vector<48x1xf32> to vector<48x128xf32>
    %557 = arith.mulf %555, %556 : vector<48x128xf32>
    %558 = vector.shape_cast %557 : vector<48x128xf32> to vector<1x48x128xf32>
    %cst_163 = arith.constant dense<0.000000e+00> : vector<1xf32>
    %559 = vector.multi_reduction <add>, %558, %cst_163 [1, 2] : vector<1x48x128xf32> to vector<1xf32>
    %560 = vector.shape_cast %559 : vector<1xf32> to vector<1x1x1xf32>
    %561 = vector.extract %560[0, 0, 0] : f32 from vector<1x1x1xf32>
    %562 = vector.broadcast %561 : f32 to vector<1x1xf32>
    %cst_164 = arith.constant 0.000000e+00 : f32
    %563 = vector.broadcast %cst_164 : f32 to vector<1x1xf32>
    %564 = arith.subf %563, %562 : vector<1x1xf32>
    %c0_165 = arith.constant 0 : index
    %c0_166 = arith.constant 0 : index
    %565 = vector.load %arg16[%c0_165, %c0_166] : memref<1x1xf32, #tpu.memory_space<vmem>>, vector<1x1xf32>
    tpu.vector_store %arg16[%c0_165, %c0_166], %564 {strides = array<i32>} : memref<1x1xf32, #tpu.memory_space<vmem>>, vector<1x1xf32>,
    %566 = vector.shape_cast %554 : vector<48x1xf32> to vector<1x48x1xf32>
    %cst_167 = arith.constant dense<0.000000e+00> : vector<1xf32>
    %567 = vector.multi_reduction <add>, %566, %cst_167 [1, 2] : vector<1x48x1xf32> to vector<1xf32>
    %568 = vector.shape_cast %567 : vector<1xf32> to vector<1x1x1xf32>
    %569 = vector.extract %568[0, 0, 0] : f32 from vector<1x1x1xf32>
    %570 = vector.broadcast %569 : f32 to vector<1x1xf32>
    %c0_168 = arith.constant 0 : index
    %c0_169 = arith.constant 0 : index
    %571 = vector.load %arg17[%c0_168, %c0_169] : memref<1x1xf32, #tpu.memory_space<vmem>>, vector<1x1xf32>
    tpu.vector_store %arg17[%c0_168, %c0_169], %570 {strides = array<i32>} : memref<1x1xf32, #tpu.memory_space<vmem>>, vector<1x1xf32>,
    return
  }
}

</mosaic_0001>

<bundles_post_ra>
// kernel: tpu_custom_call.1
= control target key start
LH: loop header
LB: loop body
LE: loop exit
PB: predicated region body
PF: predicated region fallthrough
CT: control target
= control target key end

     0   :  { %s6081_s0 = inlined_call_operand.vmem [shape: f32[48,24], index: 0, kind: input, shape index: {}]   ;;  %s6082_s1 = inlined_call_operand.vmem [shape: s32[48,1], index: 1, kind: input, shape index: {}]   ;;  %s6083_s2 = inlined_call_operand.vmem [shape: f32[32,16], index: 2, kind: input, shape index: {}]   ;;  %s6084_s3 = inlined_call_operand.hbm [shape: f32[16,32], index: 3, kind: input, shape index: {}]   ;;  %s6085_s4 = inlined_call_operand.hbm [shape: f32[24,128], index: 4, kind: input, shape index: {}]   ;;  %s6086_s5 = inlined_call_operand.vmem [shape: f32[32,128], index: 5, kind: input, shape index: {}]   ;;  %s6087_s6 = inlined_call_operand.vmem [shape: f32[32,128], index: 6, kind: input, shape index: {}]   ;;  %s6088_s7 = inlined_call_operand.vmem [shape: f32[1,128], index: 7, kind: input, shape index: {}]   ;;  %s6089_s8 = inlined_call_operand.vmem [shape: f32[32,128], index: 8, kind: input, shape index: {}]   ;;  %s6090_s9 = inlined_call_operand.vmem [shape: f32[32,128], index: 9, kind: input, shape index: {}]   ;;  %s6091_s10 = inlined_call_operand.vmem [shape: f32[1,128], index: 10, kind: input, shape index: {}]   ;;  %s6092_s11 = inlined_call_operand.vmem [shape: f32[32,32], index: 11, kind: input, shape index: {}]   ;;  %s6093_s12 = inlined_call_operand.vmem [shape: f32[32,32], index: 12, kind: input, shape index: {}]   ;;  %s6094_s13 = inlined_call_operand.vmem [shape: f32[1,32], index: 13, kind: input, shape index: {}]   ;;  %s6095_s14 = inlined_call_operand.hbm [shape: f32[32,128], index: 14, kind: input, shape index: {}]   ;;  %s6096_s15 = inlined_call_operand.vmem [shape: f32[1,128], index: 15, kind: input, shape index: {}]   ;;  %s6097_s16 = inlined_call_operand.hbm [shape: f32[1,1], index: 16, kind: output, shape index: {0}]   ;;  %s6098_s17 = inlined_call_operand.hbm [shape: f32[1,1], index: 17, kind: output, shape index: {1}]  }
   0x1   :  { %6101 = sst [smem:[#allocation18_spill]] %s6081_s0 }
   0x2   :  { %6102 = sst [smem:[#allocation19_spill]] %s6082_s1 }
   0x3   :  { %23 = vsyncpa [#allocation6], 0 }
   0x4   :  { %24 = vsyncpa [#allocation9], 0 }
   0x5   :  { %25 = vsyncpa [#allocation7], 0 }
   0x6   :  { %26 = vsyncpa [#allocation13], 0  ;;  %s5214_s24 = smov [#allocation8]   ;;  %s5215_s26 = smov [#allocation5]  }
   0x7   :  { %s50_s25 = sshll.u32 %s5214_s24, 4  ;;  %s38_s27 = sshll.u32 %s5215_s26, 4  ;;  %s51_s25 = int_to_ptr.vmem [resolvable:$true] %s50_s25  ;;  %s5318_s27 = int_to_ptr.vmem [resolvable:$true] %s38_s27 }
   0x8   :  { %s5096_s0 = scalar_lea.hbm %s6085_s4, 384 }
   0x9   :  { %p5097_p0 = scmp.ne.s32.totalorder %s6085_s4, %s5096_s0  ;;  %p5100_p1 = scmp.lt.u32.totalorder %s5096_s0, %s6085_s4 }
   0xb   :  { %p5102_p2 = pnand %p5100_p1, %p5097_p0 }
   0xd   :  { %5105 = shalt.err (!%p5102_p2)
}
   0xe   :  { %s5106_s20 = scalar_lea.vmem %s51_s25, 384  ;;  %p5111_p4 = scmp.lt.s32.totalorder %s51_s25, %s51_s25 }
   0xf   :  { %p5107_p3 = scmp.ne.s32.totalorder %s51_s25, %s5106_s20  ;;  %p5112_p5 = scmp.lt.s32.totalorder %s5106_s20, %s5106_s20 }
  0x11   :  { %p5113_p6 = por %p5112_p5, %p5111_p4 }
  0x13   :  { %p5114_p7 = pnand %p5113_p6, %p5107_p3 }
  0x15   :  { %5117 = shalt.err (!%p5114_p7)
}
  0x16   :  { %s5216_s21 = smov 128   ;;  %s5217_s22 = smov 8  }
  0x17   :  { %56 = dma.hbm_to_vmem [thread:$0]  %s6085_s4, 384, %s51_s25, [#allocation9], %s5216_s21, %s5216_s21, %s5217_s22  }
  0x18   :  { %s5118_s29 = scalar_lea.hbm %s6084_s3, 256 }
  0x19   :  { %p5119_p8 = scmp.ne.s32.totalorder %s6084_s3, %s5118_s29  ;;  %p5122_p9 = scmp.lt.u32.totalorder %s5118_s29, %s6084_s3 }
  0x1b   :  { %p5124_p10 = pnand %p5122_p9, %p5119_p8 }
  0x1d   :  { %5127 = shalt.err (!%p5124_p10)
}
  0x1e   :  { %s5128_s1 = scalar_lea.vmem %s5318_s27, 256  ;;  %p5133_p12 = scmp.lt.s32.totalorder %s5318_s27, %s5318_s27 }
  0x1f   :  { %p5129_p11 = scmp.ne.s32.totalorder %s5318_s27, %s5128_s1  ;;  %p5134_p13 = scmp.lt.s32.totalorder %s5128_s1, %s5128_s1 }
  0x21   :  { %p5135_p0 = por %p5134_p13, %p5133_p12 }
  0x23   :  { %p5136_p1 = pnand %p5135_p0, %p5129_p11 }
  0x25   :  { %5139 = shalt.err (!%p5136_p1)
}
  0x26   :  { %44 = dma.hbm_to_vmem [thread:$0]  %s6084_s3, 256, %s5318_s27, [#allocation6], %s5216_s21, %s5216_s21, %s5217_s22  }
  0x27   :  { %s5218_s20 = smov [#allocation10]   ;;  %s5140_s28 = scalar_lea.hbm %s6095_s14, 512 }
  0x28   :  { %s80_s23 = sshll.u32 %s5218_s20, 4  ;;  %p5141_p2 = scmp.ne.s32.totalorder %s6095_s14, %s5140_s28  ;;  %s81_s23 = int_to_ptr.vmem [resolvable:$true] %s80_s23 }
  0x29   :  { %p5144_p3 = scmp.lt.u32.totalorder %s5140_s28, %s6095_s14 }
  0x2b   :  { %p5146_p4 = pnand %p5144_p3, %p5141_p2 }
  0x2d   :  { %5149 = shalt.err (!%p5146_p4)
}
  0x2e   :  { %s5150_s19 = scalar_lea.vmem %s81_s23, 512  ;;  %p5155_p6 = scmp.lt.s32.totalorder %s81_s23, %s81_s23 }
  0x2f   :  { %p5151_p5 = scmp.ne.s32.totalorder %s81_s23, %s5150_s19  ;;  %p5156_p7 = scmp.lt.s32.totalorder %s5150_s19, %s5150_s19 }
  0x31   :  { %p5157_p8 = por %p5156_p7, %p5155_p6 }
  0x33   :  { %p5158_p9 = pnand %p5157_p8, %p5151_p5 }
  0x35   :  { %5161 = shalt.err (!%p5158_p9)
}
  0x36   :  { %86 = dma.hbm_to_vmem [thread:$0]  %s6095_s14, 512, %s81_s23, [#allocation9], %s5216_s21, %s5216_s21, %s5217_s22  }
  0x37   :  { %5206 = dma.done.wait [#allocation6], 256  }
  0x38   :  { %5207 = vsyncadd [#allocation6], 4294967040 }
  0x39   :  { %5208 = dma.done.wait [#allocation9], 896  }
  0x3a   :  { %5209 = vsyncadd [#allocation9], 4294966400  ;;  %v5219_v0 = vmov 0.0|0.0   ;;  %vm5220_vm0 = vmmov 0   ;;  %v5221_v1 = vmov 0.0   ;;  %vm154_vm1 = vcmask 195584  }
  0x3b   :  { %4685 = vmatprep.subr.bf16.mxu1 %v5219_v0  ;;  %4266 = vmatprep.mubr.msk.f32.mxu1 %vm5220_vm0, %v5221_v1  ;;  %v151_v2 = vld [vmem:[#allocation8] sm:$0xff]  ;;  %v152_v3 = vld [vmem:[#allocation8 + $0x8] sm:$0xff]  ;;  %s6103_s20 = sld [smem:[#allocation18_spill]]  ;;  %v153_v9 = vld [vmem:[#allocation8 + $0x10] sm:$0xff]  ;;  %s5222_s21 = smov 64   ;;  %vm274_vm2 = vcmask 261120  }
  0x3c   :  { %v104_v4 = vld [vmem:[%s6086_s5] sm:$0xff]  ;;  %v4681_v5 = vpack.c.bf16 %v152_v3, %v151_v2  ;;  %v105_v6 = vld [vmem:[%s6086_s5 + $0x8] sm:$0xff]  ;;  %v106_v10 = vld [vmem:[%s6086_s5 + $0x10] sm:$0xff]  ;;  %s5223_s22 = smov 32   ;;  %275 = vst.msk [vmem:[#allocation3] sm:$0xff] %vm274_vm2, %v5221_v1  ;;  %vm790_vm3 = vcmask 254976  }
  0x3d   :  { %v5382_v8 = vpack.c.bf16 %v105_v6, %v104_v4  ;;  %v107_v11 = vld [vmem:[%s6086_s5 + $0x18] sm:$0xff]  ;;  %v108_v13 = vld [vmem:[%s6087_s6] sm:$0xff]  ;;  %v109_v14 = vld [vmem:[%s6087_s6 + $0x8] sm:$0xff]  ;;  %276 = vst.msk [vmem:[#allocation3 + $0x8] sm:$0xff] %vm274_vm2, %v5221_v1  ;;  %vm703_vm7 = vcmask 123904   ;;  %vm715_vm8 = vcmask 130048  }
  0x3e   :  { %4682 = vmatprep.subr.bf16.mxu0 %v4681_v5  ;;  %v5392_v12 = vpack.c.bf16 %v107_v11, %v106_v10  ;;  %v5405_v16 = vpack.c.bf16 %v109_v14, %v108_v13  ;;  %v110_v17 = vld [vmem:[%s6087_s6 + $0x10] sm:$0xff]  ;;  %v111_v18 = vld [vmem:[%s6087_s6 + $0x18] sm:$0xff]  ;;  %v5431_v27 = vld [vmem:[%s6088_s7] ss:$0 sm:$0xff]  ;;  %277 = vst.msk [vmem:[#allocation3 + $0x10] sm:$0xff] %vm274_vm2, %v5221_v1  ;;  %s6104_s3 = sld [smem:[#allocation19_spill]] }
  0x3f   :  { %4684 = vmatpush3.bf16.msra.mxu0 %v4681_v5  ;;  %4687 = vmatpush3.bf16.msra.mxu1 %v5382_v8  ;;  %v5418_v19 = vpack.c.bf16 %v111_v18, %v110_v17  ;;  %v116_v41 = vld [vmem:[%s6090_s9] sm:$0xff]  ;;  %v117_v42 = vld [vmem:[%s6090_s9 + $0x8] sm:$0xff]  ;;  %v118_v50 = vld [vmem:[%s6090_s9 + $0x10] sm:$0xff]  ;;  %278 = vst.msk [vmem:[#allocation3 + $0x18] sm:$0xff] %vm274_vm2, %v5221_v1  ;;  %vm3898_vm11 = vcmask 7168   ;;  %s5226_s25 = smov [#allocation12]  }
  0x40   :  { %4247 = vmatprep.subr.mxu0 %v153_v9  ;;  %4688 = vmatprep.subr.bf16.mxu1 %v5219_v0  ;;  %v5448_v44 = vpack.c.bf16 %v117_v42, %v116_v41  ;;  %v112_v46 = vld [vmem:[%s6089_s8] sm:$0xff]  ;;  %v113_v47 = vld [vmem:[%s6089_s8 + $0x8] sm:$0xff]  ;;  %v119_v51 = vld [vmem:[%s6090_s9 + $0x18] sm:$0xff]  ;;  %279 = vst.msk [vmem:[#allocation3 + $0x20] sm:$0xff] %vm274_vm2, %v5221_v1  ;;  %s3937_s23 = sshll.u32 %s5226_s25, 4  ;;  %s5227_s24 = smov [#allocation11]   ;;  %s3938_s23 = int_to_ptr.vmem [resolvable:$true] %s3937_s23 }
  0x41   :  { %v145_v7 = vld [vmem:[%s6103_s20] sm:$0xff]  ;;  %v146_v15 = vld [vmem:[%s6103_s20 + $0x8] sm:$0xff]  ;;  %v147_v43 = vld [vmem:[%s6103_s20 + $0x10] sm:$0xff]  ;;  %v5461_v48 = vpack.c.bf16 %v113_v47, %v112_v46  ;;  %v5474_v52 = vpack.c.bf16 %v119_v51, %v118_v50  ;;  %280 = vst.msk [vmem:[#allocation3 + $0x28] sm:$0xff] %vm274_vm2, %v5221_v1  ;;  %s3927_s26 = sshll.u32 %s5227_s24, 4  ;;  %s5162_s29 = scalar_lea.vmem %s3938_s23, 16  ;;  %s6049_s26 = int_to_ptr.vmem [resolvable:$true] %s3927_s26 }
  0x42   :  { %4249 = vmatprep.mubr.msk.f32.mxu0 %vm154_vm1, %v145_v7  ;;  %v148_v45 = vld [vmem:[%s6103_s20 + $0x18] sm:$0xff]  ;;  %v149_v49 = vld [vmem:[%s6103_s20 + $0x20] sm:$0xff]  ;;  %v150_v53 = vld [vmem:[%s6103_s20 + $0x28] sm:$0xff]  ;;  %281 = vst.msk [vmem:[#allocation4] sm:$0xff] %vm274_vm2, %v5221_v1  ;;  %p5163_p10 = scmp.ne.s32.totalorder %s3938_s23, %s5162_s29  ;;  %s5166_s0 = scalar_lea.vmem %s3938_s23, 32 }
  0x43   :  { %4248 = vmatpush3.msra.mxu0 %v153_v9  ;;  %4690 = vmatpush3.bf16.msra.mxu1 %v5392_v12  ;;  %v114_v54 = vld [vmem:[%s6089_s8 + $0x10] sm:$0xff]  ;;  %v115_v55 = vld [vmem:[%s6089_s8 + $0x18] sm:$0xff]  ;;  %282 = vst.msk [vmem:[#allocation4 + $0x8] sm:$0xff] %vm274_vm2, %v5221_v1  ;;  %283 = vst.msk [vmem:[#allocation4 + $0x10] sm:$0xff] %vm274_vm2, %v5221_v1  ;;  %p5167_p11 = scmp.lt.s32.totalorder %s3938_s23, %s3938_s23  ;;  %p5168_p12 = scmp.lt.s32.totalorder %s5166_s0, %s5162_s29 }
  0x44   :  { %4250 = vmatmul.mubr.msk.f32.vlgmr.msra.gmra.mrb[0].mxu0 %vm154_vm1, %v146_v15  ;;  %4691 = vmatprep.subr.bf16.mxu1 %v5219_v0  ;;  %v5487_v56 = vpack.c.bf16 %v115_v55, %v114_v54  ;;  %284 = vst.msk [vmem:[#allocation4 + $0x18] sm:$0xff] %vm274_vm2, %v5221_v1  ;;  %285 = vst.msk [vmem:[#allocation4 + $0x20] sm:$0xff] %vm274_vm2, %v5221_v1  ;;  %v5543_v5 = vld [vmem:[%s6091_s10] ss:$0 sm:$0xff] }
  0x45   :  { %4697 = vmatprep.subr.bf16.mxu0 %v5219_v0  ;;  %4252 = vmatprep.mubr.msk.f32.mxu0 %vm154_vm1, %v147_v43  ;;  %286 = vst.msk [vmem:[#allocation4 + $0x28] sm:$0xff] %vm274_vm2, %v5221_v1  ;;  %p5169_p13 = por %p5168_p12, %p5167_p11 }
  0x46   :  { %4267 = vmatmul.mubr.f32.vlgmr.msra.gmra.mrb[0].mxu1 %v5221_v1  ;;  %4699 = vmatpush3.bf16.msra.mxu0 %v5448_v44 }
  0x47   :  { %4693 = vmatpush3.bf16.msra.mxu1 %v5405_v16  ;;  %4277 = vmatprep.mubr.msk.f32.mxu1 %vm5220_vm0, %v5221_v1  ;;  %p5170_p0 = pnand %p5169_p13, %p5163_p10 }
  0x48   :  { %4694 = vmatprep.subr.bf16.mxu1 %v5219_v0  ;;  %4253 = vmatmul.mubr.msk.f32.gmra.mrb[2].mxu0 %vm154_vm1, %v148_v45  ;;  %v5224_v45 = vmov -1e+30  }
  0x49   :  { %4255 = vmatprep.mubr.msk.f32.mxu0 %vm154_vm1, %v149_v49  ;;  %4700 = vmatprep.subr.bf16.mxu0 %v5219_v0 }
  0x4a   :  { %4702 = vmatpush3.bf16.msra.mxu0 %v5474_v52 }
  0x4b   :  { %4696 = vmatpush3.bf16.msra.mxu1 %v5418_v19  ;;  %4709 = vmatprep.subr.bf16.mxu0 %v5219_v0 }
  0x4c   :  { %4703 = vmatprep.subr.bf16.mxu1 %v5219_v0  ;;  %4256 = vmatmul.mubr.msk.f32.gmra.mrb[4].mxu0 %vm154_vm1, %v150_v53 }
  0x4d   :  { %4288 = vmatprep.mubr.msk.f32.mxu0 %vm5220_vm0, %v5221_v1 }
  0x4e   :  { %4278 = vmatmul.mubr.f32.vlgmr.msra.gmra.mrb[2].mxu1 %v5221_v1 }
  0x4f   :  { %4299 = vmatprep.mubr.msk.f32.mxu1 %vm5220_vm0, %v5221_v1  ;;  %4705 = vmatpush3.bf16.msra.mxu1 %v5461_v48 }
  0x50   :  { %4706 = vmatprep.subr.bf16.mxu1 %v5219_v0  ;;  %4289 = vmatmul.mubr.f32.vlgmr.msra.gmra.mrb[6].mxu0 %v5221_v1 }
  0x51   :  { %4310 = vmatprep.mubr.msk.f32.mxu0 %vm5220_vm0, %v5221_v1 }
  0x53   :  { %4708 = vmatpush3.bf16.msra.mxu1 %v5487_v56 }
  0x54   :  { %4724 = vmatprep.subr.bf16.mxu1 %v5219_v0 }
 0x117   :  { %v4251_v20 = vpop.f32.mrb[0].mxu0 }
 0x118   :  { %269 = vst [vmem:[#allocation2 + $0x8] sm:$0xff] %v4251_v20  ;;  %v239_v21 = vpop.f32.mrb[1].mxu0 }
 0x119   :  { %268 = vst [vmem:[#allocation2] sm:$0xff] %v239_v21  ;;  %v357_v22 = vpop.f32.mrb[0].mxu1 }
 0x11a   :  { %v4268_v23 = vpop.f32.mrb[1].mxu1 }
 0x11b   :  { %v4254_v60 = vpop.f32.mrb[2].mxu0 }
 0x11c   :  { %271 = vst [vmem:[#allocation2 + $0x18] sm:$0xff] %v4254_v60  ;;  %v249_v61 = vpop.f32.mrb[3].mxu0  ;;  %v103_v60 = vld [vmem:[#allocation5 + $0x8] sm:$0xff] }
 0x11d   :  { %270 = vst [vmem:[#allocation2 + $0x10] sm:$0xff] %v249_v61 }
 0x11f   :  { %v4257_v62 = vpop.f32.mrb[4].mxu0 }
 0x120   :  { %v287_v24 = vld [vmem:[#allocation2] sm:$0x3]  ;;  %273 = vst [vmem:[#allocation2 + $0x28] sm:$0xff] %v4257_v62  ;;  %v259_v63 = vpop.f32.mrb[5].mxu0 }
 0x121   :  { %v361_v25 = vadd.f32 %v357_v22, %v287_v24  ;;  %v428_v26 = vpop.f32.mrb[2].mxu1  ;;  %272 = vst [vmem:[#allocation2 + $0x20] sm:$0xff] %v259_v63 }
 0x122   :  { %v4279_v28 = vpop.f32.mrb[3].mxu1 }
 0x123   :  { %v432_v29 = vadd.f32 %v428_v26, %v361_v25  ;;  %v524_v2 = vpop.f32.mrb[6].mxu0  ;;  %v98_v26 = vld [vmem:[%s6083_s2] sm:$0xff]  ;;  %v99_v28 = vld [vmem:[%s6083_s2 + $0x8] sm:$0xff] }
 0x124   :  { %v4290_v3 = vpop.f32.mrb[7].mxu0 }
 0x125   :  { %v433_v30 = vadd.f32 %v5431_v27, %v432_v29  ;;  %v100_v29 = vld [vmem:[%s6083_s2 + $0x10] sm:$0xff] }
 0x127   :  { %4938 = vtanh.f32 %v433_v30  ;;  %v3959_v32 = vmul.f32 -1.442695, %v433_v30  ;;  %v5562_v30 = vpack.c.bf16 %v99_v28, %v98_v26 }
 0x129   :  { %4940 = vpow2.f32 %v3959_v32  ;;  %4711 = vmatpush3.bf16.msra.mxu0 %v5562_v30 }
 0x12a   :  { %4712 = vmatprep.subr.bf16.mxu0 %v5219_v0 }
 0x131   :  { %v4939_v31 = vpop.eup %4938 }
 0x132   :  { %443 = vrot.lane.b32.xlu0 %v4939_v31, %s5222_s21  ;;  %v101_v31 = vld [vmem:[%s6083_s2 + $0x18] sm:$0xff] }
 0x133   :  { %v4941_v33 = vpop.eup %4940  ;;  %v5568_v32 = vpack.c.bf16 %v101_v31, %v100_v29 }
 0x134   :  { %v437_v34 = vadd.f32 1.0, %v4941_v33 }
 0x135   :  { %4714 = vmatpush3.bf16.msra.mxu0 %v5568_v32 }
 0x136   :  { %4942 = vrcp.f32 %v437_v34  ;;  %4715 = vmatprep.subr.bf16.mxu0 %v5219_v0 }
 0x140   :  { %v4943_v35 = vpop.eup %4942 }
 0x141   :  { %v441_v38 = vmul.f32 0.0, %v4943_v35 }
 0x1a4   :  { %v444_v36 = vpop.permute.xlu0 %443 }
 0x1a5   :  { %v446_v37 = vmul.f32 %v4943_v35, %v444_v36 }
 0x1a7   :  { %448 = vrot.lane.b32.xlu0 %v446_v37, %s5223_s22  ;;  %v134_v37 = vlaneseq }
 0x1a9   :  { %v5579_v41 = vand.u32 127, %v134_v37 }
 0x219   :  { %v449_v39 = vpop.permute.xlu0 %448 }
 0x21a   :  { %v5436_v40 = vadd.f32 %v449_v39, %v441_v38  ;;  %v135_v38 = vshrl.u32 %v134_v37, 7 }
 0x21c   :  { %4944 = vtanh.f32 %v5436_v40  ;;  %v140_v39 = vadd.s32 1, %v135_v38  ;;  %v138_v42 = vmul.u32 8, %v135_v38 }
 0x21e   :  { %v141_v43 = vmul.u32 8, %v140_v39  ;;  %vm139_vm4 = vcmp.ge.s32.totalorder %v5579_v41, %v138_v42 }
 0x220   :  { %vm142_vm5 = vcmp.lt.s32.totalorder %v5579_v41, %v141_v43 }
 0x221   :  { %vm143_vm6 = vmand %vm139_vm4, %vm142_vm5 }
 0x222   :  { %v5583_v46 = vsel %vm143_vm6, 0.0, %v5224_v45  ;;  %vm3896_vm6 = vcmask 0  }
 0x226   :  { %v4945_v57 = vpop.eup %4944 }
 0x227   :  { %454 = vrot.lane.b32.xlu1 %v4945_v57, %s5222_s21 }
 0x299   :  { %v455_v58 = vpop.permute.xlu1 %454 }
 0x29a   :  { %v457_v59 = vmul.f32 %v4943_v35, %v455_v58 }
 0x29c   :  { %529 = vrot.lane.b32.xlu1 %v457_v59, %s5223_s22  ;;  %v102_v59 = vld [vmem:[#allocation5] sm:$0xff] }
 0x29d   :  { %v5588_v61 = vpack.c.bf16 %v103_v60, %v102_v59 }
 0x30e   :  { %v530_v4 = vpop.permute.xlu1 %529 }
 0x30f   :  { %4300 = vmatmul.mubr.msk.f32.vlgmr.msra.gmra.mrb[4].mxu1 %vm274_vm2, %v530_v4 }
 0x310   :  { %4726 = vmatpush3.bf16.msra.mxu1 %v5405_v16  ;;  %4339 = vmatprep.mubr.msk.f32.mxu1 %vm5220_vm0, %v5221_v1 }
 0x311   :  { %4727 = vmatprep.subr.bf16.mxu1 %v5219_v0 }
 0x314   :  { %4729 = vmatpush3.bf16.msra.mxu1 %v5418_v19 }
 0x315   :  { %4736 = vmatprep.subr.bf16.mxu1 %v5219_v0 }
 0x317   :  { %4340 = vmatmul.mubr.msk.f32.vlgmr.msra.gmra.mrb[6].mxu1 %vm274_vm2, %v530_v4 }
 0x318   :  { %4738 = vmatpush3.bf16.msra.mxu1 %v5461_v48  ;;  %4361 = vmatprep.mubr.msk.f32.mxu1 %vm5220_vm0, %v5221_v1 }
 0x319   :  { %4739 = vmatprep.subr.bf16.mxu1 %v5219_v0 }
 0x31c   :  { %4741 = vmatpush3.bf16.msra.mxu1 %v5487_v56 }
 0x31d   :  { %4748 = vmatprep.subr.bf16.mxu1 %v5219_v0 }
 0x3e2   :  { %v599_v6 = vpop.f32.mrb[4].mxu1 }
 0x3e3   :  { %v600_v7 = vadd.f32 %v599_v6, %v524_v2  ;;  %v4301_v9 = vpop.f32.mrb[5].mxu1  ;;  %v794_v6 = vld [vmem:[#allocation2 + $0x8] sm:$0x3] }
 0x3e5   :  { %v603_v10 = vadd.f32 %v5543_v5, %v600_v7 }
 0x3e7   :  { %4946 = vtanh.f32 %v603_v10  ;;  %v3961_v15 = vmul.f32 -1.442695, %v603_v10 }
 0x3e9   :  { %4948 = vpow2.f32 %v3961_v15 }
 0x3ea   :  { %v5546_v11 = vpop.f32.mrb[6].mxu1 }
 0x3eb   :  { %v4341_v13 = vpop.f32.mrb[7].mxu1 }
 0x3f1   :  { %v4947_v14 = vpop.eup %4946 }
 0x3f2   :  { %613 = vrot.lane.b32.xlu0 %v4947_v14, %s5222_s21 }
 0x3f3   :  { %v4949_v17 = vpop.eup %4948 }
 0x3f4   :  { %v607_v18 = vadd.f32 1.0, %v4949_v17 }
 0x3f6   :  { %4950 = vrcp.f32 %v607_v18 }
 0x400   :  { %v4951_v20 = vpop.eup %4950 }
 0x401   :  { %v611_v23 = vmul.f32 0.0, %v4951_v20 }
 0x464   :  { %v614_v21 = vpop.permute.xlu0 %613 }
 0x465   :  { %v616_v22 = vmul.f32 %v4951_v20, %v614_v21 }
 0x467   :  { %618 = vrot.lane.b32.xlu1 %v616_v22, %s5223_s22 }
 0x4d9   :  { %v619_v24 = vpop.permute.xlu1 %618 }
 0x4da   :  { %v5550_v25 = vadd.f32 %v619_v24, %v611_v23 }
 0x4dc   :  { %4952 = vtanh.f32 %v5550_v25 }
 0x4e6   :  { %v4953_v33 = vpop.eup %4952 }
 0x4e7   :  { %624 = vrot.lane.b32.xlu0 %v4953_v33, %s5222_s21 }
 0x559   :  { %v625_v34 = vpop.permute.xlu0 %624 }
 0x55a   :  { %v627_v35 = vmul.f32 %v4951_v20, %v625_v34 }
 0x55c   :  { %629 = vrot.lane.b32.xlu1 %v627_v35, %s5223_s22 }
 0x5ce   :  { %v630_v36 = vpop.permute.xlu1 %629 }
 0x5cf   :  { %791 = vst.msk [vmem:[#allocation3] sm:$0x3] %vm790_vm3, %v630_v36  ;;  %4311 = vmatmul.mubr.msk.f32.vlgmr.msra.gmra.mrb[8].mxu0 %vm274_vm2, %v630_v36 }
 0x5d0   :  { %4317 = vmatprep.mubr.msk.f32.mxu0 %vm5220_vm0, %v5221_v1  ;;  %4717 = vmatpush3.bf16.msra.mxu0 %v5588_v61 }
 0x5d1   :  { %4718 = vmatprep.subr.bf16.mxu0 %v5219_v0 }
 0x6a2   :  { %v699_v47 = vpop.f32.mrb[8].mxu0 }
 0x6a3   :  { %v700_v49 = vadd.f32 %v699_v47, %v5583_v46  ;;  %v4312_v50 = vpop.f32.mrb[9].mxu0 }
 0x6a5   :  { %v704_v51 = vsel %vm703_vm7, %v700_v49, -inf }
 0x6a6   :  { %705 = vmax.xlane.f32.xlu0 %v704_v51 }
 0x733   :  { %v706_v53 = vpop.xlane.xlu0 %705 }
 0x734   :  { %v707_v54 = vsub.f32 %v700_v49, %v706_v53 }
 0x736   :  { %v708_v55 = vmul.f32 1.442695, %v707_v54 }
 0x738   :  { %4954 = vpow2.f32 %v708_v55 }
 0x742   :  { %v4955_v57 = vpop.eup %4954 }
 0x743   :  { %v710_v58 = vsel %vm703_vm7, %v4955_v57, 0.0 }
 0x744   :  { %711 = vadd.xlane.f32.xlu1 %v710_v58 }
 0x7d1   :  { %v712_v62 = vpop.xlane.xlu1 %711 }
 0x7d2   :  { %4956 = vrcp.f32 %v712_v62 }
 0x7dc   :  { %v4957_v63 = vpop.eup %4956 }
 0x7dd   :  { %v714_v2 = vmul.f32 %v4957_v63, %v4955_v57 }
 0x7df   :  { %4318 = vmatmul.mubr.msk.f32.vlgmr.msra.gmra.mrb[10].mxu0 %vm715_vm8, %v714_v2 }
 0x7e0   :  { %4720 = vmatpush3.bf16.msra.mxu0 %v5382_v8  ;;  %4328 = vmatprep.mubr.msk.f32.mxu0 %vm5220_vm0, %v5221_v1 }
 0x7e1   :  { %4721 = vmatprep.subr.bf16.mxu0 %v5219_v0 }
 0x7e4   :  { %4723 = vmatpush3.bf16.msra.mxu0 %v5392_v12 }
 0x7e5   :  { %4730 = vmatprep.subr.bf16.mxu0 %v5219_v0 }
 0x8b2   :  { %v785_v3 = vpop.f32.mrb[10].mxu0 }
 0x8b3   :  { %792 = vst.msk [vmem:[#allocation4] sm:$0x3] %vm790_vm3, %v785_v3  ;;  %v4319_v4 = vpop.f32.mrb[11].mxu0  ;;  %4329 = vmatmul.mubr.msk.f32.vlgmr.msra.gmra.mrb[12].mxu0 %vm274_vm2, %v785_v3 }
 0x8b4   :  { %4732 = vmatpush3.bf16.msra.mxu0 %v5448_v44  ;;  %4350 = vmatprep.mubr.msk.f32.mxu0 %vm5220_vm0, %v5221_v1 }
 0x8b5   :  { %4733 = vmatprep.subr.bf16.mxu0 %v5219_v0 }
 0x8b8   :  { %4735 = vmatpush3.bf16.msra.mxu0 %v5474_v52 }
 0x8b9   :  { %4742 = vmatprep.subr.bf16.mxu0 %v5219_v0 }
 0x8bb   :  { %4351 = vmatmul.mubr.msk.f32.vlgmr.msra.gmra.mrb[14].mxu0 %vm274_vm2, %v630_v36 }
 0x8bc   :  { %4744 = vmatpush3.bf16.msra.mxu0 %v5562_v30  ;;  %4372 = vmatprep.mubr.msk.f32.mxu0 %vm5220_vm0, %v5221_v1 }
 0x8bd   :  { %4745 = vmatprep.subr.bf16.mxu0 %v5219_v0 }
 0x8c0   :  { %4747 = vmatpush3.bf16.msra.mxu0 %v5568_v32 }
 0x8c1   :  { %4757 = vmatprep.subr.bf16.mxu0 %v5219_v0 }
 0x986   :  { %v864_v7 = vpop.f32.mrb[12].mxu0 }
 0x987   :  { %v868_v9 = vadd.f32 %v864_v7, %v794_v6  ;;  %v4330_v10 = vpop.f32.mrb[13].mxu0 }
 0x989   :  { %v939_v13 = vadd.f32 %v5546_v11, %v868_v9 }
 0x98b   :  { %v940_v14 = vadd.f32 %v5431_v27, %v939_v13 }
 0x98d   :  { %4958 = vtanh.f32 %v940_v14  ;;  %v3966_v20 = vmul.f32 -1.442695, %v940_v14 }
 0x98e   :  { %v1031_v15 = vpop.f32.mrb[14].mxu0 }
 0x98f   :  { %v4352_v17 = vpop.f32.mrb[15].mxu0  ;;  %4960 = vpow2.f32 %v3966_v20  ;;  %v1300_v20 = vld [vmem:[#allocation2 + $0x10] sm:$0x3] }
 0x997   :  { %v4959_v18 = vpop.eup %4958 }
 0x998   :  { %950 = vrot.lane.b32.xlu0 %v4959_v18, %s5222_s21 }
 0x999   :  { %v4961_v21 = vpop.eup %4960 }
 0x99a   :  { %v944_v22 = vadd.f32 1.0, %v4961_v21 }
 0x99c   :  { %4962 = vrcp.f32 %v944_v22 }
 0x9a6   :  { %v4963_v23 = vpop.eup %4962 }
 0x9a7   :  { %v948_v11 = vmul.f32 %v4963_v23, %v5436_v40 }
 0xa0a   :  { %v951_v24 = vpop.permute.xlu0 %950 }
 0xa0b   :  { %v953_v26 = vmul.f32 %v4963_v23, %v951_v24 }
 0xa0d   :  { %955 = vrot.lane.b32.xlu1 %v953_v26, %s5223_s22 }
 0xa7f   :  { %v956_v28 = vpop.permute.xlu1 %955 }
 0xa80   :  { %v5619_v29 = vadd.f32 %v956_v28, %v948_v11 }
 0xa82   :  { %4964 = vtanh.f32 %v5619_v29 }
 0xa8c   :  { %v4965_v31 = vpop.eup %4964 }
 0xa8d   :  { %961 = vrot.lane.b32.xlu0 %v4965_v31, %s5222_s21 }
 0xaff   :  { %v962_v33 = vpop.permute.xlu0 %961 }
 0xb00   :  { %v964_v34 = vmul.f32 %v4963_v23, %v962_v33 }
 0xb02   :  { %1036 = vrot.lane.b32.xlu1 %v964_v34, %s5223_s22 }
 0xb74   :  { %v1037_v35 = vpop.permute.xlu1 %1036 }
 0xb75   :  { %4362 = vmatmul.mubr.msk.f32.vlgmr.msra.gmra.mrb[8].mxu1 %vm274_vm2, %v1037_v35 }
 0xb76   :  { %4750 = vmatpush3.bf16.msra.mxu1 %v5588_v61  ;;  %4379 = vmatprep.mubr.msk.f32.mxu1 %vm5220_vm0, %v5221_v1 }
 0xb77   :  { %4751 = vmatprep.subr.bf16.mxu1 %v5219_v0 }
 0xc48   :  { %v1106_v40 = vpop.f32.mrb[8].mxu1 }
 0xc49   :  { %v1107_v36 = vadd.f32 %v1106_v40, %v1031_v15  ;;  %v4363_v37 = vpop.f32.mrb[9].mxu1 }
 0xc4b   :  { %v1110_v38 = vadd.f32 %v5543_v5, %v1107_v36 }
 0xc4d   :  { %4966 = vtanh.f32 %v1110_v38  ;;  %v3969_v42 = vmul.f32 -1.442695, %v1110_v38 }
 0xc4f   :  { %4968 = vpow2.f32 %v3969_v42 }
 0xc57   :  { %v4967_v39 = vpop.eup %4966 }
 0xc58   :  { %1120 = vrot.lane.b32.xlu0 %v4967_v39, %s5222_s21 }
 0xc59   :  { %v4969_v43 = vpop.eup %4968 }
 0xc5a   :  { %v1114_v45 = vadd.f32 1.0, %v4969_v43 }
 0xc5c   :  { %4970 = vrcp.f32 %v1114_v45 }
 0xc66   :  { %v4971_v47 = vpop.eup %4970 }
 0xc67   :  { %v1118_v51 = vmul.f32 %v4971_v47, %v5550_v25 }
 0xcca   :  { %v1121_v49 = vpop.permute.xlu0 %1120 }
 0xccb   :  { %v1123_v50 = vmul.f32 %v4971_v47, %v1121_v49 }
 0xccd   :  { %1125 = vrot.lane.b32.xlu1 %v1123_v50, %s5223_s22 }
 0xd3f   :  { %v1126_v53 = vpop.permute.xlu1 %1125 }
 0xd40   :  { %v5633_v54 = vadd.f32 %v1126_v53, %v1118_v51 }
 0xd42   :  { %4972 = vtanh.f32 %v5633_v54 }
 0xd4c   :  { %v4973_v55 = vpop.eup %4972 }
 0xd4d   :  { %1131 = vrot.lane.b32.xlu0 %v4973_v55, %s5222_s21 }
 0xdbf   :  { %v1132_v57 = vpop.permute.xlu0 %1131 }
 0xdc0   :  { %v1134_v58 = vmul.f32 %v4971_v47, %v1132_v57 }
 0xdc2   :  { %1136 = vrot.lane.b32.xlu1 %v1134_v58, %s5223_s22 }
 0xe34   :  { %v1137_v59 = vpop.permute.xlu1 %1136 }
 0xe35   :  { %1296 = vst.msk [vmem:[#allocation3 + $0x8] sm:$0x3] %vm790_vm3, %v1137_v59  ;;  %4373 = vmatmul.mubr.msk.f32.vlgmr.msra.gmra.mrb[16].mxu0 %vm274_vm2, %v1137_v59 }
 0xe36   :  { %4759 = vmatpush3.bf16.msra.mxu0 %v5405_v16  ;;  %4401 = vmatprep.mubr.msk.f32.mxu0 %vm5220_vm0, %v5221_v1 }
 0xe37   :  { %4760 = vmatprep.subr.bf16.mxu0 %v5219_v0 }
 0xe3a   :  { %4762 = vmatpush3.bf16.msra.mxu0 %v5418_v19 }
 0xe3b   :  { %4769 = vmatprep.subr.bf16.mxu0 %v5219_v0 }
 0xe3d   :  { %4402 = vmatmul.mubr.msk.f32.vlgmr.msra.gmra.mrb[18].mxu0 %vm274_vm2, %v1037_v35 }
 0xe3e   :  { %4771 = vmatpush3.bf16.msra.mxu0 %v5461_v48  ;;  %4423 = vmatprep.mubr.msk.f32.mxu0 %vm5220_vm0, %v5221_v1 }
 0xe3f   :  { %4772 = vmatprep.subr.bf16.mxu0 %v5219_v0 }
 0xe42   :  { %4774 = vmatpush3.bf16.msra.mxu0 %v5487_v56 }
 0xe43   :  { %4781 = vmatprep.subr.bf16.mxu0 %v5219_v0 }
 0xf08   :  { %v1206_v25 = vpop.f32.mrb[16].mxu0 }
 0xf09   :  { %v1207_v60 = vadd.f32 %v1206_v25, %v5583_v46  ;;  %v4374_v62 = vpop.f32.mrb[17].mxu0 }
 0xf0b   :  { %v1210_v63 = vsel %vm703_vm7, %v1207_v60, -inf }
 0xf0c   :  { %1211 = vmax.xlane.f32.xlu0 %v1210_v63 }
 0xf10   :  { %v1441_v2 = vpop.f32.mrb[18].mxu0 }
 0xf11   :  { %v4403_v3 = vpop.f32.mrb[19].mxu0 }
 0xf99   :  { %v1212_v4 = vpop.xlane.xlu0 %1211 }
 0xf9a   :  { %v1213_v6 = vsub.f32 %v1207_v60, %v1212_v4 }
 0xf9c   :  { %v1214_v7 = vmul.f32 1.442695, %v1213_v6 }
 0xf9e   :  { %4974 = vpow2.f32 %v1214_v7 }
 0xfa8   :  { %v4975_v9 = vpop.eup %4974 }
 0xfa9   :  { %v1216_v10 = vsel %vm703_vm7, %v4975_v9, 0.0 }
 0xfaa   :  { %1217 = vadd.xlane.f32.xlu1 %v1216_v10 }
0x1037   :  { %v1218_v13 = vpop.xlane.xlu1 %1217 }
0x1038   :  { %4976 = vrcp.f32 %v1218_v13 }
0x1042   :  { %v4977_v14 = vpop.eup %4976 }
0x1043   :  { %v1220_v15 = vmul.f32 %v4977_v14, %v4975_v9 }
0x1045   :  { %4380 = vmatmul.mubr.msk.f32.vlgmr.msra.gmra.mrb[10].mxu1 %vm715_vm8, %v1220_v15 }
0x1046   :  { %4753 = vmatpush3.bf16.msra.mxu1 %v5382_v8  ;;  %4390 = vmatprep.mubr.msk.f32.mxu1 %vm5220_vm0, %v5221_v1 }
0x1047   :  { %4754 = vmatprep.subr.bf16.mxu1 %v5219_v0 }
0x104a   :  { %4756 = vmatpush3.bf16.msra.mxu1 %v5392_v12 }
0x104b   :  { %4763 = vmatprep.subr.bf16.mxu1 %v5219_v0 }
0x1118   :  { %v1290_v17 = vpop.f32.mrb[10].mxu1 }
0x1119   :  { %1298 = vst.msk [vmem:[#allocation4 + $0x8] sm:$0x3] %vm790_vm3, %v1290_v17  ;;  %v4381_v18 = vpop.f32.mrb[11].mxu1  ;;  %4391 = vmatmul.mubr.msk.f32.vlgmr.msra.gmra.mrb[12].mxu1 %vm274_vm2, %v1290_v17 }
0x111a   :  { %4765 = vmatpush3.bf16.msra.mxu1 %v5448_v44  ;;  %4412 = vmatprep.mubr.msk.f32.mxu1 %vm5220_vm0, %v5221_v1 }
0x111b   :  { %4766 = vmatprep.subr.bf16.mxu1 %v5219_v0 }
0x111e   :  { %4768 = vmatpush3.bf16.msra.mxu1 %v5474_v52 }
0x111f   :  { %4775 = vmatprep.subr.bf16.mxu1 %v5219_v0 }
0x1121   :  { %4413 = vmatmul.mubr.msk.f32.vlgmr.msra.gmra.mrb[14].mxu1 %vm274_vm2, %v1137_v59 }
0x1122   :  { %4777 = vmatpush3.bf16.msra.mxu1 %v5562_v30  ;;  %4434 = vmatprep.mubr.msk.f32.mxu1 %vm5220_vm0, %v5221_v1 }
0x1123   :  { %4778 = vmatprep.subr.bf16.mxu1 %v5219_v0 }
0x1126   :  { %4780 = vmatpush3.bf16.msra.mxu1 %v5568_v32 }
0x1127   :  { %4790 = vmatprep.subr.bf16.mxu1 %v5219_v0 }
0x11ec   :  { %v1370_v21 = vpop.f32.mrb[12].mxu1 }
0x11ed   :  { %v1374_v22 = vadd.f32 %v1370_v21, %v1300_v20  ;;  %v4392_v23 = vpop.f32.mrb[13].mxu1 }
0x11ef   :  { %v1445_v24 = vadd.f32 %v1441_v2, %v1374_v22 }
0x11f1   :  { %v1446_v26 = vadd.f32 %v5431_v27, %v1445_v24 }
0x11f3   :  { %4978 = vtanh.f32 %v1446_v26  ;;  %v3974_v33 = vmul.f32 -1.442695, %v1446_v26 }
0x11f4   :  { %v1537_v11 = vpop.f32.mrb[14].mxu1 }
0x11f5   :  { %v4414_v28 = vpop.f32.mrb[15].mxu1  ;;  %4980 = vpow2.f32 %v3974_v33  ;;  %v1806_v33 = vld [vmem:[#allocation2 + $0x18] sm:$0x3] }
0x11fd   :  { %v4979_v31 = vpop.eup %4978 }
0x11fe   :  { %1456 = vrot.lane.b32.xlu0 %v4979_v31, %s5222_s21 }
0x11ff   :  { %v4981_v34 = vpop.eup %4980 }
0x1200   :  { %v1450_v35 = vadd.f32 1.0, %v4981_v34 }
0x1202   :  { %4982 = vrcp.f32 %v1450_v35 }
0x120c   :  { %v4983_v40 = vpop.eup %4982 }
0x120d   :  { %v1454_v38 = vmul.f32 %v4983_v40, %v5619_v29 }
0x1270   :  { %v1457_v36 = vpop.permute.xlu0 %1456 }
0x1271   :  { %v1459_v37 = vmul.f32 %v4983_v40, %v1457_v36 }
0x1273   :  { %1461 = vrot.lane.b32.xlu1 %v1459_v37, %s5223_s22 }
0x12e5   :  { %v1462_v39 = vpop.permute.xlu1 %1461 }
0x12e6   :  { %v5682_v42 = vadd.f32 %v1462_v39, %v1454_v38 }
0x12e8   :  { %4984 = vtanh.f32 %v5682_v42 }
0x12f2   :  { %v4985_v43 = vpop.eup %4984 }
0x12f3   :  { %1467 = vrot.lane.b32.xlu0 %v4985_v43, %s5222_s21 }
0x1365   :  { %v1468_v45 = vpop.permute.xlu0 %1467 }
0x1366   :  { %v1470_v47 = vmul.f32 %v4983_v40, %v1468_v45 }
0x1368   :  { %1542 = vrot.lane.b32.xlu1 %v1470_v47, %s5223_s22 }
0x13da   :  { %v1543_v49 = vpop.permute.xlu1 %1542 }
0x13db   :  { %4424 = vmatmul.mubr.msk.f32.vlgmr.msra.gmra.mrb[20].mxu0 %vm274_vm2, %v1543_v49 }
0x13dc   :  { %4783 = vmatpush3.bf16.msra.mxu0 %v5588_v61  ;;  %4441 = vmatprep.mubr.msk.f32.mxu0 %vm5220_vm0, %v5221_v1 }
0x13dd   :  { %4784 = vmatprep.subr.bf16.mxu0 %v5219_v0 }
0x14ae   :  { %v1612_v29 = vpop.f32.mrb[20].mxu0 }
0x14af   :  { %v1613_v50 = vadd.f32 %v1612_v29, %v1537_v11  ;;  %v4425_v51 = vpop.f32.mrb[21].mxu0 }
0x14b1   :  { %v1616_v53 = vadd.f32 %v5543_v5, %v1613_v50 }
0x14b3   :  { %4986 = vtanh.f32 %v1616_v53  ;;  %v3977_v57 = vmul.f32 -1.442695, %v1616_v53 }
0x14b5   :  { %4988 = vpow2.f32 %v3977_v57 }
0x14bd   :  { %v4987_v55 = vpop.eup %4986 }
0x14be   :  { %1626 = vrot.lane.b32.xlu0 %v4987_v55, %s5222_s21 }
0x14bf   :  { %v4989_v58 = vpop.eup %4988 }
0x14c0   :  { %v1620_v59 = vadd.f32 1.0, %v4989_v58 }
0x14c2   :  { %4990 = vrcp.f32 %v1620_v59 }
0x14cc   :  { %v4991_v25 = vpop.eup %4990 }
0x14cd   :  { %v1624_v63 = vmul.f32 %v4991_v25, %v5633_v54 }
0x1530   :  { %v1627_v60 = vpop.permute.xlu0 %1626 }
0x1531   :  { %v1629_v62 = vmul.f32 %v4991_v25, %v1627_v60 }
0x1533   :  { %1631 = vrot.lane.b32.xlu1 %v1629_v62, %s5223_s22 }
0x15a5   :  { %v1632_v2 = vpop.permute.xlu1 %1631 }
0x15a6   :  { %v5696_v3 = vadd.f32 %v1632_v2, %v1624_v63 }
0x15a8   :  { %4992 = vtanh.f32 %v5696_v3 }
0x15b2   :  { %v4993_v4 = vpop.eup %4992 }
0x15b3   :  { %1637 = vrot.lane.b32.xlu0 %v4993_v4, %s5222_s21 }
0x1625   :  { %v1638_v6 = vpop.permute.xlu0 %1637 }
0x1626   :  { %v1640_v7 = vmul.f32 %v4991_v25, %v1638_v6 }
0x1628   :  { %1642 = vrot.lane.b32.xlu1 %v1640_v7, %s5223_s22 }
0x169a   :  { %v1643_v9 = vpop.permute.xlu1 %1642 }
0x169b   :  { %1802 = vst.msk [vmem:[#allocation3 + $0x10] sm:$0x3] %vm790_vm3, %v1643_v9  ;;  %4435 = vmatmul.mubr.msk.f32.vlgmr.msra.gmra.mrb[16].mxu1 %vm274_vm2, %v1643_v9 }
0x169c   :  { %4792 = vmatpush3.bf16.msra.mxu1 %v5405_v16  ;;  %4463 = vmatprep.mubr.msk.f32.mxu1 %vm5220_vm0, %v5221_v1 }
0x169d   :  { %4793 = vmatprep.subr.bf16.mxu1 %v5219_v0 }
0x16a0   :  { %4795 = vmatpush3.bf16.msra.mxu1 %v5418_v19 }
0x16a1   :  { %4802 = vmatprep.subr.bf16.mxu1 %v5219_v0 }
0x16a3   :  { %4464 = vmatmul.mubr.msk.f32.vlgmr.msra.gmra.mrb[18].mxu1 %vm274_vm2, %v1543_v49 }
0x16a4   :  { %4804 = vmatpush3.bf16.msra.mxu1 %v5461_v48  ;;  %4485 = vmatprep.mubr.msk.f32.mxu1 %vm5220_vm0, %v5221_v1 }
0x16a5   :  { %4805 = vmatprep.subr.bf16.mxu1 %v5219_v0 }
0x16a8   :  { %4807 = vmatpush3.bf16.msra.mxu1 %v5487_v56 }
0x16a9   :  { %4814 = vmatprep.subr.bf16.mxu1 %v5219_v0 }
0x176e   :  { %v1712_v54 = vpop.f32.mrb[16].mxu1 }
0x176f   :  { %v1713_v10 = vadd.f32 %v1712_v54, %v5583_v46  ;;  %v4436_v13 = vpop.f32.mrb[17].mxu1 }
0x1771   :  { %v1716_v14 = vsel %vm703_vm7, %v1713_v10, -inf }
0x1772   :  { %1717 = vmax.xlane.f32.xlu0 %v1716_v14 }
0x1776   :  { %v1947_v15 = vpop.f32.mrb[18].mxu1 }
0x1777   :  { %v4465_v17 = vpop.f32.mrb[19].mxu1 }
0x17ff   :  { %v1718_v18 = vpop.xlane.xlu0 %1717 }
0x1800   :  { %v1719_v20 = vsub.f32 %v1713_v10, %v1718_v18 }
0x1802   :  { %v1720_v21 = vmul.f32 1.442695, %v1719_v20 }
0x1804   :  { %4994 = vpow2.f32 %v1720_v21 }
0x180e   :  { %v4995_v22 = vpop.eup %4994 }
0x180f   :  { %v1722_v23 = vsel %vm703_vm7, %v4995_v22, 0.0 }
0x1810   :  { %1723 = vadd.xlane.f32.xlu1 %v1722_v23 }
0x189d   :  { %v1724_v24 = vpop.xlane.xlu1 %1723 }
0x189e   :  { %4996 = vrcp.f32 %v1724_v24 }
0x18a8   :  { %v4997_v26 = vpop.eup %4996 }
0x18a9   :  { %v1726_v11 = vmul.f32 %v4997_v26, %v4995_v22 }
0x18ab   :  { %4442 = vmatmul.mubr.msk.f32.vlgmr.msra.gmra.mrb[22].mxu0 %vm715_vm8, %v1726_v11 }
0x18ac   :  { %4786 = vmatpush3.bf16.msra.mxu0 %v5382_v8  ;;  %4452 = vmatprep.mubr.msk.f32.mxu0 %vm5220_vm0, %v5221_v1 }
0x18ad   :  { %4787 = vmatprep.subr.bf16.mxu0 %v5219_v0 }
0x18b0   :  { %4789 = vmatpush3.bf16.msra.mxu0 %v5392_v12 }
0x18b1   :  { %4796 = vmatprep.subr.bf16.mxu0 %v5219_v0 }
0x197e   :  { %v1796_v28 = vpop.f32.mrb[22].mxu0 }
0x197f   :  { %1804 = vst.msk [vmem:[#allocation4 + $0x10] sm:$0x3] %vm790_vm3, %v1796_v28  ;;  %v4443_v31 = vpop.f32.mrb[23].mxu0  ;;  %4453 = vmatmul.mubr.msk.f32.vlgmr.msra.gmra.mrb[24].mxu0 %vm274_vm2, %v1796_v28 }
0x1980   :  { %4798 = vmatpush3.bf16.msra.mxu0 %v5448_v44  ;;  %4474 = vmatprep.mubr.msk.f32.mxu0 %vm5220_vm0, %v5221_v1 }
0x1981   :  { %4799 = vmatprep.subr.bf16.mxu0 %v5219_v0 }
0x1984   :  { %4801 = vmatpush3.bf16.msra.mxu0 %v5474_v52 }
0x1985   :  { %4808 = vmatprep.subr.bf16.mxu0 %v5219_v0 }
0x1987   :  { %4475 = vmatmul.mubr.msk.f32.vlgmr.msra.gmra.mrb[26].mxu0 %vm274_vm2, %v1643_v9 }
0x1988   :  { %4810 = vmatpush3.bf16.msra.mxu0 %v5562_v30  ;;  %4496 = vmatprep.mubr.msk.f32.mxu0 %vm5220_vm0, %v5221_v1 }
0x1989   :  { %4811 = vmatprep.subr.bf16.mxu0 %v5219_v0 }
0x198c   :  { %4813 = vmatpush3.bf16.msra.mxu0 %v5568_v32 }
0x198d   :  { %4823 = vmatprep.subr.bf16.mxu0 %v5219_v0 }
0x1a52   :  { %v1876_v34 = vpop.f32.mrb[24].mxu0 }
0x1a53   :  { %v1880_v35 = vadd.f32 %v1876_v34, %v1806_v33  ;;  %v4454_v40 = vpop.f32.mrb[25].mxu0 }
0x1a55   :  { %v1951_v36 = vadd.f32 %v1947_v15, %v1880_v35 }
0x1a57   :  { %v1952_v37 = vadd.f32 %v5431_v27, %v1951_v36 }
0x1a59   :  { %4998 = vtanh.f32 %v1952_v37  ;;  %v3982_v45 = vmul.f32 -1.442695, %v1952_v37 }
0x1a5a   :  { %v2043_v38 = vpop.f32.mrb[26].mxu0 }
0x1a5b   :  { %v4476_v39 = vpop.f32.mrb[27].mxu0  ;;  %5000 = vpow2.f32 %v3982_v45 }
0x1a63   :  { %v4999_v43 = vpop.eup %4998 }
0x1a64   :  { %1962 = vrot.lane.b32.xlu0 %v4999_v43, %s5222_s21  ;;  %v2312_v43 = vld [vmem:[#allocation2 + $0x20] sm:$0x3] }
0x1a65   :  { %v5001_v47 = vpop.eup %5000 }
0x1a66   :  { %v1956_v49 = vadd.f32 1.0, %v5001_v47 }
0x1a68   :  { %5002 = vrcp.f32 %v1956_v49 }
0x1a72   :  { %v5003_v29 = vpop.eup %5002 }
0x1a73   :  { %v1960_v53 = vmul.f32 %v5003_v29, %v5682_v42 }
0x1ad6   :  { %v1963_v50 = vpop.permute.xlu0 %1962 }
0x1ad7   :  { %v1965_v51 = vmul.f32 %v5003_v29, %v1963_v50  ;;  %v5807_v50 = vld [vmem:[%s6088_s7] ss:$0 sm:$0xff] }
0x1ad9   :  { %1967 = vrot.lane.b32.xlu1 %v1965_v51, %s5223_s22 }
0x1b4b   :  { %v1968_v55 = vpop.permute.xlu1 %1967 }
0x1b4c   :  { %v5745_v27 = vadd.f32 %v1968_v55, %v1960_v53 }
0x1b4e   :  { %5004 = vtanh.f32 %v5745_v27 }
0x1b58   :  { %v5005_v57 = vpop.eup %5004 }
0x1b59   :  { %1973 = vrot.lane.b32.xlu0 %v5005_v57, %s5222_s21 }
0x1bcb   :  { %v1974_v58 = vpop.permute.xlu0 %1973 }
0x1bcc   :  { %v1976_v59 = vmul.f32 %v5003_v29, %v1974_v58 }
0x1bce   :  { %2048 = vrot.lane.b32.xlu1 %v1976_v59, %s5223_s22 }
0x1c40   :  { %v2049_v25 = vpop.permute.xlu1 %2048 }
0x1c41   :  { %4486 = vmatmul.mubr.msk.f32.vlgmr.msra.gmra.mrb[20].mxu1 %vm274_vm2, %v2049_v25 }
0x1c42   :  { %4816 = vmatpush3.bf16.msra.mxu1 %v5588_v61  ;;  %4503 = vmatprep.mubr.msk.f32.mxu1 %vm5220_vm0, %v5221_v1 }
0x1c43   :  { %4817 = vmatprep.subr.bf16.mxu1 %v5219_v0 }
0x1d14   :  { %v2118_v42 = vpop.f32.mrb[20].mxu1 }
0x1d15   :  { %v2119_v60 = vadd.f32 %v2118_v42, %v2043_v38  ;;  %v4487_v62 = vpop.f32.mrb[21].mxu1 }
0x1d17   :  { %v2122_v63 = vadd.f32 %v5543_v5, %v2119_v60 }
0x1d19   :  { %5006 = vtanh.f32 %v2122_v63  ;;  %v3985_v4 = vmul.f32 -1.442695, %v2122_v63 }
0x1d1b   :  { %5008 = vpow2.f32 %v3985_v4 }
0x1d23   :  { %v5007_v2 = vpop.eup %5006 }
0x1d24   :  { %2132 = vrot.lane.b32.xlu0 %v5007_v2, %s5222_s21 }
0x1d25   :  { %v5009_v6 = vpop.eup %5008 }
0x1d26   :  { %v2126_v7 = vadd.f32 1.0, %v5009_v6 }
0x1d28   :  { %5010 = vrcp.f32 %v2126_v7 }
0x1d32   :  { %v5011_v9 = vpop.eup %5010 }
0x1d33   :  { %v2130_v13 = vmul.f32 %v5011_v9, %v5696_v3 }
0x1d96   :  { %v2133_v54 = vpop.permute.xlu0 %2132 }
0x1d97   :  { %v2135_v10 = vmul.f32 %v5011_v9, %v2133_v54 }
0x1d99   :  { %2137 = vrot.lane.b32.xlu1 %v2135_v10, %s5223_s22 }
0x1e0b   :  { %v2138_v14 = vpop.permute.xlu1 %2137 }
0x1e0c   :  { %v5759_v15 = vadd.f32 %v2138_v14, %v2130_v13 }
0x1e0e   :  { %5012 = vtanh.f32 %v5759_v15 }
0x1e18   :  { %v5013_v17 = vpop.eup %5012 }
0x1e19   :  { %2143 = vrot.lane.b32.xlu0 %v5013_v17, %s5222_s21 }
0x1e8b   :  { %v2144_v18 = vpop.permute.xlu0 %2143 }
0x1e8c   :  { %v2146_v20 = vmul.f32 %v5011_v9, %v2144_v18 }
0x1e8e   :  { %2148 = vrot.lane.b32.xlu1 %v2146_v20, %s5223_s22 }
0x1f00   :  { %v2149_v21 = vpop.permute.xlu1 %2148 }
0x1f01   :  { %2308 = vst.msk [vmem:[#allocation3 + $0x18] sm:$0x3] %vm790_vm3, %v2149_v21  ;;  %4497 = vmatmul.mubr.msk.f32.vlgmr.msra.gmra.mrb[28].mxu0 %vm274_vm2, %v2149_v21 }
0x1f02   :  { %4825 = vmatpush3.bf16.msra.mxu0 %v5405_v16  ;;  %4525 = vmatprep.mubr.msk.f32.mxu0 %vm5220_vm0, %v5221_v1 }
0x1f03   :  { %4826 = vmatprep.subr.bf16.mxu0 %v5219_v0 }
0x1f06   :  { %4828 = vmatpush3.bf16.msra.mxu0 %v5418_v19 }
0x1f07   :  { %4835 = vmatprep.subr.bf16.mxu0 %v5219_v0 }
0x1f09   :  { %4526 = vmatmul.mubr.msk.f32.vlgmr.msra.gmra.mrb[30].mxu0 %vm274_vm2, %v2049_v25 }
0x1f0a   :  { %4837 = vmatpush3.bf16.msra.mxu0 %v5461_v48  ;;  %4547 = vmatprep.mubr.msk.f32.mxu0 %vm5220_vm0, %v5221_v1 }
0x1f0b   :  { %4838 = vmatprep.subr.bf16.mxu0 %v5219_v0 }
0x1f0e   :  { %4840 = vmatpush3.bf16.msra.mxu0 %v5487_v56 }
0x1f0f   :  { %4847 = vmatprep.subr.bf16.mxu0 %v5219_v0 }
0x1fd4   :  { %v2218_v3 = vpop.f32.mrb[28].mxu0 }
0x1fd5   :  { %v2219_v22 = vadd.f32 %v2218_v3, %v5583_v46  ;;  %v4498_v23 = vpop.f32.mrb[29].mxu0 }
0x1fd7   :  { %v2222_v24 = vsel %vm703_vm7, %v2219_v22, -inf }
0x1fd8   :  { %2223 = vmax.xlane.f32.xlu0 %v2222_v24 }
0x1fdc   :  { %v2453_v26 = vpop.f32.mrb[30].mxu0 }
0x1fdd   :  { %v4527_v11 = vpop.f32.mrb[31].mxu0 }
0x2065   :  { %v2224_v28 = vpop.xlane.xlu0 %2223 }
0x2066   :  { %v2225_v31 = vsub.f32 %v2219_v22, %v2224_v28 }
0x2068   :  { %v2226_v33 = vmul.f32 1.442695, %v2225_v31 }
0x206a   :  { %5014 = vpow2.f32 %v2226_v33 }
0x2074   :  { %v5015_v34 = vpop.eup %5014 }
0x2075   :  { %v2228_v35 = vsel %vm703_vm7, %v5015_v34, 0.0 }
0x2076   :  { %2229 = vadd.xlane.f32.xlu1 %v2228_v35 }
0x2103   :  { %v2230_v40 = vpop.xlane.xlu1 %2229 }
0x2104   :  { %5016 = vrcp.f32 %v2230_v40 }
0x210e   :  { %v5017_v36 = vpop.eup %5016 }
0x210f   :  { %v2232_v37 = vmul.f32 %v5017_v36, %v5015_v34 }
0x2111   :  { %4504 = vmatmul.mubr.msk.f32.vlgmr.msra.gmra.mrb[22].mxu1 %vm715_vm8, %v2232_v37 }
0x2112   :  { %4819 = vmatpush3.bf16.msra.mxu1 %v5382_v8  ;;  %4514 = vmatprep.mubr.msk.f32.mxu1 %vm5220_vm0, %v5221_v1 }
0x2113   :  { %4820 = vmatprep.subr.bf16.mxu1 %v5219_v0 }
0x2116   :  { %4822 = vmatpush3.bf16.msra.mxu1 %v5392_v12 }
0x2117   :  { %4829 = vmatprep.subr.bf16.mxu1 %v5219_v0 }
0x21e4   :  { %v2302_v38 = vpop.f32.mrb[22].mxu1 }
0x21e5   :  { %2310 = vst.msk [vmem:[#allocation4 + $0x18] sm:$0x3] %vm790_vm3, %v2302_v38  ;;  %v4505_v39 = vpop.f32.mrb[23].mxu1  ;;  %4515 = vmatmul.mubr.msk.f32.vlgmr.msra.gmra.mrb[24].mxu1 %vm274_vm2, %v2302_v38 }
0x21e6   :  { %4831 = vmatpush3.bf16.msra.mxu1 %v5448_v44  ;;  %4536 = vmatprep.mubr.msk.f32.mxu1 %vm5220_vm0, %v5221_v1 }
0x21e7   :  { %4832 = vmatprep.subr.bf16.mxu1 %v5219_v0 }
0x21ea   :  { %4834 = vmatpush3.bf16.msra.mxu1 %v5474_v52 }
0x21eb   :  { %4841 = vmatprep.subr.bf16.mxu1 %v5219_v0 }
0x21ed   :  { %4537 = vmatmul.mubr.msk.f32.vlgmr.msra.gmra.mrb[26].mxu1 %vm274_vm2, %v2149_v21 }
0x21ee   :  { %4843 = vmatpush3.bf16.msra.mxu1 %v5562_v30  ;;  %4558 = vmatprep.mubr.msk.f32.mxu1 %vm5220_vm0, %v5221_v1 }
0x21ef   :  { %4844 = vmatprep.subr.bf16.mxu1 %v5219_v0 }
0x21f2   :  { %4846 = vmatpush3.bf16.msra.mxu1 %v5568_v32 }
0x21f3   :  { %4856 = vmatprep.subr.bf16.mxu1 %v5219_v0 }
0x22b8   :  { %v2382_v45 = vpop.f32.mrb[24].mxu1 }
0x22b9   :  { %v2386_v47 = vadd.f32 %v2382_v45, %v2312_v43  ;;  %v4516_v49 = vpop.f32.mrb[25].mxu1 }
0x22bb   :  { %v2457_v29 = vadd.f32 %v2453_v26, %v2386_v47 }
0x22bd   :  { %v2458_v51 = vadd.f32 %v5807_v50, %v2457_v29 }
0x22bf   :  { %5018 = vtanh.f32 %v2458_v51  ;;  %v3990_v58 = vmul.f32 -1.442695, %v2458_v51 }
0x22c0   :  { %v2549_v53 = vpop.f32.mrb[26].mxu1 }
0x22c1   :  { %v4538_v55 = vpop.f32.mrb[27].mxu1  ;;  %5020 = vpow2.f32 %v3990_v58 }
0x22c9   :  { %v5019_v57 = vpop.eup %5018 }
0x22ca   :  { %2468 = vrot.lane.b32.xlu0 %v5019_v57, %s5222_s21 }
0x22cb   :  { %v5021_v59 = vpop.eup %5020 }
0x22cc   :  { %v2462_v25 = vadd.f32 1.0, %v5021_v59 }
0x22ce   :  { %5022 = vrcp.f32 %v2462_v25 }
0x22d8   :  { %v5023_v42 = vpop.eup %5022 }
0x22d9   :  { %v2466_v63 = vmul.f32 %v5023_v42, %v5745_v27 }
0x233c   :  { %v2469_v60 = vpop.permute.xlu0 %2468 }
0x233d   :  { %v2471_v62 = vmul.f32 %v5023_v42, %v2469_v60 }
0x233f   :  { %2473 = vrot.lane.b32.xlu1 %v2471_v62, %s5223_s22 }
0x23b1   :  { %v2474_v2 = vpop.permute.xlu1 %2473 }
0x23b2   :  { %v5813_v4 = vadd.f32 %v2474_v2, %v2466_v63 }
0x23b4   :  { %5024 = vtanh.f32 %v5813_v4 }
0x23be   :  { %v5025_v6 = vpop.eup %5024 }
0x23bf   :  { %2479 = vrot.lane.b32.xlu0 %v5025_v6, %s5222_s21 }
0x2431   :  { %v2480_v7 = vpop.permute.xlu0 %2479 }
0x2432   :  { %v2482_v9 = vmul.f32 %v5023_v42, %v2480_v7 }
0x2434   :  { %2554 = vrot.lane.b32.xlu1 %v2482_v9, %s5223_s22 }
0x24a6   :  { %v2555_v54 = vpop.permute.xlu1 %2554 }
0x24a7   :  { %4548 = vmatmul.mubr.msk.f32.vlgmr.msra.gmra.mrb[32].mxu0 %vm274_vm2, %v2555_v54 }
0x24a8   :  { %4849 = vmatpush3.bf16.msra.mxu0 %v5588_v61  ;;  %4565 = vmatprep.mubr.msk.f32.mxu0 %vm5220_vm0, %v5221_v1 }
0x24a9   :  { %4850 = vmatprep.subr.bf16.mxu0 %v5219_v0 }
0x257a   :  { %v2624_v27 = vpop.f32.mrb[32].mxu0 }
0x257b   :  { %v2625_v10 = vadd.f32 %v2624_v27, %v2549_v53  ;;  %v4549_v13 = vpop.f32.mrb[33].mxu0 }
0x257d   :  { %v2628_v14 = vadd.f32 %v5543_v5, %v2625_v10 }
0x257f   :  { %5026 = vtanh.f32 %v2628_v14  ;;  %v3993_v18 = vmul.f32 -1.442695, %v2628_v14 }
0x2581   :  { %5028 = vpow2.f32 %v3993_v18 }
0x2589   :  { %v5027_v17 = vpop.eup %5026 }
0x258a   :  { %2638 = vrot.lane.b32.xlu0 %v5027_v17, %s5222_s21 }
0x258b   :  { %v5029_v20 = vpop.eup %5028 }
0x258c   :  { %v2632_v21 = vadd.f32 1.0, %v5029_v20 }
0x258e   :  { %5030 = vrcp.f32 %v2632_v21 }
0x2598   :  { %v5031_v3 = vpop.eup %5030 }
0x2599   :  { %v2636_v24 = vmul.f32 %v5031_v3, %v5759_v15 }
0x25fc   :  { %v2639_v22 = vpop.permute.xlu0 %2638 }
0x25fd   :  { %v2641_v23 = vmul.f32 %v5031_v3, %v2639_v22 }
0x25ff   :  { %2643 = vrot.lane.b32.xlu1 %v2641_v23, %s5223_s22 }
0x2671   :  { %v2644_v26 = vpop.permute.xlu1 %2643 }
0x2672   :  { %v5827_v11 = vadd.f32 %v2644_v26, %v2636_v24 }
0x2674   :  { %5032 = vtanh.f32 %v5827_v11 }
0x267e   :  { %v5033_v5 = vpop.eup %5032 }
0x267f   :  { %2649 = vrot.lane.b32.xlu0 %v5033_v5, %s5222_s21 }
0x26f1   :  { %v2650_v28 = vpop.permute.xlu0 %2649 }
0x26f2   :  { %v2652_v31 = vmul.f32 %v5031_v3, %v2650_v28 }
0x26f4   :  { %2654 = vrot.lane.b32.xlu1 %v2652_v31, %s5223_s22 }
0x2766   :  { %v2655_v33 = vpop.permute.xlu1 %2654 }
0x2767   :  { %2814 = vst.msk [vmem:[#allocation3 + $0x20] sm:$0x3] %vm790_vm3, %v2655_v33  ;;  %4559 = vmatmul.mubr.msk.f32.vlgmr.msra.gmra.mrb[28].mxu1 %vm274_vm2, %v2655_v33 }
0x2768   :  { %4858 = vmatpush3.bf16.msra.mxu1 %v5405_v16  ;;  %4587 = vmatprep.mubr.msk.f32.mxu1 %vm5220_vm0, %v5221_v1 }
0x2769   :  { %4859 = vmatprep.subr.bf16.mxu1 %v5219_v0 }
0x276c   :  { %4861 = vmatpush3.bf16.msra.mxu1 %v5418_v19 }
0x276d   :  { %4868 = vmatprep.subr.bf16.mxu1 %v5219_v0 }
0x276f   :  { %4588 = vmatmul.mubr.msk.f32.vlgmr.msra.gmra.mrb[30].mxu1 %vm274_vm2, %v2555_v54  ;;  %v5095_v54 = vld [vmem:[%s6091_s10] ss:$0 sm:$0xff] }
0x2770   :  { %4870 = vmatpush3.bf16.msra.mxu1 %v5461_v48  ;;  %4609 = vmatprep.mubr.msk.f32.mxu1 %vm5220_vm0, %v5221_v1 }
0x2771   :  { %4871 = vmatprep.subr.bf16.mxu1 %v5219_v0 }
0x2774   :  { %4873 = vmatpush3.bf16.msra.mxu1 %v5487_v56 }
0x2775   :  { %4880 = vmatprep.subr.bf16.mxu1 %v5219_v0 }
0x283a   :  { %v2724_v16 = vpop.f32.mrb[28].mxu1 }
0x283b   :  { %v2725_v15 = vadd.f32 %v2724_v16, %v5583_v46  ;;  %v4560_v34 = vpop.f32.mrb[29].mxu1 }
0x283d   :  { %v2728_v19 = vsel %vm703_vm7, %v2725_v15, -inf }
0x283e   :  { %2729 = vmax.xlane.f32.xlu0 %v2728_v19 }
0x2842   :  { %v2959_v35 = vpop.f32.mrb[30].mxu1 }
0x2843   :  { %v4589_v40 = vpop.f32.mrb[31].mxu1 }
0x2844   :  { %v3353_v40 = vld [vmem:[%s6093_s12] sm:$0xff] }
0x28cb   :  { %v2730_v36 = vpop.xlane.xlu0 %2729 }
0x28cc   :  { %v2731_v48 = vsub.f32 %v2725_v15, %v2730_v36 }
0x28ce   :  { %v2732_v37 = vmul.f32 1.442695, %v2731_v48 }
0x28d0   :  { %5034 = vpow2.f32 %v2732_v37  ;;  %v3355_v37 = vld [vmem:[%s6093_s12 + $0x10] sm:$0xff] }
0x28da   :  { %v5035_v38 = vpop.eup %5034 }
0x28db   :  { %v2734_v39 = vsel %vm703_vm7, %v5035_v38, 0.0 }
0x28dc   :  { %2735 = vadd.xlane.f32.xlu1 %v2734_v39 }
0x2969   :  { %v2736_v56 = vpop.xlane.xlu1 %2735 }
0x296a   :  { %5036 = vrcp.f32 %v2736_v56 }
0x2974   :  { %v5037_v43 = vpop.eup %5036 }
0x2975   :  { %v2738_v45 = vmul.f32 %v5037_v43, %v5035_v38  ;;  %v3356_v38 = vld [vmem:[%s6093_s12 + $0x18] sm:$0xff] }
0x2976   :  { %v4887_v43 = vpack.c.bf16 %v3356_v38, %v3355_v37 }
0x2977   :  { %4566 = vmatmul.mubr.msk.f32.vlgmr.msra.gmra.mrb[34].mxu0 %vm715_vm8, %v2738_v45  ;;  %v3347_v45 = vld [vmem:[#allocation4] sm:$0xff] }
0x2978   :  { %4852 = vmatpush3.bf16.msra.mxu0 %v5382_v8  ;;  %4576 = vmatprep.mubr.msk.f32.mxu0 %vm5220_vm0, %v5221_v1  ;;  %v2818_v8 = vld [vmem:[#allocation2 + $0x28] sm:$0x3] }
0x2979   :  { %4853 = vmatprep.subr.bf16.mxu0 %v5219_v0 }
0x297c   :  { %4855 = vmatpush3.bf16.msra.mxu0 %v5392_v12 }
0x297d   :  { %4862 = vmatprep.subr.bf16.mxu0 %v5219_v0 }
0x2a4a   :  { %v2808_v47 = vpop.f32.mrb[34].mxu0 }
0x2a4b   :  { %2816 = vst.msk [vmem:[#allocation4 + $0x20] sm:$0x3] %vm790_vm3, %v2808_v47  ;;  %v4567_v49 = vpop.f32.mrb[35].mxu0  ;;  %4577 = vmatmul.mubr.msk.f32.vlgmr.msra.gmra.mrb[36].mxu0 %vm274_vm2, %v2808_v47  ;;  %v3348_v47 = vld [vmem:[#allocation4 + $0x8] sm:$0xff] }
0x2a4c   :  { %4864 = vmatpush3.bf16.msra.mxu0 %v5448_v44  ;;  %4598 = vmatprep.mubr.msk.f32.mxu0 %vm5220_vm0, %v5221_v1  ;;  %v3349_v49 = vld [vmem:[#allocation4 + $0x10] sm:$0xff] }
0x2a4d   :  { %4865 = vmatprep.subr.bf16.mxu0 %v5219_v0 }
0x2a50   :  { %4867 = vmatpush3.bf16.msra.mxu0 %v5474_v52 }
0x2a51   :  { %4874 = vmatprep.subr.bf16.mxu0 %v5219_v0 }
0x2a53   :  { %4599 = vmatmul.mubr.msk.f32.vlgmr.msra.gmra.mrb[38].mxu0 %vm274_vm2, %v2655_v33 }
0x2a54   :  { %4876 = vmatpush3.bf16.msra.mxu0 %v5562_v30  ;;  %4620 = vmatprep.mubr.msk.f32.mxu0 %vm5220_vm0, %v5221_v1 }
0x2a55   :  { %4877 = vmatprep.subr.bf16.mxu0 %v5219_v0 }
0x2a58   :  { %4879 = vmatpush3.bf16.msra.mxu0 %v5568_v32 }
0x2b1e   :  { %v2888_v12 = vpop.f32.mrb[36].mxu0 }
0x2b1f   :  { %v2892_v44 = vadd.f32 %v2888_v12, %v2818_v8  ;;  %v4578_v29 = vpop.f32.mrb[37].mxu0  ;;  %v3350_v8 = vld [vmem:[#allocation4 + $0x18] sm:$0xff]  ;;  %v3351_v12 = vld [vmem:[#allocation4 + $0x20] sm:$0xff] }
0x2b20   :  { %v3344_v29 = vld [vmem:[%s6092_s11 + $0x8] sm:$0xff] }
0x2b21   :  { %v2963_v51 = vadd.f32 %v2959_v35, %v2892_v44  ;;  %v3343_v44 = vld [vmem:[%s6092_s11] sm:$0xff] }
0x2b23   :  { %v2964_v52 = vadd.f32 %v5807_v50, %v2963_v51  ;;  %v3345_v51 = vld [vmem:[%s6092_s11 + $0x10] sm:$0xff] }
0x2b25   :  { %5038 = vtanh.f32 %v2964_v52  ;;  %v3998_v30 = vmul.f32 -1.442695, %v2964_v52  ;;  %v4891_v52 = vpack.c.bf16 %v3344_v29, %v3343_v44  ;;  %v3715_v44 = vld [vmem:[%s6104_s3 + $0x18] sm:$0xff] }
0x2b26   :  { %v3055_v53 = vpop.f32.mrb[38].mxu0  ;;  %vm3823_vm13 = vcmp.ge.s32.totalorder %v3715_v44, 0 }
0x2b27   :  { %v4600_v55 = vpop.f32.mrb[39].mxu0  ;;  %5040 = vpow2.f32 %v3998_v30 }
0x2b2f   :  { %v5039_v57 = vpop.eup %5038 }
0x2b30   :  { %2974 = vrot.lane.b32.xlu0 %v5039_v57, %s5222_s21 }
0x2b31   :  { %v5041_v58 = vpop.eup %5040 }
0x2b32   :  { %v2968_v59 = vadd.f32 1.0, %v5041_v58 }
0x2b34   :  { %5042 = vrcp.f32 %v2968_v59  ;;  %v3337_v59 = vld [vmem:[#allocation3] sm:$0xff] }
0x2b3e   :  { %v5043_v0 = vpop.eup %5042 }
0x2b3f   :  { %v2972_v42 = vmul.f32 %v5043_v0, %v5813_v4 }
0x2ba2   :  { %v2975_v32 = vpop.permute.xlu0 %2974 }
0x2ba3   :  { %v2977_v25 = vmul.f32 %v5043_v0, %v2975_v32  ;;  %v3339_v32 = vld [vmem:[#allocation3 + $0x10] sm:$0xff] }
0x2ba5   :  { %2979 = vrot.lane.b32.xlu1 %v2977_v25, %s5223_s22  ;;  %v3340_v25 = vld [vmem:[#allocation3 + $0x18] sm:$0xff] }
0x2c17   :  { %v2980_v60 = vpop.permute.xlu1 %2979 }
0x2c18   :  { %v2982_v50 = vadd.f32 %v2980_v60, %v2972_v42  ;;  %v3341_v42 = vld [vmem:[#allocation3 + $0x20] sm:$0xff] }
0x2c1a   :  { %5044 = vtanh.f32 %v2982_v50  ;;  %v3595_v50 = vld [vmem:[#allocation10] sm:$0xff] }
0x2c24   :  { %v5045_v62 = vpop.eup %5044 }
0x2c25   :  { %2985 = vrot.lane.b32.xlu0 %v5045_v62, %s5222_s21  ;;  %v3596_v62 = vld [vmem:[#allocation10 + $0x8] sm:$0xff] }
0x2c97   :  { %v2986_v63 = vpop.permute.xlu0 %2985 }
0x2c98   :  { %v2988_v2 = vmul.f32 %v5043_v0, %v2986_v63  ;;  %v3338_v0 = vld [vmem:[#allocation3 + $0x8] sm:$0xff]  ;;  %v4899_v63 = vpack.c.bf16 %v3596_v62, %v3595_v50 }
0x2c9a   :  { %3060 = vrot.lane.b32.xlu1 %v2988_v2, %s5223_s22  ;;  %4900 = vmatprep.subr.bf16.mxu0 %v4899_v63  ;;  %v3597_v2 = vld [vmem:[#allocation10 + $0x10] sm:$0xff] }
0x2d0c   :  { %v3061_v6 = vpop.permute.xlu1 %3060 }
0x2d0d   :  { %4610 = vmatmul.mubr.msk.f32.vlgmr.msra.gmra.mrb[32].mxu1 %vm274_vm2, %v3061_v6  ;;  %v3598_v6 = vld [vmem:[#allocation10 + $0x18] sm:$0xff] }
0x2d0e   :  { %4882 = vmatpush3.bf16.msra.mxu1 %v5588_v61  ;;  %4627 = vmatprep.mubr.msk.f32.mxu1 %vm5220_vm0, %v5221_v1 }
0x2de0   :  { %v3130_v7 = vpop.f32.mrb[32].mxu1 }
0x2de1   :  { %v3131_v4 = vadd.f32 %v3130_v7, %v3055_v53  ;;  %v4611_v9 = vpop.f32.mrb[33].mxu1  ;;  %v3346_v53 = vld [vmem:[%s6092_s11 + $0x18] sm:$0xff]  ;;  %v4903_v7 = vpack.c.bf16 %v3598_v6, %v3597_v2 }
0x2de2   :  { %v4895_v55 = vpack.c.bf16 %v3346_v53, %v3345_v51  ;;  %v3716_v51 = vld [vmem:[%s6104_s3 + $0x20] sm:$0xff]  ;;  %v3717_v53 = vld [vmem:[%s6104_s3 + $0x28] sm:$0xff] }
0x2de3   :  { %v3134_v27 = vadd.f32 %v5095_v54, %v3131_v4  ;;  %v4004_v4 = vld [vmem:[%s6094_s13] ss:$0 sm:$0xff]  ;;  %vm3825_vm14 = vcmp.ge.s32.totalorder %v3717_v53, 0  ;;  %vm3824_vm15 = vcmp.ge.s32.totalorder %v3716_v51, 0 }
0x2de5   :  { %5046 = vtanh.f32 %v3134_v27  ;;  %v4001_v13 = vmul.f32 -1.442695, %v3134_v27 }
0x2de7   :  { %5048 = vpow2.f32 %v4001_v13 }
0x2def   :  { %v5047_v10 = vpop.eup %5046 }
0x2df0   :  { %3144 = vrot.lane.b32.xlu0 %v5047_v10, %s5222_s21 }
0x2df1   :  { %v5049_v14 = vpop.eup %5048 }
0x2df2   :  { %v3138_v17 = vadd.f32 1.0, %v5049_v14 }
0x2df4   :  { %5050 = vrcp.f32 %v3138_v17 }
0x2dfe   :  { %v5051_v61 = vpop.eup %5050 }
0x2dff   :  { %v3142_v21 = vmul.f32 %v5051_v61, %v5827_v11 }
0x2e62   :  { %v3145_v18 = vpop.permute.xlu0 %3144 }
0x2e63   :  { %v3147_v20 = vmul.f32 %v5051_v61, %v3145_v18 }
0x2e65   :  { %3149 = vrot.lane.b32.xlu1 %v3147_v20, %s5223_s22 }
0x2ed7   :  { %v3150_v3 = vpop.permute.xlu1 %3149 }
0x2ed8   :  { %v3152_v22 = vadd.f32 %v3150_v3, %v3142_v21 }
0x2eda   :  { %5052 = vtanh.f32 %v3152_v22 }
0x2ee4   :  { %v5053_v23 = vpop.eup %5052 }
0x2ee5   :  { %3155 = vrot.lane.b32.xlu0 %v5053_v23, %s5222_s21 }
0x2f57   :  { %v3156_v24 = vpop.permute.xlu0 %3155 }
0x2f58   :  { %v3158_v26 = vmul.f32 %v5051_v61, %v3156_v24 }
0x2f5a   :  { %3160 = vrot.lane.b32.xlu1 %v3158_v26, %s5223_s22 }
0x2fcc   :  { %v3161_v5 = vpop.permute.xlu1 %3160 }
0x2fcd   :  { %3320 = vst.msk [vmem:[#allocation3 + $0x28] sm:$0x3] %vm790_vm3, %v3161_v5  ;;  %4621 = vmatmul.mubr.msk.f32.vlgmr.msra.gmra.mrb[40].mxu0 %vm274_vm2, %v3161_v5 }
0x2fce   :  { %4902 = vmatpush3.bf16.msra.mxu0 %v4899_v63 }
0x2fcf   :  { %4904 = vmatprep.subr.bf16.mxu0 %v4903_v7 }
0x2fd2   :  { %4906 = vmatpush3.bf16.msra.mxu0 %v4903_v7 }
0x2fd4   :  { %v3342_v60 = vld [vmem:[#allocation3 + $0x28] sm:$0xff] }
0x30a0   :  { %v3230_v28 = vpop.f32.mrb[40].mxu0 }
0x30a1   :  { %v3231_v31 = vadd.f32 %v3230_v28, %v5583_v46  ;;  %v4622_v33 = vpop.f32.mrb[41].mxu0  ;;  %v3354_v46 = vld [vmem:[%s6093_s12 + $0x8] sm:$0xff] }
0x30a2   :  { %v4883_v36 = vpack.c.bf16 %v3354_v46, %v3353_v40  ;;  %v3713_v33 = vld [vmem:[%s6104_s3 + $0x8] sm:$0xff]  ;;  %v4005_v40 = vld [vmem:[%s6096_s15] ss:$0 sm:$0xff] }
0x30a3   :  { %v3234_v11 = vsel %vm703_vm7, %v3231_v31, -inf  ;;  %vm3821_vm10 = vcmp.ge.s32.totalorder %v3713_v33, 0 }
0x30a4   :  { %3235 = vmax.xlane.f32.xlu0 %v3234_v11  ;;  %4884 = vmatprep.subr.bf16.mxu1 %v4883_v36  ;;  %v3712_v11 = vld [vmem:[%s6104_s3] sm:$0xff] }
0x30a5   :  { %vm3820_vm9 = vcmp.ge.s32.totalorder %v3712_v11, 0 }
0x3131   :  { %v3236_v16 = vpop.xlane.xlu0 %3235 }
0x3132   :  { %v3237_v15 = vsub.f32 %v3231_v31, %v3236_v16  ;;  %v5225_v31 = vmov 0   ;;  %v4030_v16 = vsel %vm3820_vm9, 1.0, %v5221_v1 }
0x3133   :  { %4931 = vset.pattern.permute.xlu1 %v5225_v31  ;;  %4932 = vset.pattern.permute.xlu0 %v5225_v31 }
0x3134   :  { %v3238_v34 = vmul.f32 1.442695, %v3237_v15  ;;  %v4031_v15 = vsel %vm3821_vm10, 1.0, %v5221_v1 }
0x3135   :  { %v4933_v29 = vpack.i.bf16 %v4031_v15, %v4030_v16 }
0x3136   :  { %5054 = vpow2.f32 %v3238_v34  ;;  %v3899_v34 = vsel %vm3898_vm11, %v4030_v16, 0.0 }
0x3140   :  { %v5055_v19 = vpop.eup %5054 }
0x3141   :  { %v3240_v35 = vsel %vm703_vm7, %v5055_v19, 0.0 }
0x3142   :  { %3241 = vadd.xlane.f32.xlu1 %v3240_v35 }
0x31cf   :  { %v3242_v48 = vpop.xlane.xlu1 %3241 }
0x31d0   :  { %5056 = vrcp.f32 %v3242_v48 }
0x31da   :  { %v5057_v39 = vpop.eup %5056 }
0x31db   :  { %v3244_v56 = vmul.f32 %v5057_v39, %v5055_v19  ;;  %v3900_v19 = vsel %vm3898_vm11, %v4031_v15, 0.0 }
0x31dc   :  { %v5951_v35 = vadd.f32 %v3900_v19, %v3899_v34 }
0x31dd   :  { %4628 = vmatmul.mubr.msk.f32.vlgmr.msra.gmra.mrb[34].mxu1 %vm715_vm8, %v3244_v56 }
0x31de   :  { %4886 = vmatpush3.bf16.msra.mxu1 %v4883_v36  ;;  %4638 = vmatprep.mubr.msk.f32.mxu1 %vm274_vm2, %v3347_v45 }
0x31df   :  { %4888 = vmatprep.subr.bf16.mxu1 %v4887_v43 }
0x31e2   :  { %4890 = vmatpush3.bf16.msra.mxu1 %v4887_v43 }
0x31e3   :  { %4892 = vmatprep.subr.bf16.mxu1 %v4891_v52 }
0x31e5   :  { %4639 = vmatmul.mubr.msk.f32.vlgmr.msra.gmra.mrb[36].mxu1 %vm274_vm2, %v3348_v47 }
0x31e6   :  { %4641 = vmatprep.mubr.msk.f32.mxu1 %vm274_vm2, %v3349_v49  ;;  %4894 = vmatpush3.bf16.msra.mxu1 %v4891_v52 }
0x31e7   :  { %4896 = vmatprep.subr.bf16.mxu1 %v4895_v55 }
0x31e9   :  { %4642 = vmatmul.mubr.msk.f32.gmra.mrb[38].mxu1 %vm274_vm2, %v3350_v8 }
0x31ea   :  { %4644 = vmatprep.mubr.msk.f32.mxu1 %vm274_vm2, %v3351_v12  ;;  %4898 = vmatpush3.bf16.msra.mxu1 %v4895_v55  ;;  %v3714_v12 = vld [vmem:[%s6104_s3 + $0x10] sm:$0xff]  ;;  %v4033_v55 = vsel %vm3823_vm13, 1.0, %v5221_v1 }
0x31eb   :  { %vm3822_vm12 = vcmp.ge.s32.totalorder %v3714_v12, 0 }
0x31ec   :  { %v4032_v52 = vsel %vm3822_vm12, 1.0, %v5221_v1 }
0x32b0   :  { %v3314_v57 = vpop.f32.mrb[34].mxu1 }
0x32b1   :  { %3322 = vst.msk [vmem:[#allocation4 + $0x28] sm:$0x3] %vm790_vm3, %v3314_v57  ;;  %v4629_v30 = vpop.f32.mrb[35].mxu1 }
0x32b8   :  { %v3352_v58 = vld [vmem:[#allocation4 + $0x28] sm:$0xff] }
0x32b9   :  { %4645 = vmatmul.mubr.msk.f32.gmra.mrb[40].mxu1 %vm274_vm2, %v3352_v58 }
0x32ba   :  { %4655 = vmatprep.mubr.msk.f32.mxu1 %vm274_vm2, %v3337_v59 }
0x32bd   :  { %4656 = vmatmul.mubr.msk.f32.vlgmr.msra.gmra.mrb[36].mxu1 %vm274_vm2, %v3338_v0 }
0x32be   :  { %4658 = vmatprep.mubr.msk.f32.mxu1 %vm274_vm2, %v3339_v32 }
0x32c1   :  { %4659 = vmatmul.mubr.msk.f32.gmra.mrb[38].mxu1 %vm274_vm2, %v3340_v25 }
0x32c2   :  { %4661 = vmatprep.mubr.msk.f32.mxu1 %vm274_vm2, %v3341_v42 }
0x32c5   :  { %4662 = vmatmul.mubr.msk.f32.gmra.mrb[40].mxu1 %vm274_vm2, %v3342_v60 }
0x3390   :  { %v4657_v9 = vpop.f32.mrb[36].mxu1 }
0x3391   :  { %v3584_v54 = vadd.f32 %v4657_v9, %v4004_v4  ;;  %v3554_v27 = vpop.f32.mrb[37].mxu1 }
0x3392   :  { %v3583_v10 = vadd.f32 %v4004_v4, %v3554_v27 }
0x3394   :  { %5058 = vtanh.f32 %v3583_v10  ;;  %v4660_v13 = vpop.f32.mrb[38].mxu1 }
0x3395   :  { %5060 = vtanh.f32 %v3584_v54  ;;  %v3586_v14 = vadd.f32 %v4660_v13, %v4004_v4  ;;  %v3564_v17 = vpop.f32.mrb[39].mxu1  ;;  %v4035_v13 = vsel %vm3825_vm14, 1.0, %v5221_v1 }
0x3396   :  { %v3585_v61 = vadd.f32 %v4004_v4, %v3564_v17 }
0x3398   :  { %5062 = vtanh.f32 %v3585_v61  ;;  %v4663_v18 = vpop.f32.mrb[40].mxu1 }
0x3399   :  { %5064 = vtanh.f32 %v3586_v14  ;;  %v3588_v20 = vadd.f32 %v4663_v18, %v4004_v4  ;;  %v3574_v21 = vpop.f32.mrb[41].mxu1 }
0x339a   :  { %v3587_v3 = vadd.f32 %v4004_v4, %v3574_v21 }
0x339c   :  { %5066 = vtanh.f32 %v3587_v3 }
0x339d   :  { %5068 = vtanh.f32 %v3588_v20 }
0x339e   :  { %v5059_v22 = vpop.eup %5058 }
0x339f   :  { %v5061_v23 = vpop.eup %5060  ;;  %4672 = vmatprep.mubr.msk.f32.mxu0 %vm274_vm2, %v5059_v22  ;;  %v4034_v22 = vsel %vm3824_vm15, 1.0, %v5221_v1 }
0x33a0   :  { %4673 = vmatmul.mubr.msk.f32.vlgmr.msra.gmra.mrb[42].mxu0 %vm274_vm2, %v5061_v23  ;;  %v3902_v23 = vsel %vm3898_vm11, %v4032_v52, 0.0 }
0x33a2   :  { %v5063_v24 = vpop.eup %5062 }
0x33a3   :  { %v5065_v26 = vpop.eup %5064  ;;  %4675 = vmatprep.mubr.msk.f32.mxu0 %vm274_vm2, %v5063_v24  ;;  %v3903_v24 = vadd.f32 %v3902_v23, %v5951_v35 }
0x33a4   :  { %4676 = vmatmul.mubr.msk.f32.gmra.mrb[44].mxu0 %vm274_vm2, %v5065_v26  ;;  %v3904_v26 = vsel %vm3898_vm11, %v4033_v55, 0.0 }
0x33a6   :  { %v5067_v5 = vpop.eup %5066 }
0x33a7   :  { %v5069_v28 = vpop.eup %5068  ;;  %4678 = vmatprep.mubr.msk.f32.mxu0 %vm274_vm2, %v5067_v5  ;;  %v3905_v5 = vadd.f32 %v3904_v26, %v3903_v24 }
0x33a8   :  { %4679 = vmatmul.mubr.msk.f32.gmra.mrb[46].mxu0 %vm274_vm2, %v5069_v28  ;;  %v3906_v28 = vsel %vm3898_vm11, %v4034_v22, 0.0 }
0x33a9   :  { %v3907_v31 = vadd.f32 %v3906_v28, %v3905_v5 }
0x3473   :  { %v4674_v46 = vpop.f32.mrb[42].mxu0 }
0x3474   :  { %v5956_v36 = vadd.f32 %v4674_v46, %v4005_v40  ;;  %v3683_v48 = vpop.f32.mrb[43].mxu0 }
0x3475   :  { %v5959_v38 = vadd.f32 %v4005_v40, %v3683_v48 }
0x3476   :  { %3720 = vmax.xlane.f32.xlu0 %v5956_v36 }
0x3477   :  { %v4677_v37 = vpop.f32.mrb[44].mxu0 }
0x3478   :  { %v3693_v39 = vpop.f32.mrb[45].mxu0  ;;  %v5965_v45 = vadd.f32 %v4677_v37, %v4005_v40 }
0x3479   :  { %v5961_v56 = vadd.f32 %v4005_v40, %v3693_v39 }
0x347a   :  { %3718 = vmax.xlane.f32.xlu0 %v5959_v38 }
0x347b   :  { %v4680_v43 = vpop.f32.mrb[46].mxu0  ;;  %3722 = vmax.xlane.f32.xlu1 %v5961_v56 }
0x347c   :  { %v3703_v47 = vpop.f32.mrb[47].mxu0  ;;  %v5970_v8 = vadd.f32 %v4680_v43, %v4005_v40 }
0x347d   :  { %v5967_v49 = vadd.f32 %v4005_v40, %v3703_v47 }
0x347e   :  { %3724 = vmax.xlane.f32.xlu0 %v5965_v45 }
0x3482   :  { %3728 = vmax.xlane.f32.xlu0 %v5970_v8 }
0x348c   :  { %3785 = vperm.xlu1 %4931, %v3712_v11  }
0x3490   :  { %3791 = vperm.xlu1 %4931, %v3714_v12  }
0x3494   :  { %3794 = vperm.xlu1 %4931, %v3715_v44  }
0x3498   :  { %3788 = vperm.xlu0 %4932, %v3713_v33   ;;  %v3908_v33 = vsel %vm3898_vm11, %v4035_v13, 0.0 }
0x3499   :  { %v3909_v11 = vadd.f32 %v3908_v33, %v3907_v31 }
0x34b8   :  { %3726 = vmax.xlane.f32.xlu1 %v5967_v49 }
0x34c9   :  { %4934 = vperm.xlu1 %4931, %v4933_v29  }
0x34cd   :  { %3797 = vperm.xlu1 %4931, %v3716_v51  }
0x34d1   :  { %3856 = vperm.xlu1 %4931, %v4032_v52  }
0x34d5   :  { %3800 = vperm.xlu1 %4931, %v3717_v53  }
0x34d9   :  { %3861 = vperm.xlu1 %4931, %v4033_v55  }
0x3503   :  { %v5988_v57 = vpop.xlane.xlu0 %3720 }
0x3504   :  { %v3731_v30 = vsub.f32 %v5956_v36, %v5988_v57 }
0x3506   :  { %v3738_v58 = vmul.f32 1.442695, %v3731_v30 }
0x3507   :  { %v5992_v59 = vpop.xlane.xlu0 %3718 }
0x3508   :  { %5070 = vpow2.f32 %v3738_v58  ;;  %v3730_v0 = vsub.f32 %v5959_v38, %v5992_v59  ;;  %v5996_v32 = vpop.xlane.xlu1 %3722 }
0x3509   :  { %v3732_v25 = vsub.f32 %v5961_v56, %v5996_v32 }
0x350a   :  { %v3736_v42 = vmul.f32 1.442695, %v3730_v0 }
0x350b   :  { %v3740_v60 = vmul.f32 1.442695, %v3732_v25  ;;  %v6000_v50 = vpop.xlane.xlu0 %3724 }
0x350c   :  { %5072 = vpow2.f32 %v3736_v42  ;;  %v3733_v62 = vsub.f32 %v5965_v45, %v6000_v50  ;;  %v3786_v14 = vpop.permute.xlu1 %3785 }
0x350d   :  { %5074 = vpow2.f32 %v3740_v60  ;;  %vm3802_vm1 = vcmp.eq.s32.totalorder %v5579_v41, %v3786_v14 }
0x350e   :  { %v3742_v63 = vmul.f32 1.442695, %v3733_v62  ;;  %v4024_v25 = vsel %vm3802_vm1, 1.0, %v5221_v1 }
0x350f   :  { %v6004_v2 = vpop.xlane.xlu0 %3728 }
0x3510   :  { %5076 = vpow2.f32 %v3742_v63  ;;  %v3735_v6 = vsub.f32 %v5970_v8, %v6004_v2  ;;  %v3792_v17 = vpop.permute.xlu1 %3791 }
0x3511   :  { %vm3804_vm2 = vcmp.eq.s32.totalorder %v5579_v41, %v3792_v17 }
0x3512   :  { %v5071_v7 = vpop.eup %5070  ;;  %v3746_v4 = vmul.f32 1.442695, %v3735_v6 }
0x3513   :  { %3750 = vadd.xlane.f32.xlu0 %v5071_v7 }
0x3514   :  { %5078 = vpow2.f32 %v3746_v4  ;;  %v3795_v61 = vpop.permute.xlu1 %3794 }
0x3515   :  { %vm3805_vm3 = vcmp.eq.s32.totalorder %v5579_v41, %v3795_v61 }
0x3516   :  { %v5073_v9 = vpop.eup %5072 }
0x3517   :  { %3748 = vadd.xlane.f32.xlu1 %v5073_v9  ;;  %v5075_v54 = vpop.eup %5074  ;;  %v3789_v40 = vpop.permute.xlu0 %3788  ;;  %v4027_v9 = vsel %vm3805_vm3, 1.0, %v5221_v1 }
0x3518   :  { %vm3803_vm0 = vcmp.eq.s32.totalorder %v5579_v41, %v3789_v40 }
0x3519   :  { %v4025_v55 = vsel %vm3803_vm0, 1.0, %v5221_v1 }
0x351a   :  { %v5077_v27 = vpop.eup %5076 }
0x351b   :  { %3752 = vadd.xlane.f32.xlu1 %v5075_v54  ;;  %3754 = vadd.xlane.f32.xlu0 %v5077_v27 }
0x351e   :  { %v5079_v10 = vpop.eup %5078 }
0x351f   :  { %3758 = vadd.xlane.f32.xlu0 %v5079_v10 }
0x3535   :  { %3871 = vperm.xlu0 %4932, %v4035_v13  }
0x3545   :  { %v6009_v18 = vpop.xlane.xlu1 %3726 }
0x3546   :  { %v3734_v20 = vsub.f32 %v5967_v49, %v6009_v18 }
0x3548   :  { %v3744_v21 = vmul.f32 1.442695, %v3734_v20 }
0x3549   :  { %v4935_v16 = vpop.permute.xlu1 %4934 }
0x354a   :  { %5080 = vpow2.f32 %v3744_v21  ;;  %v4936_v42 = vunpack.i.l.bf16 %v4935_v16 }
0x354d   :  { %v6019_v15 = vpop.permute.xlu1 %3797 }
0x354e   :  { %vm3806_vm4 = vcmp.eq.s32.totalorder %v5579_v41, %v6019_v15 }
0x354f   :  { %v4028_v5 = vsel %vm3806_vm4, 1.0, %v5221_v1 }
0x3551   :  { %v3857_v34 = vpop.permute.xlu1 %3856 }
0x3554   :  { %v5081_v3 = vpop.eup %5080  ;;  %3910 = vadd.xlane.f32.xlu0 %v3909_v11 }
0x3555   :  { %3756 = vadd.xlane.f32.xlu1 %v5081_v3  ;;  %v6021_v19 = vpop.permute.xlu1 %3800 }
0x3556   :  { %vm3807_vm5 = vcmp.eq.s32.totalorder %v5579_v41, %v6021_v19 }
0x3557   :  { %v4029_v28 = vsel %vm3807_vm5, 1.0, %v5221_v1 }
0x3559   :  { %v3862_v46 = vpop.permute.xlu1 %3861 }
0x3566   :  { %3866 = vperm.xlu1 %4931, %v4034_v22  }
0x35a0   :  { %v3751_v48 = vpop.xlane.xlu0 %3750 }
0x35a1   :  { %5082 = vlog2.f32 %v3751_v48 }
0x35a4   :  { %v3749_v35 = vpop.xlane.xlu1 %3748 }
0x35a5   :  { %5084 = vlog2.f32 %v3749_v35 }
0x35a8   :  { %v3753_v37 = vpop.xlane.xlu1 %3752  ;;  %v3755_v39 = vpop.xlane.xlu0 %3754 }
0x35a9   :  { %5086 = vlog2.f32 %v3753_v37 }
0x35aa   :  { %5088 = vlog2.f32 %v3755_v39 }
0x35ab   :  { %v5083_v43 = vpop.eup %5082 }
0x35ac   :  { %v3763_v47 = vmul.f32 0.6931472, %v5083_v43  ;;  %v3759_v20 = vpop.xlane.xlu0 %3758 }
0x35ad   :  { %5090 = vlog2.f32 %v3759_v20 }
0x35ae   :  { %v3773_v12 = vadd.f32 %v3763_v47, %v5988_v57 }
0x35af   :  { %v5085_v44 = vpop.eup %5084 }
0x35b0   :  { %v3761_v29 = vmul.f32 0.6931472, %v5085_v44  ;;  %v3779_v51 = vsub.f32 %v5956_v36, %v3773_v12 }
0x35b2   :  { %v3772_v52 = vadd.f32 %v3761_v29, %v5992_v59  ;;  %v3839_v60 = vmul.f32 %v4025_v55, %v3779_v51  ;;  %v4937_v59 = vunpack.i.h.bf16 %v4935_v16 }
0x35b3   :  { %v5087_v53 = vpop.eup %5086 }
0x35b4   :  { %v5089_v30 = vpop.eup %5088  ;;  %v3778_v58 = vsub.f32 %v5959_v38, %v3772_v52  ;;  %v3765_v0 = vmul.f32 0.6931472, %v5087_v53  ;;  %v4026_v38 = vsel %vm3804_vm2, 1.0, %v5221_v1  ;;  %v3875_v27 = vmul.f32 %v4937_v59, %v3839_v60  ;;  %v3872_v16 = vpop.permute.xlu0 %3871 }
0x35b5   :  { %v3767_v57 = vmul.f32 0.6931472, %v5089_v30 }
0x35b6   :  { %v3838_v62 = vmul.f32 %v4024_v25, %v3778_v58  ;;  %v3774_v63 = vadd.f32 %v3765_v0, %v5996_v32 }
0x35b7   :  { %v3775_v36 = vadd.f32 %v3767_v57, %v6000_v50 }
0x35b8   :  { %v3780_v6 = vsub.f32 %v5961_v56, %v3774_v63  ;;  %v3874_v7 = vmul.f32 %v4936_v42, %v3838_v62  ;;  %v5091_v56 = vpop.eup %5090 }
0x35b9   :  { %v3781_v4 = vsub.f32 %v5965_v45, %v3775_v36  ;;  %v3771_v21 = vmul.f32 0.6931472, %v5091_v56 }
0x35ba   :  { %v3840_v54 = vmul.f32 %v4026_v38, %v3780_v6  ;;  %v3880_v14 = vadd.f32 %v3875_v27, %v3874_v7 }
0x35bb   :  { %v3841_v10 = vmul.f32 %v4027_v9, %v3781_v4  ;;  %v3777_v3 = vadd.f32 %v3771_v21, %v6004_v2 }
0x35bc   :  { %v3876_v13 = vmul.f32 %v3857_v34, %v3840_v54 }
0x35bd   :  { %v3877_v32 = vmul.f32 %v3862_v46, %v3841_v10  ;;  %v3783_v23 = vsub.f32 %v5970_v8, %v3777_v3 }
0x35be   :  { %v3881_v17 = vadd.f32 %v3880_v14, %v3876_v13 }
0x35bf   :  { %v3843_v31 = vmul.f32 %v4029_v28, %v3783_v23 }
0x35c0   :  { %v3882_v61 = vadd.f32 %v3881_v17, %v3877_v32 }
0x35c1   :  { %v3879_v34 = vmul.f32 %v3872_v16, %v3843_v31 }
0x35e1   :  { %v3911_v41 = vpop.xlane.xlu0 %3910 }
0x35e2   :  { %v3757_v50 = vpop.xlane.xlu1 %3756  ;;  %v3912_v19 = vrot.slane %v3911_v41, 4 }
0x35e3   :  { %5092 = vlog2.f32 %v3757_v50 }
0x35e4   :  { %v3913_v8 = vadd.f32 %v3912_v19, %v3911_v41 }
0x35e6   :  { %v3867_v33 = vpop.permute.xlu1 %3866  ;;  %v3914_v46 = vrot.slane %v3913_v8, 2 }
0x35e8   :  { %v3915_v35 = vadd.f32 %v3914_v46, %v3913_v8 }
0x35ea   :  { %v3916_v1 = vrot.slane %v3915_v35, 1 }
0x35ec   :  { %v3917_v12 = vadd.f32 %v3916_v1, %v3915_v35 }
0x35ed   :  { %v5093_v22 = vpop.eup %5092 }
0x35ee   :  { %v3769_v45 = vmul.f32 0.6931472, %v5093_v22 }
0x35f0   :  { %v3776_v24 = vadd.f32 %v3769_v45, %v6009_v18 }
0x35f2   :  { %v3782_v26 = vsub.f32 %v5967_v49, %v3776_v24 }
0x35f4   :  { %v3842_v2 = vmul.f32 %v4028_v5, %v3782_v26 }
0x35f6   :  { %v3878_v11 = vmul.f32 %v3867_v33, %v3842_v2 }
0x35f8   :  { %v3883_v15 = vadd.f32 %v3882_v61, %v3878_v11 }
0x35fa   :  { %v3884_v40 = vadd.f32 %v3883_v15, %v3879_v34 }
0x35fc   :  { %3885 = vadd.xlane.f32.xlu1 %v3884_v40 }
0x3689   :  { %v3886_v18 = vpop.xlane.xlu1 %3885 }
0x368a   :  { %v3887_v48 = vrot.slane %v3886_v18, 4 }
0x368c   :  { %v3888_v49 = vadd.f32 %v3887_v48, %v3886_v18 }
0x368e   :  { %v3889_v37 = vrot.slane %v3888_v49, 2 }
0x3690   :  { %v3890_v39 = vadd.f32 %v3889_v37, %v3888_v49 }
0x3692   :  { %v3891_v43 = vrot.slane %v3890_v39, 1 }
0x3694   :  { %v3892_v47 = vadd.f32 %v3891_v43, %v3890_v39 }
0x3696   :  { %4913 = vpush %v3892_v47 }
0x3697   :  { %4915 = vpush %v3917_v12 }
0x36c7   :  { %s4914_s12 = spop %4913 }
0x36c8   :  { %v3894_v44 = vstv %s4914_s12  ;;  %s4916_s28 = spop %4915 }
0x36c9   :  { %v3895_v29 = vsub.f32 0.0, %v3894_v44  ;;  %v3919_v51 = vstv %s4916_s28 }
0x36ca   :  { %3920 = vst.msk [vmem:[#allocation12] sm:$0x1] %vm3896_vm6, %v3919_v51 }
0x36cb   :  { %3897 = vst.msk [vmem:[#allocation11] sm:$0x1] %vm3896_vm6, %v3895_v29 }
0x36cc   :  { %5173 = shalt.err (!%p5170_p0)
}
0x36cd   :  { %s5174_s20 = scalar_lea.hbm %s6098_s17, 16 }
0x36ce   :  { %p5175_p1 = scmp.ne.s32.totalorder %s6098_s17, %s5174_s20  ;;  %p5178_p2 = scmp.lt.u32.totalorder %s5174_s20, %s6098_s17 }
0x36d0   :  { %p5180_p3 = pnand %p5178_p2, %p5175_p1 }
0x36d2   :  { %5183 = shalt.err (!%p5180_p3)
}
0x36d3   :  { %3940 = dma.vmem_to_hbm [thread:$0]  %s3938_s23, 16, %s6098_s17, [#allocation13]  }
0x36d4   :  { %s5184_s5 = scalar_lea.vmem %s6049_s26, 16  ;;  %s5188_s27 = scalar_lea.vmem %s6049_s26, 32 }
0x36d5   :  { %p5185_p4 = scmp.ne.s32.totalorder %s6049_s26, %s5184_s5  ;;  %p5189_p5 = scmp.lt.s32.totalorder %s6049_s26, %s6049_s26 }
0x36d6   :  { %p5190_p6 = scmp.lt.s32.totalorder %s5188_s27, %s5184_s5 }
0x36d8   :  { %p5191_p7 = por %p5190_p6, %p5189_p5 }
0x36da   :  { %p5192_p8 = pnand %p5191_p7, %p5185_p4 }
0x36dc   :  { %5195 = shalt.err (!%p5192_p8)
}
0x36dd   :  { %s5196_s15 = scalar_lea.hbm %s6097_s16, 16 }
0x36de   :  { %p5197_p9 = scmp.ne.s32.totalorder %s6097_s16, %s5196_s15  ;;  %p5200_p10 = scmp.lt.u32.totalorder %s5196_s15, %s6097_s16 }
0x36e0   :  { %p5202_p11 = pnand %p5200_p10, %p5197_p9 }
0x36e2   :  { %5205 = shalt.err (!%p5202_p11)
}
0x36e3   :  { %3930 = dma.vmem_to_hbm [thread:$0]  %s6049_s26, 16, %s6097_s16, [#allocation7]  }
0x36e4   :  { %5210 = dma.done.wait [#allocation7], 16  }
0x36e5   :  { %5211 = vsyncadd [#allocation7], 4294967280 }
0x36e6   :  { %5212 = dma.done.wait [#allocation13], 16  }
0x36e7   :  { %5213 = vsyncadd [#allocation13], 4294967280 }
0x36e8   :  { %3947 = vsyncpa [#allocation6], 1 }
0x36e9   :  { %3948 = vsyncpa [#allocation9], 1 }
0x36ea   :  { %3949 = vsyncpa [#allocation7], 1 }
0x36eb   :  { %3950 = vsyncpa [#allocation13], 1 }

</bundles_post_ra>
